<compile_context>
chip_gen: v7x
topology: tpu7x:2x2x1
jax: 0.10.0
libtpu: 0.0.40
codegen_flags: <defaults>
</compile_context>

<pallas_src>
import math
from functools import partial

import jax
import jax.numpy as jnp
from jax.experimental import pallas as pl
from jax.experimental.pallas import tpu as pltpu


def _round_up(x, m):
    return (x + m - 1) // m * m


# ---------------------------------------------------------------------------
# Kernel 1: 3x3 conv as 3 wide-K MXU matmuls + per-channel batch statistics.
# Grid: (n_chunks 'parallel', images-per-chunk 'arbitrary'); one image / step.
# ---------------------------------------------------------------------------
def conv_stats_kernel(x_ref, w_ref, y_ref, sum_ref, ssq_ref, *, wp8, w_real):
    """
    x_ref:   (r_in, cin_p)        zero-padded image, flattened rows of width wp8
                                  (+8 bottom guard rows)
    w_ref:   (3, 3*cin_p, c_pad)  per-kh weights, K axis ordered (kw, cin)
    y_ref:   (nr, c_pad)          conv output rows (nr = H*wp8), bf16
    sum_ref: (1, 8, c_pad)        per-chunk running channel sum   (grid-carried)
    ssq_ref: (1, 8, c_pad)        per-chunk running channel sum^2 (grid-carried)
    """
    nr, c_pad = y_ref.shape
    lc = nr + 2 * wp8                       # rows needed by the kh-shifted matmuls

    # Build the kw-shifted copies ONCE in VMEM; concatenate along the
    # contraction axis so each matmul has K = 3*cin_p (only 2 unaligned
    # sublane shifts per image instead of 6-8).
    xc = jnp.concatenate([x_ref[kw:kw + lc, :] for kw in range(3)], axis=-1)

    # kh row offsets are multiples of wp8 (a multiple of 8) -> sublane aligned.
    acc = jnp.dot(xc[0:nr, :], w_ref[0], preferred_element_type=jnp.float32)
    acc = acc + jnp.dot(xc[wp8:wp8 + nr, :], w_ref[1],
                        preferred_element_type=jnp.float32)
    acc = acc + jnp.dot(xc[2 * wp8:2 * wp8 + nr, :], w_ref[2],
                        preferred_element_type=jnp.float32)

    # Interior-column mask computed in-kernel (no HBM mask input); all stored
    # rows are interior rows by construction.
    col = jax.lax.broadcasted_iota(jnp.int32, (nr, 1), 0) % wp8
    ym = acc * (col < w_real).astype(jnp.float32)

    y_ref[...] = ym.astype(y_ref.dtype)

    @pl.when(pl.program_id(1) == 0)
    def _init():
        sum_ref[...] = jnp.zeros_like(sum_ref)
        ssq_ref[...] = jnp.zeros_like(ssq_ref)

    s1 = jnp.sum(ym, axis=0, keepdims=True)[None]          # (1, 1, c_pad)
    s2 = jnp.sum(ym * ym, axis=0, keepdims=True)[None]
    sum_ref[...] = sum_ref[...] + jnp.broadcast_to(s1, sum_ref.shape)
    ssq_ref[...] = ssq_ref[...] + jnp.broadcast_to(s2, ssq_ref.shape)


# ---------------------------------------------------------------------------
# Kernel 2: folded BN affine + exact GELU. Reads bf16 y tiles, computes in f32,
# writes only real pixels / real channels: (N*H, W, C_out).
# ---------------------------------------------------------------------------
def bn_gelu_kernel(y_ref, scale_ref, shift_ref, o_ref, *, w_real, c_out):
    z = y_ref[:, :w_real, :].astype(jnp.float32)
    z = z * scale_ref[...] + shift_ref[...]
    g = 0.5 * z * (1.0 + jax.lax.erf(z * (1.0 / math.sqrt(2.0))))
    o_ref[...] = g[:, :, :c_out]


@partial(jax.jit, static_argnames=("use_bf16_matmul",))
def conv_bn_relu_forward(x_nchw, weight, bias, gamma, beta, *, use_bf16_matmul=True):
    """ConvBNRelu forward.  x: (N,C_in,H,W); weight: (C_out,C_in,3,3)."""
    del bias  # conv bias cancels exactly under training-mode BatchNorm
    N, C_in, H, W = x_nchw.shape
    C_out = weight.shape[0]

    cin_p = _round_up(C_in, 8)
    c_pad = _round_up(C_out, 128)          # lane-dense conv-output channels
    wp8 = _round_up(W + 2, 8)              # padded row stride (multiple of 8)
    nr = H * wp8                           # conv-output rows per image
    r_in = (H + 2) * wp8 + 8               # padded input rows + bottom guard
    mm_dtype = jnp.bfloat16 if use_bf16_matmul else jnp.float32
    bpe = 2 if use_bf16_matmul else 4

    # ---- input prep (input-sized copies only; no im2col expansion) ---------
    x = jnp.transpose(x_nchw.astype(jnp.float32), (0, 2, 3, 1))          # NHWC
    x = jnp.pad(x, ((0, 0), (1, 1), (1, wp8 - W - 1), (0, cin_p - C_in)))
    x = x.reshape(N, (H + 2) * wp8, cin_p)
    x = jnp.pad(x, ((0, 0), (0, 8), (0, 0))).astype(mm_dtype)            # (N, r_in, cin_p)

    # weights: (C_out, C_in, 3, 3) -> (3, 3*cin_p, c_pad), K axis = (kw, cin)
    wt = jnp.transpose(weight.astype(jnp.float32), (2, 3, 1, 0))         # (kh,kw,ci,co)
    wt = jnp.pad(wt, ((0, 0), (0, 0), (0, cin_p - C_in), (0, c_pad - C_out)))
    wt = wt.reshape(3, 3 * cin_p, c_pad).astype(mm_dtype)

    # megacore split: outer 'parallel' chunks own private stat partials
    n_chunks = 2 if (N >= 2 and N % 2 == 0) else 1
    per_chunk = N // n_chunks

    vmem1 = int(min(max(
        2 * r_in * cin_p * bpe                 # x block, double-buffered
        + 2 * nr * c_pad * 2                   # bf16 y block, double-buffered
        + (nr + 2 * wp8) * 3 * cin_p * bpe     # kw-concat staging
        + nr * c_pad * 4                       # f32 accumulator
        + 3 * 3 * cin_p * c_pad * bpe          # weights
        + (2 << 20), 32 << 20), 100 << 20))

    # ---- phase 1: conv + per-chunk batch-stat partials ----------------------
    y_flat, psum, pssq = pl.pallas_call(
        partial(conv_stats_kernel, wp8=wp8, w_real=W),
        out_shape=(
            jax.ShapeDtypeStruct((N, nr, c_pad), jnp.bfloat16),
            jax.ShapeDtypeStruct((n_chunks, 8, c_pad), jnp.float32),
            jax.ShapeDtypeStruct((n_chunks, 8, c_pad), jnp.float32),
        ),
        grid=(n_chunks, per_chunk),
        in_specs=[
            pl.BlockSpec((None, r_in, cin_p),
                         lambda c, i: (c * per_chunk + i, 0, 0)),
            pl.BlockSpec((3, 3 * cin_p, c_pad), lambda c, i: (0, 0, 0)),
        ],
        out_specs=(
            pl.BlockSpec((None, nr, c_pad),
                         lambda c, i: (c * per_chunk + i, 0, 0)),
            pl.BlockSpec((1, 8, c_pad), lambda c, i: (c, 0, 0)),
            pl.BlockSpec((1, 8, c_pad), lambda c, i: (c, 0, 0)),
        ),
        compiler_params=pltpu.CompilerParams(
            dimension_semantics=("parallel", "arbitrary"),
            vmem_limit_bytes=vmem1),
    )(x, wt)

    # ---- tiny per-channel BN fold (O(C) work, plain JAX) --------------------
    # TODO(synk): E[x^2]-E[x]^2 is kept for simplicity; switch to Welford-style
    # partial-mean merging if a tighter-than-5e-2 tolerance is ever required.
    count = jnp.float32(N * H * W)
    ssum = psum[:, 0, :].sum(axis=0)
    ssq = pssq[:, 0, :].sum(axis=0)
    mean = ssum / count
    var = jnp.maximum(ssq / count - mean * mean, 0.0)      # biased var (training BN)
    gamma_p = jnp.pad(gamma.astype(jnp.float32), (0, c_pad - C_out))
    beta_p = jnp.pad(beta.astype(jnp.float32), (0, c_pad - C_out))
    scale_v = gamma_p * jax.lax.rsqrt(var + 1e-3)
    shift_v = beta_p - mean * scale_v
    scale = scale_v.reshape(1, 1, c_pad)
    shift = shift_v.reshape(1, 1, c_pad)

    # ---- phase 2: BN affine + exact GELU; HBM write is (N*H, W, C_out) ------
    n_rows = N * H
    y2 = y_flat.reshape(n_rows, wp8, c_pad)                 # free reshape
    tile_r = min(n_rows, max(8, (4 << 20) // (wp8 * c_pad * 2)))
    vmem2 = int(min(max(6 * tile_r * wp8 * c_pad * 2, 8 << 20), 64 << 20))

    out3 = pl.pallas_call(
        partial(bn_gelu_kernel, w_real=W, c_out=C_out),
        out_shape=jax.ShapeDtypeStruct((n_rows, W, C_out), jnp.float32),
        grid=(pl.cdiv(n_rows, tile_r),),
        in_specs=[
            pl.BlockSpec((tile_r, wp8, c_pad), lambda i: (i, 0, 0)),
            pl.BlockSpec((1, 1, c_pad), lambda i: (0, 0, 0)),
            pl.BlockSpec((1, 1, c_pad), lambda i: (0, 0, 0)),
        ],
        out_specs=pl.BlockSpec((tile_r, W, C_out), lambda i: (i, 0, 0)),
        compiler_params=pltpu.CompilerParams(
            dimension_semantics=("parallel",),
            vmem_limit_bytes=vmem2),
    )(y2, scale, shift)

    # NCHW for PyTorch API parity.  This transpose is the only remaining
    # epilogue HBM pass; NHWC consumers can take `out3.reshape(N,H,W,C_out)`.
    out = out3.reshape(N, H, W, C_out)
    return jnp.transpose(out, (0, 3, 1, 2))


# ---------------------------------------------------------------------------
# Pure-JAX reference (matches the PyTorch module's forward semantics).
# ---------------------------------------------------------------------------
def _reference(x, weight, bias, gamma, beta):
    y = jax.lax.conv_general_dilated(
        x, weight, window_strides=(1, 1), padding=((1, 1), (1, 1)),
        dimension_numbers=("NCHW", "OIHW", "NCHW"),
        precision=jax.lax.Precision.HIGHEST)
    y = y + bias.reshape(1, -1, 1, 1)
    mean = jnp.mean(y, axis=(0, 2, 3), keepdims=True)
    var = jnp.mean((y - mean) ** 2, axis=(0, 2, 3), keepdims=True)
    ybn = (y - mean) * jax.lax.rsqrt(var + 1e-3) * gamma.reshape(1, -1, 1, 1) \
          + beta.reshape(1, -1, 1, 1)
    return 0.5 * ybn * (1.0 + jax.lax.erf(ybn * (1.0 / math.sqrt(2.0))))


if __name__ == "__main__":
    key = jax.random.PRNGKey(0)
    k_x, k_w, k_b, k_g, k_be = jax.random.split(key, 5)

    N, C_in, H, W = 2, 4, 16, 16
    C_out = 8

    x = jax.random.normal(k_x, (N, C_in, H, W), dtype=jnp.float32)

    fan_in = C_in * 3 * 3
    bound = 1.0 / math.sqrt(fan_in)
    weight = jax.random.uniform(k_w, (C_out, C_in, 3, 3), jnp.float32, -bound, bound)
    bias = jax.random.uniform(k_b, (C_out,), jnp.float32, -bound, bound)
    gamma = 1.0 + 0.1 * jax.random.normal(k_g, (C_out,), jnp.float32)
    beta = 0.1 * jax.random.normal(k_be, (C_out,), jnp.float32)

    out = conv_bn_relu_forward(x, weight, bias, gamma, beta)
    jax.block_until_ready(out)

    assert out.shape == (N, C_out, H, W)
    assert bool(jnp.all(jnp.isfinite(out)))

    ref = _reference(x, weight, bias, gamma, beta)
    max_err = float(jnp.max(jnp.abs(out - ref)))
    assert max_err < 5e-2, f"max abs err vs reference: {max_err}"

    print("KERNEL_OK")
</pallas_src>

<mosaic_0001>
module attributes {stable_mosaic.version = 11 : i64} {
  func.func @conv_stats_kernel(%arg0: i32, %arg1: i32, %arg2: memref<1x440x8xbf16, #tpu.memory_space<vmem>>, %arg3: memref<3x24x128xbf16, #tpu.memory_space<vmem>>, %arg4: memref<1x384x128xbf16, #tpu.memory_space<vmem>>, %arg5: memref<1x8x128xf32, #tpu.memory_space<vmem>>, %arg6: memref<1x8x128xf32, #tpu.memory_space<vmem>>) attributes {dimension_semantics = [#tpu.dimension_semantics<parallel>, #tpu.dimension_semantics<arbitrary>], iteration_bounds = array<i64: 2, 1>, scalar_prefetch = 0 : i64, scratch_operands = 0 : i64, tpu.core_type = #tpu.core_type<tc>, window_params = [{transform_indices = @transform_0, window_bounds = array<i64: 1, 440, 8>}, {pipeline_mode = #tpu.pipeline_mode<synchronous>, transform_indices = @transform_1, window_bounds = array<i64: 3, 24, 128>}, {transform_indices = @transform_2, window_bounds = array<i64: 1, 384, 128>}, {transform_indices = @transform_3, window_bounds = array<i64: 1, 8, 128>}, {transform_indices = @transform_4, window_bounds = array<i64: 1, 8, 128>}]} {
    %c0 = arith.constant 0 : index
    %c0_0 = arith.constant 0 : index
    %c0_1 = arith.constant 0 : index
    %0 = vector.load %arg2[%c0, %c0_0, %c0_1] : memref<1x440x8xbf16, #tpu.memory_space<vmem>>, vector<1x432x8xbf16>
    %1 = vector.shape_cast %0 : vector<1x432x8xbf16> to vector<432x8xbf16>
    %c0_2 = arith.constant 0 : index
    %c1 = arith.constant 1 : index
    %c0_3 = arith.constant 0 : index
    %2 = vector.load %arg2[%c0_2, %c1, %c0_3] : memref<1x440x8xbf16, #tpu.memory_space<vmem>>, vector<1x432x8xbf16>
    %3 = vector.shape_cast %2 : vector<1x432x8xbf16> to vector<432x8xbf16>
    %c0_4 = arith.constant 0 : index
    %c2 = arith.constant 2 : index
    %c0_5 = arith.constant 0 : index
    %4 = vector.load %arg2[%c0_4, %c2, %c0_5] : memref<1x440x8xbf16, #tpu.memory_space<vmem>>, vector<1x432x8xbf16>
    %5 = vector.shape_cast %4 : vector<1x432x8xbf16> to vector<432x8xbf16>
    %6 = tpu.concatenate %1, %3, %5 in 1 : vector<432x8xbf16>, vector<432x8xbf16>, vector<432x8xbf16> -> vector<432x24xbf16>
    %7 = vector.extract_strided_slice %6 {offsets = [0, 0], sizes = [384, 24], strides = [1, 1]} : vector<432x24xbf16> to vector<384x24xbf16>
    %c0_6 = arith.constant 0 : index
    %c0_7 = arith.constant 0 : index
    %c0_8 = arith.constant 0 : index
    %8 = vector.load %arg3[%c0_6, %c0_7, %c0_8] : memref<3x24x128xbf16, #tpu.memory_space<vmem>>, vector<1x24x128xbf16>
    %9 = vector.shape_cast %8 : vector<1x24x128xbf16> to vector<24x128xbf16>
    %cst = arith.constant dense<0.000000e+00> : vector<384x128xf32>
    %10 = tpu.matmul %7, %9, %cst {dimension_numbers = #tpu.dot_dimension_numbers<[1], [0], [0], [1], [0, 0, 1, 1], [], []>} : vector<384x24xbf16>, vector<24x128xbf16>, vector<384x128xf32> -> vector<384x128xf32>
    %11 = vector.extract_strided_slice %6 {offsets = [24, 0], sizes = [384, 24], strides = [1, 1]} : vector<432x24xbf16> to vector<384x24xbf16>
    %c1_9 = arith.constant 1 : index
    %c0_10 = arith.constant 0 : index
    %c0_11 = arith.constant 0 : index
    %12 = vector.load %arg3[%c1_9, %c0_10, %c0_11] : memref<3x24x128xbf16, #tpu.memory_space<vmem>>, vector<1x24x128xbf16>
    %13 = vector.shape_cast %12 : vector<1x24x128xbf16> to vector<24x128xbf16>
    %cst_12 = arith.constant dense<0.000000e+00> : vector<384x128xf32>
    %14 = tpu.matmul %11, %13, %cst_12 {dimension_numbers = #tpu.dot_dimension_numbers<[1], [0], [0], [1], [0, 0, 1, 1], [], []>} : vector<384x24xbf16>, vector<24x128xbf16>, vector<384x128xf32> -> vector<384x128xf32>
    %15 = arith.addf %10, %14 : vector<384x128xf32>
    %16 = vector.extract_strided_slice %6 {offsets = [48, 0], sizes = [384, 24], strides = [1, 1]} : vector<432x24xbf16> to vector<384x24xbf16>
    %c2_13 = arith.constant 2 : index
    %c0_14 = arith.constant 0 : index
    %c0_15 = arith.constant 0 : index
    %17 = vector.load %arg3[%c2_13, %c0_14, %c0_15] : memref<3x24x128xbf16, #tpu.memory_space<vmem>>, vector<1x24x128xbf16>
    %18 = vector.shape_cast %17 : vector<1x24x128xbf16> to vector<24x128xbf16>
    %cst_16 = arith.constant dense<0.000000e+00> : vector<384x128xf32>
    %19 = tpu.matmul %16, %18, %cst_16 {dimension_numbers = #tpu.dot_dimension_numbers<[1], [0], [0], [1], [0, 0, 1, 1], [], []>} : vector<384x24xbf16>, vector<24x128xbf16>, vector<384x128xf32> -> vector<384x128xf32>
    %20 = arith.addf %15, %19 : vector<384x128xf32>
    %21 = tpu.iota {dimensions = array<i32: 0>} : vector<384x1xi32>
    %c24_i32 = arith.constant 24 : i32
    %c0_i32 = arith.constant 0 : i32
    %22 = arith.cmpi eq, %c24_i32, %c0_i32 : i32
    %c1_i32 = arith.constant 1 : i32
    %23 = arith.select %22, %c1_i32, %c24_i32 : i32
    %24 = vector.broadcast %23 : i32 to vector<384x1xi32>
    %25 = arith.remsi %21, %24 : vector<384x1xi32>
    %c0_i32_17 = arith.constant 0 : i32
    %26 = vector.broadcast %c0_i32_17 : i32 to vector<384x1xi32>
    %27 = arith.cmpi ne, %25, %26 : vector<384x1xi32>
    %c0_i32_18 = arith.constant 0 : i32
    %28 = vector.broadcast %c0_i32_18 : i32 to vector<384x1xi32>
    %29 = arith.cmpi slt, %25, %28 : vector<384x1xi32>
    %c0_i32_19 = arith.constant 0 : i32
    %30 = arith.cmpi slt, %23, %c0_i32_19 : i32
    %31 = vector.broadcast %30 : i1 to vector<384x1xi1>
    %32 = vector.broadcast %31 : vector<384x1xi1> to vector<384x1xi1>
    %33 = arith.xori %29, %32 : vector<384x1xi1>
    %34 = arith.andi %33, %27 : vector<384x1xi1>
    %35 = vector.broadcast %23 : i32 to vector<384x1xi32>
    %36 = arith.addi %25, %35 : vector<384x1xi32>
    %37 = arith.select %34, %36, %25 : vector<384x1xi1>, vector<384x1xi32>
    %c16_i32 = arith.constant 16 : i32
    %38 = vector.broadcast %c16_i32 : i32 to vector<384x1xi32>
    %39 = arith.cmpi slt, %37, %38 : vector<384x1xi32>
    %40 = arith.extui %39 : vector<384x1xi1> to vector<384x1xi32>
    %41 = arith.sitofp %40 : vector<384x1xi32> to vector<384x1xf32>
    %42 = vector.broadcast %41 : vector<384x1xf32> to vector<384x128xf32>
    %43 = arith.mulf %20, %42 : vector<384x128xf32>
    %44 = arith.truncf %43 : vector<384x128xf32> to vector<384x128xbf16>
    %c0_20 = arith.constant 0 : index
    %c0_21 = arith.constant 0 : index
    %c0_22 = arith.constant 0 : index
    %45 = vector.load %arg4[%c0_20, %c0_21, %c0_22] : memref<1x384x128xbf16, #tpu.memory_space<vmem>>, vector<1x384x128xbf16>
    %46 = vector.shape_cast %45 : vector<1x384x128xbf16> to vector<384x128xbf16>
    %47 = vector.shape_cast %44 : vector<384x128xbf16> to vector<1x384x128xbf16>
    tpu.vector_store %arg4[%c0_20, %c0_21, %c0_22], %47 {strides = array<i32>} : memref<1x384x128xbf16, #tpu.memory_space<vmem>>, vector<1x384x128xbf16>,
    %c0_i32_23 = arith.constant 0 : i32
    %48 = arith.cmpi eq, %arg1, %c0_i32_23 : i32
    %49 = arith.extui %48 : i1 to i32
    %c0_i32_24 = arith.constant 0 : i32
    %50 = arith.cmpi ne, %49, %c0_i32_24 : i32
    scf.if %50 {
      %cst_39 = arith.constant 0.000000e+00 : f32
      %68 = vector.broadcast %cst_39 : f32 to vector<1x8x128xf32>
      %c0_40 = arith.constant 0 : index
      %c0_41 = arith.constant 0 : index
      %c0_42 = arith.constant 0 : index
      %69 = vector.load %arg5[%c0_40, %c0_41, %c0_42] : memref<1x8x128xf32, #tpu.memory_space<vmem>>, vector<1x8x128xf32>
      tpu.vector_store %arg5[%c0_40, %c0_41, %c0_42], %68 {strides = array<i32>} : memref<1x8x128xf32, #tpu.memory_space<vmem>>, vector<1x8x128xf32>,
      %cst_43 = arith.constant 0.000000e+00 : f32
      %70 = vector.broadcast %cst_43 : f32 to vector<1x8x128xf32>
      %c0_44 = arith.constant 0 : index
      %c0_45 = arith.constant 0 : index
      %c0_46 = arith.constant 0 : index
      %71 = vector.load %arg6[%c0_44, %c0_45, %c0_46] : memref<1x8x128xf32, #tpu.memory_space<vmem>>, vector<1x8x128xf32>
      tpu.vector_store %arg6[%c0_44, %c0_45, %c0_46], %70 {strides = array<i32>} : memref<1x8x128xf32, #tpu.memory_space<vmem>>, vector<1x8x128xf32>,
    } else {
    }
    %cst_25 = arith.constant dense<0.000000e+00> : vector<128xf32>
    %51 = vector.multi_reduction <add>, %43, %cst_25 [0] : vector<384x128xf32> to vector<128xf32>
    %52 = vector.shape_cast %51 : vector<128xf32> to vector<1x128xf32>
    %53 = vector.shape_cast %52 : vector<1x128xf32> to vector<1x1x128xf32>
    %54 = arith.mulf %43, %43 : vector<384x128xf32>
    %cst_26 = arith.constant dense<0.000000e+00> : vector<128xf32>
    %55 = vector.multi_reduction <add>, %54, %cst_26 [0] : vector<384x128xf32> to vector<128xf32>
    %56 = vector.shape_cast %55 : vector<128xf32> to vector<1x128xf32>
    %57 = vector.shape_cast %56 : vector<1x128xf32> to vector<1x1x128xf32>
    %c0_27 = arith.constant 0 : index
    %c0_28 = arith.constant 0 : index
    %c0_29 = arith.constant 0 : index
    %58 = vector.load %arg5[%c0_27, %c0_28, %c0_29] : memref<1x8x128xf32, #tpu.memory_space<vmem>>, vector<1x8x128xf32>
    %59 = vector.shape_cast %53 : vector<1x1x128xf32> to vector<1x1x128xf32>
    %60 = vector.broadcast %59 : vector<1x1x128xf32> to vector<1x8x128xf32>
    %61 = arith.addf %58, %60 : vector<1x8x128xf32>
    %c0_30 = arith.constant 0 : index
    %c0_31 = arith.constant 0 : index
    %c0_32 = arith.constant 0 : index
    %62 = vector.load %arg5[%c0_30, %c0_31, %c0_32] : memref<1x8x128xf32, #tpu.memory_space<vmem>>, vector<1x8x128xf32>
    tpu.vector_store %arg5[%c0_30, %c0_31, %c0_32], %61 {strides = array<i32>} : memref<1x8x128xf32, #tpu.memory_space<vmem>>, vector<1x8x128xf32>,
    %c0_33 = arith.constant 0 : index
    %c0_34 = arith.constant 0 : index
    %c0_35 = arith.constant 0 : index
    %63 = vector.load %arg6[%c0_33, %c0_34, %c0_35] : memref<1x8x128xf32, #tpu.memory_space<vmem>>, vector<1x8x128xf32>
    %64 = vector.shape_cast %57 : vector<1x1x128xf32> to vector<1x1x128xf32>
    %65 = vector.broadcast %64 : vector<1x1x128xf32> to vector<1x8x128xf32>
    %66 = arith.addf %63, %65 : vector<1x8x128xf32>
    %c0_36 = arith.constant 0 : index
    %c0_37 = arith.constant 0 : index
    %c0_38 = arith.constant 0 : index
    %67 = vector.load %arg6[%c0_36, %c0_37, %c0_38] : memref<1x8x128xf32, #tpu.memory_space<vmem>>, vector<1x8x128xf32>
    tpu.vector_store %arg6[%c0_36, %c0_37, %c0_38], %66 {strides = array<i32>} : memref<1x8x128xf32, #tpu.memory_space<vmem>>, vector<1x8x128xf32>,
    return
  }
  func.func @transform_0(%arg0: i32, %arg1: i32) -> (i32, i32, i32) {
    %c1_i32 = arith.constant 1 : i32
    %0 = arith.muli %arg0, %c1_i32 : i32
    %1 = arith.addi %0, %arg1 : i32
    %c0_i32 = arith.constant 0 : i32
    %c0_i32_0 = arith.constant 0 : i32
    %c0_i32_1 = arith.constant 0 : i32
    return %1, %c0_i32, %c0_i32_0 : i32, i32, i32
  }
  func.func @transform_1(%arg0: i32, %arg1: i32) -> (i32, i32, i32) {
    %c0_i32 = arith.constant 0 : i32
    %c0_i32_0 = arith.constant 0 : i32
    %c0_i32_1 = arith.constant 0 : i32
    %c0_i32_2 = arith.constant 0 : i32
    return %c0_i32, %c0_i32_0, %c0_i32_1 : i32, i32, i32
  }
  func.func @transform_2(%arg0: i32, %arg1: i32) -> (i32, i32, i32) {
    %c1_i32 = arith.constant 1 : i32
    %0 = arith.muli %arg0, %c1_i32 : i32
    %1 = arith.addi %0, %arg1 : i32
    %c0_i32 = arith.constant 0 : i32
    %c0_i32_0 = arith.constant 0 : i32
    %c0_i32_1 = arith.constant 0 : i32
    return %1, %c0_i32, %c0_i32_0 : i32, i32, i32
  }
  func.func @transform_3(%arg0: i32, %arg1: i32) -> (i32, i32, i32) {
    %c0_i32 = arith.constant 0 : i32
    %c0_i32_0 = arith.constant 0 : i32
    %c0_i32_1 = arith.constant 0 : i32
    return %arg0, %c0_i32, %c0_i32_0 : i32, i32, i32
  }
  func.func @transform_4(%arg0: i32, %arg1: i32) -> (i32, i32, i32) {
    %c0_i32 = arith.constant 0 : i32
    %c0_i32_0 = arith.constant 0 : i32
    %c0_i32_1 = arith.constant 0 : i32
    return %arg0, %c0_i32, %c0_i32_0 : i32, i32, i32
  }
}

module attributes {stable_mosaic.version = 11 : i64} {
  func.func @bn_gelu_kernel(%arg0: i32, %arg1: memref<32x24x128xbf16, #tpu.memory_space<vmem>>, %arg2: memref<1x1x128xf32, #tpu.memory_space<vmem>>, %arg3: memref<1x1x128xf32, #tpu.memory_space<vmem>>, %arg4: memref<32x16x8xf32, #tpu.memory_space<vmem>>) attributes {dimension_semantics = [#tpu.dimension_semantics<parallel>], iteration_bounds = array<i64: 1>, scalar_prefetch = 0 : i64, scratch_operands = 0 : i64, tpu.core_type = #tpu.core_type<tc>, window_params = [{transform_indices = @transform_0, window_bounds = array<i64: 32, 24, 128>}, {pipeline_mode = #tpu.pipeline_mode<synchronous>, transform_indices = @transform_1, window_bounds = array<i64: 1, 1, 128>}, {pipeline_mode = #tpu.pipeline_mode<synchronous>, transform_indices = @transform_2, window_bounds = array<i64: 1, 1, 128>}, {transform_indices = @transform_3, window_bounds = array<i64: 32, 16, 8>}]} {
    %c0 = arith.constant 0 : index
    %c0_0 = arith.constant 0 : index
    %c0_1 = arith.constant 0 : index
    %0 = vector.load %arg1[%c0, %c0_0, %c0_1] : memref<32x24x128xbf16, #tpu.memory_space<vmem>>, vector<32x16x128xbf16>
    %1 = arith.extf %0 : vector<32x16x128xbf16> to vector<32x16x128xf32>
    %c0_2 = arith.constant 0 : index
    %c0_3 = arith.constant 0 : index
    %c0_4 = arith.constant 0 : index
    %2 = vector.load %arg2[%c0_2, %c0_3, %c0_4] : memref<1x1x128xf32, #tpu.memory_space<vmem>>, vector<1x1x128xf32>
    %3 = vector.broadcast %2 : vector<1x1x128xf32> to vector<32x16x128xf32>
    %4 = arith.mulf %1, %3 : vector<32x16x128xf32>
    %c0_5 = arith.constant 0 : index
    %c0_6 = arith.constant 0 : index
    %c0_7 = arith.constant 0 : index
    %5 = vector.load %arg3[%c0_5, %c0_6, %c0_7] : memref<1x1x128xf32, #tpu.memory_space<vmem>>, vector<1x1x128xf32>
    %6 = vector.broadcast %5 : vector<1x1x128xf32> to vector<32x16x128xf32>
    %7 = arith.addf %4, %6 : vector<32x16x128xf32>
    %cst = arith.constant 5.000000e-01 : f32
    %8 = vector.broadcast %cst : f32 to vector<32x16x128xf32>
    %9 = arith.mulf %8, %7 : vector<32x16x128xf32>
    %cst_8 = arith.constant 0.707106769 : f32
    %10 = vector.broadcast %cst_8 : f32 to vector<32x16x128xf32>
    %11 = arith.mulf %7, %10 : vector<32x16x128xf32>
    %12 = math.erf %11 : vector<32x16x128xf32>
    %cst_9 = arith.constant 1.000000e+00 : f32
    %13 = vector.broadcast %cst_9 : f32 to vector<32x16x128xf32>
    %14 = arith.addf %13, %12 : vector<32x16x128xf32>
    %15 = arith.mulf %9, %14 : vector<32x16x128xf32>
    %16 = vector.extract_strided_slice %15 {offsets = [0, 0, 0], sizes = [32, 16, 8], strides = [1, 1, 1]} : vector<32x16x128xf32> to vector<32x16x8xf32>
    %c0_10 = arith.constant 0 : index
    %c0_11 = arith.constant 0 : index
    %c0_12 = arith.constant 0 : index
    %17 = vector.load %arg4[%c0_10, %c0_11, %c0_12] : memref<32x16x8xf32, #tpu.memory_space<vmem>>, vector<32x16x8xf32>
    tpu.vector_store %arg4[%c0_10, %c0_11, %c0_12], %16 {strides = array<i32>} : memref<32x16x8xf32, #tpu.memory_space<vmem>>, vector<32x16x8xf32>,
    return
  }
  func.func @transform_0(%arg0: i32) -> (i32, i32, i32) {
    %c0_i32 = arith.constant 0 : i32
    %c0_i32_0 = arith.constant 0 : i32
    %c0_i32_1 = arith.constant 0 : i32
    return %arg0, %c0_i32, %c0_i32_0 : i32, i32, i32
  }
  func.func @transform_1(%arg0: i32) -> (i32, i32, i32) {
    %c0_i32 = arith.constant 0 : i32
    %c0_i32_0 = arith.constant 0 : i32
    %c0_i32_1 = arith.constant 0 : i32
    %c0_i32_2 = arith.constant 0 : i32
    return %c0_i32, %c0_i32_0, %c0_i32_1 : i32, i32, i32
  }
  func.func @transform_2(%arg0: i32) -> (i32, i32, i32) {
    %c0_i32 = arith.constant 0 : i32
    %c0_i32_0 = arith.constant 0 : i32
    %c0_i32_1 = arith.constant 0 : i32
    %c0_i32_2 = arith.constant 0 : i32
    return %c0_i32, %c0_i32_0, %c0_i32_1 : i32, i32, i32
  }
  func.func @transform_3(%arg0: i32) -> (i32, i32, i32) {
    %c0_i32 = arith.constant 0 : i32
    %c0_i32_0 = arith.constant 0 : i32
    %c0_i32_1 = arith.constant 0 : i32
    return %arg0, %c0_i32, %c0_i32_0 : i32, i32, i32
  }
}

</mosaic_0001>

<bundles_post_ra>
// kernel: conv_bn_relu_forward.3
= control target key start
LH: loop header
LB: loop body
LE: loop exit
PB: predicated region body
PF: predicated region fallthrough
CT: control target
= control target key end

     0   :  { %vm604_vm0 = vcmask 64512   ;;  %s1485_s0 = inlined_call_operand.vmem [shape: bf16[32,24,128], index: 0, kind: input, shape index: {}]   ;;  %s1486_s1 = inlined_call_operand.vmem [shape: f32[1,1,128], index: 1, kind: input, shape index: {}]   ;;  %s1487_s2 = inlined_call_operand.vmem [shape: f32[1,1,128], index: 2, kind: input, shape index: {}]   ;;  %s1488_s3 = inlined_call_operand.vmem [shape: f32[32,16,8], index: 3, kind: output, shape index: {}]  }
   0x1   :  { %v676_v0 = vld [vmem:[%s1485_s0] sm:$0xff]   ;;  %v16_v4 = vld [vmem:[%s1485_s0 + $0xc] sm:$0xff]   ;;  %v739_v5 = vld [vmem:[%s1485_s0 + $0x18] sm:$0xff]  }
   0x2   :  { %v910_v1 = vld [vmem:[%s1486_s1] ss:$0 sm:$0xff]  ;;  %v677_v2 = vunpack.c.l.bf16 %v676_v0  ;;  %v678_v3 = vunpack.c.h.bf16 %v676_v0  ;;  %v20_v6 = vld [vmem:[%s1485_s0 + $0x24] sm:$0xff]   ;;  %v80_v8 = vunpack.c.l.bf16 %v16_v4  ;;  %v81_v9 = vunpack.c.h.bf16 %v16_v4  ;;  %v740_v32 = vld [vmem:[%s1485_s0 + $0x30] sm:$0xff]  }
   0x3   :  { %v924_v7 = vld [vmem:[%s1487_s2] ss:$0 sm:$0xff]  ;;  %v681_v10 = vunpack.c.l.bf16 %v739_v5  ;;  %v682_v11 = vunpack.c.h.bf16 %v739_v5  ;;  %v84_v14 = vunpack.c.l.bf16 %v20_v6  ;;  %v85_v15 = vunpack.c.h.bf16 %v20_v6  ;;  %v741_v43 = vld [vmem:[%s1485_s0 + $0x48] sm:$0xff]   ;;  %v28_v59 = vld [vmem:[%s1485_s0 + $0x54] sm:$0xff]  }
   0x4   :  { %v149_v12 = vmul.f32 %v677_v2, %v910_v1  ;;  %v150_v13 = vmul.f32 %v678_v3, %v910_v1  ;;  %v151_v16 = vmul.f32 %v910_v1, %v80_v8  ;;  %v152_v17 = vmul.f32 %v910_v1, %v81_v9  ;;  %v24_v33 = vld [vmem:[%s1485_s0 + $0x3c] sm:$0xff]  }
   0x5   :  { %v153_v18 = vmul.f32 %v681_v10, %v910_v1  ;;  %v154_v19 = vmul.f32 %v682_v11, %v910_v1  ;;  %v155_v22 = vmul.f32 %v910_v1, %v84_v14  ;;  %v156_v23 = vmul.f32 %v910_v1, %v85_v15 }
   0x6   :  { %v220_v20 = vadd.f32 %v924_v7, %v149_v12  ;;  %v221_v21 = vadd.f32 %v924_v7, %v150_v13  ;;  %v222_v24 = vadd.f32 %v924_v7, %v151_v16  ;;  %v223_v25 = vadd.f32 %v924_v7, %v152_v17 }
   0x7   :  { %v224_v26 = vadd.f32 %v924_v7, %v153_v18  ;;  %v225_v27 = vadd.f32 %v924_v7, %v154_v19  ;;  %v226_v38 = vadd.f32 %v924_v7, %v155_v22  ;;  %v227_v39 = vadd.f32 %v924_v7, %v156_v23 }
   0x8   :  { %v348_v28 = vmul.f32 0.70710677, %v220_v20  ;;  %v349_v29 = vmul.f32 0.70710677, %v221_v21  ;;  %v350_v30 = vmul.f32 0.70710677, %v222_v24  ;;  %v685_v40 = vunpack.c.l.bf16 %v740_v32 }
   0x9   :  { %v351_v31 = vmul.f32 0.70710677, %v223_v25  ;;  %v284_v34 = vmul.f32 0.5, %v220_v20  ;;  %v946_v35 = vmul.f32 0.5, %v221_v21  ;;  %v352_v36 = vmul.f32 0.70710677, %v224_v26 }
   0xa   :  { %754 = verf.f32 %v348_v28  ;;  %v353_v37 = vmul.f32 0.70710677, %v225_v27  ;;  %v686_v41 = vunpack.c.h.bf16 %v740_v32  ;;  %v88_v42 = vunpack.c.l.bf16 %v24_v33 }
   0xb   :  { %756 = verf.f32 %v349_v29  ;;  %v286_v44 = vmul.f32 0.5, %v222_v24  ;;  %v953_v45 = vmul.f32 0.5, %v223_v25  ;;  %v354_v46 = vmul.f32 0.70710677, %v226_v38 }
   0xc   :  { %758 = verf.f32 %v350_v30  ;;  %v355_v47 = vmul.f32 0.70710677, %v227_v39  ;;  %v157_v48 = vmul.f32 %v685_v40, %v910_v1  ;;  %v158_v49 = vmul.f32 %v686_v41, %v910_v1  ;;  %v32_v41 = vld [vmem:[%s1485_s0 + $0x6c] sm:$0xff]  }
   0xd   :  { %760 = verf.f32 %v351_v31  ;;  %v159_v50 = vmul.f32 %v910_v1, %v88_v42  ;;  %v89_v51 = vunpack.c.h.bf16 %v24_v33  ;;  %v689_v52 = vunpack.c.l.bf16 %v741_v43 }
   0xe   :  { %762 = verf.f32 %v352_v36  ;;  %v228_v53 = vadd.f32 %v924_v7, %v157_v48  ;;  %v229_v54 = vadd.f32 %v924_v7, %v158_v49  ;;  %v690_v55 = vunpack.c.h.bf16 %v741_v43 }
   0xf   :  { %764 = verf.f32 %v353_v37  ;;  %v230_v56 = vadd.f32 %v924_v7, %v159_v50  ;;  %v160_v57 = vmul.f32 %v910_v1, %v89_v51  ;;  %v161_v58 = vmul.f32 %v689_v52, %v910_v1 }
  0x10   :  { %766 = verf.f32 %v354_v46  ;;  %v288_v60 = vmul.f32 0.5, %v224_v26  ;;  %v289_v61 = vmul.f32 0.5, %v225_v27  ;;  %v356_v62 = vmul.f32 0.70710677, %v228_v53  ;;  %v742_v26 = vld [vmem:[%s1485_s0 + $0x60] sm:$0xff]  }
  0x11   :  { %768 = verf.f32 %v355_v47  ;;  %v357_v63 = vmul.f32 0.70710677, %v229_v54  ;;  %v290_v0 = vmul.f32 0.5, %v226_v38  ;;  %v358_v2 = vmul.f32 0.70710677, %v230_v56 }
  0x12   :  { %v967_v3 = vadd.f32 %v924_v7, %v160_v57  ;;  %v970_v4 = vadd.f32 %v924_v7, %v161_v58  ;;  %v291_v6 = vmul.f32 0.5, %v227_v39  ;;  %770 = verf.f32 %v356_v62 }
  0x13   :  { %v162_v8 = vmul.f32 %v690_v55, %v910_v1  ;;  %v92_v9 = vunpack.c.l.bf16 %v28_v59  ;;  %v973_v12 = vmul.f32 0.5, %v228_v53  ;;  %772 = verf.f32 %v357_v63 }
  0x14   :  { %v755_v5 = vpop.eup %754  ;;  %v359_v13 = vmul.f32 0.70710677, %v967_v3  ;;  %774 = verf.f32 %v358_v2  ;;  %v360_v16 = vmul.f32 0.70710677, %v970_v4  ;;  %v93_v17 = vunpack.c.h.bf16 %v28_v59 }
  0x15   :  { %v757_v10 = vpop.eup %756  ;;  %v476_v11 = vadd.f32 1.0, %v755_v5  ;;  %v978_v21 = vadd.f32 %v924_v7, %v162_v8  ;;  %v163_v25 = vmul.f32 %v910_v1, %v92_v9  ;;  %v293_v30 = vmul.f32 0.5, %v229_v54 }
  0x16   :  { %v759_v14 = vpop.eup %758  ;;  %v477_v15 = vadd.f32 1.0, %v757_v10  ;;  %776 = verf.f32 %v359_v13  ;;  %v164_v36 = vmul.f32 %v910_v1, %v93_v17  ;;  %v693_v40 = vunpack.c.l.bf16 %v742_v26 }
  0x17   :  { %v761_v18 = vpop.eup %760  ;;  %v540_v19 = vmul.f32 %v476_v11, %v284_v34  ;;  %v478_v20 = vadd.f32 1.0, %v759_v14  ;;  %778 = verf.f32 %v360_v16  ;;  %v361_v31 = vmul.f32 0.70710677, %v978_v21 }
  0x18   :  { %v763_v22 = vpop.eup %762  ;;  %v541_v23 = vmul.f32 %v477_v15, %v946_v35  ;;  %v479_v24 = vadd.f32 1.0, %v761_v18  ;;  %v234_v35 = vadd.f32 %v924_v7, %v163_v25  ;;  %v235_v47 = vadd.f32 %v924_v7, %v164_v36 }
  0x19   :  { %v765_v27 = vpop.eup %764  ;;  %605 = vst.msk [vmem:[%s1488_s3] sm:$0xff] %vm604_vm0, %v540_v19  ;;  %v542_v28 = vmul.f32 %v478_v20, %v286_v44  ;;  %v480_v29 = vadd.f32 1.0, %v763_v22  ;;  %780 = verf.f32 %v361_v31  ;;  %v294_v44 = vmul.f32 0.5, %v230_v56  ;;  %v36_v19 = vld [vmem:[%s1485_s0 + $0x84] sm:$0xff]  }
  0x1a   :  { %v767_v32 = vpop.eup %766  ;;  %606 = vst.msk [vmem:[%s1488_s3 + $0x8] sm:$0xff] %vm604_vm0, %v541_v23  ;;  %v543_v33 = vmul.f32 %v479_v24, %v953_v45  ;;  %v481_v34 = vadd.f32 1.0, %v765_v27  ;;  %v362_v45 = vmul.f32 0.70710677, %v234_v35  ;;  %v165_v48 = vmul.f32 %v693_v40, %v910_v1  ;;  %v40_v40 = vld [vmem:[%s1485_s0 + $0x9c] sm:$0xff]  }
  0x1b   :  { %v769_v37 = vpop.eup %768  ;;  %607 = vst.msk [vmem:[%s1488_s3 + $0x10] sm:$0xff] %vm604_vm0, %v542_v28  ;;  %v544_v38 = vmul.f32 %v480_v29, %v288_v60  ;;  %v482_v39 = vadd.f32 1.0, %v767_v32  ;;  %v694_v49 = vunpack.c.h.bf16 %v742_v26  ;;  %v96_v52 = vunpack.c.l.bf16 %v32_v41 }
  0x1c   :  { %608 = vst.msk [vmem:[%s1488_s3 + $0x18] sm:$0xff] %vm604_vm0, %v543_v33  ;;  %v545_v42 = vmul.f32 %v481_v34, %v289_v61  ;;  %v483_v43 = vadd.f32 1.0, %v769_v37  ;;  %v771_v50 = vpop.eup %770  ;;  %782 = verf.f32 %v362_v45  ;;  %v97_v53 = vunpack.c.h.bf16 %v32_v41 }
  0x1d   :  { %609 = vst.msk [vmem:[%s1488_s3 + $0x20] sm:$0xff] %vm604_vm0, %v544_v38  ;;  %v546_v46 = vmul.f32 %v482_v39, %v290_v0  ;;  %v773_v54 = vpop.eup %772  ;;  %v484_v55 = vadd.f32 1.0, %v771_v50  ;;  %v295_v56 = vmul.f32 0.5, %v967_v3  ;;  %v363_v57 = vmul.f32 0.70710677, %v235_v47 }
  0x1e   :  { %610 = vst.msk [vmem:[%s1488_s3 + $0x28] sm:$0xff] %vm604_vm0, %v545_v42  ;;  %v547_v51 = vmul.f32 %v483_v43, %v291_v6  ;;  %v236_v58 = vadd.f32 %v924_v7, %v165_v48  ;;  %v775_v59 = vpop.eup %774  ;;  %v485_v60 = vadd.f32 1.0, %v773_v54  ;;  %v166_v61 = vmul.f32 %v694_v49, %v910_v1 }
  0x1f   :  { %611 = vst.msk [vmem:[%s1488_s3 + $0x30] sm:$0xff] %vm604_vm0, %v546_v46  ;;  %v167_v62 = vmul.f32 %v910_v1, %v96_v52  ;;  %v168_v63 = vmul.f32 %v910_v1, %v97_v53  ;;  %v548_v2 = vmul.f32 %v484_v55, %v973_v12  ;;  %v486_v3 = vadd.f32 1.0, %v775_v59 }
  0x20   :  { %612 = vst.msk [vmem:[%s1488_s3 + $0x38] sm:$0xff] %vm604_vm0, %v547_v51  ;;  %v777_v0 = vpop.eup %776  ;;  %v296_v5 = vmul.f32 0.5, %v970_v4  ;;  %784 = verf.f32 %v363_v57  ;;  %v549_v8 = vmul.f32 %v485_v60, %v293_v30  ;;  %v364_v10 = vmul.f32 0.70710677, %v236_v58  ;;  %v743_v4 = vld [vmem:[%s1485_s0 + $0x78] sm:$0xff]  }
  0x21   :  { %v779_v6 = vpop.eup %778  ;;  %v487_v9 = vadd.f32 1.0, %v777_v0  ;;  %v237_v11 = vadd.f32 %v924_v7, %v166_v61  ;;  %613 = vst.msk [vmem:[%s1488_s3 + $0x40] sm:$0xff] %vm604_vm0, %v548_v2  ;;  %v550_v13 = vmul.f32 %v486_v3, %v294_v44  ;;  %v238_v15 = vadd.f32 %v924_v7, %v167_v62  ;;  %v745_v62 = vld [vmem:[%s1485_s0 + $0xa8] sm:$0xff]  }
  0x22   :  { %v488_v14 = vadd.f32 1.0, %v779_v6  ;;  %v239_v12 = vadd.f32 %v924_v7, %v168_v63  ;;  %614 = vst.msk [vmem:[%s1488_s3 + $0x48] sm:$0xff] %vm604_vm0, %v549_v8  ;;  %v297_v17 = vmul.f32 0.5, %v978_v21  ;;  %786 = verf.f32 %v364_v10  ;;  %v744_v21 = vld [vmem:[%s1485_s0 + $0x90] sm:$0xff]  }
  0x23   :  { %v551_v16 = vmul.f32 %v487_v9, %v295_v56  ;;  %v365_v18 = vmul.f32 0.70710677, %v237_v11  ;;  %v781_v20 = vpop.eup %780  ;;  %615 = vst.msk [vmem:[%s1488_s3 + $0x50] sm:$0xff] %vm604_vm0, %v550_v13  ;;  %v298_v23 = vmul.f32 0.5, %v234_v35  ;;  %v299_v24 = vmul.f32 0.5, %v235_v47 }
  0x24   :  { %v552_v22 = vmul.f32 %v488_v14, %v296_v5  ;;  %v366_v25 = vmul.f32 0.70710677, %v238_v15  ;;  %v489_v26 = vadd.f32 1.0, %v781_v20  ;;  %v367_v27 = vmul.f32 0.70710677, %v239_v12  ;;  %v44_v20 = vld [vmem:[%s1485_s0 + $0xb4] sm:$0xff]  }
  0x25   :  { %616 = vst.msk [vmem:[%s1488_s3 + $0x58] sm:$0xff] %vm604_vm0, %v551_v16  ;;  %788 = verf.f32 %v365_v18  ;;  %v697_v28 = vunpack.c.l.bf16 %v743_v4  ;;  %v698_v29 = vunpack.c.h.bf16 %v743_v4  ;;  %v100_v30 = vunpack.c.l.bf16 %v36_v19 }
  0x26   :  { %617 = vst.msk [vmem:[%s1488_s3 + $0x60] sm:$0xff] %vm604_vm0, %v552_v22  ;;  %790 = verf.f32 %v366_v25  ;;  %v101_v31 = vunpack.c.h.bf16 %v36_v19  ;;  %v783_v32 = vpop.eup %782  ;;  %v553_v33 = vmul.f32 %v489_v26, %v297_v17  ;;  %v701_v35 = vunpack.c.l.bf16 %v744_v21 }
  0x27   :  { %792 = verf.f32 %v367_v27  ;;  %v169_v34 = vmul.f32 %v697_v28, %v910_v1  ;;  %v490_v36 = vadd.f32 1.0, %v783_v32  ;;  %v170_v37 = vmul.f32 %v698_v29, %v910_v1  ;;  %v746_v32 = vld [vmem:[%s1485_s0 + $0xc0] sm:$0xff]  }
  0x28   :  { %v171_v38 = vmul.f32 %v910_v1, %v100_v30  ;;  %v172_v39 = vmul.f32 %v910_v1, %v101_v31  ;;  %618 = vst.msk [vmem:[%s1488_s3 + $0x68] sm:$0xff] %vm604_vm0, %v553_v33  ;;  %v300_v41 = vmul.f32 0.5, %v236_v58  ;;  %v173_v43 = vmul.f32 %v701_v35, %v910_v1 }
  0x29   :  { %v240_v42 = vadd.f32 %v924_v7, %v169_v34  ;;  %v702_v44 = vunpack.c.h.bf16 %v744_v21  ;;  %v554_v46 = vmul.f32 %v490_v36, %v298_v23  ;;  %v241_v47 = vadd.f32 %v924_v7, %v170_v37 }
  0x2a   :  { %v785_v45 = vpop.eup %784  ;;  %v242_v48 = vadd.f32 %v924_v7, %v171_v38  ;;  %v243_v49 = vadd.f32 %v924_v7, %v172_v39  ;;  %v244_v52 = vadd.f32 %v924_v7, %v173_v43  ;;  %v104_v53 = vunpack.c.l.bf16 %v40_v40 }
  0x2b   :  { %v491_v50 = vadd.f32 1.0, %v785_v45  ;;  %v368_v51 = vmul.f32 0.70710677, %v240_v42  ;;  %619 = vst.msk [vmem:[%s1488_s3 + $0x70] sm:$0xff] %vm604_vm0, %v554_v46  ;;  %v301_v54 = vmul.f32 0.5, %v237_v11  ;;  %v302_v55 = vmul.f32 0.5, %v238_v15 }
  0x2c   :  { %v369_v56 = vmul.f32 0.70710677, %v241_v47  ;;  %v370_v57 = vmul.f32 0.70710677, %v242_v48  ;;  %v787_v58 = vpop.eup %786  ;;  %v303_v60 = vmul.f32 0.5, %v239_v12  ;;  %v304_v0 = vmul.f32 0.5, %v240_v42 }
  0x2d   :  { %v555_v59 = vmul.f32 %v491_v50, %v299_v24  ;;  %794 = verf.f32 %v368_v51  ;;  %v371_v61 = vmul.f32 0.70710677, %v243_v49  ;;  %v492_v63 = vadd.f32 1.0, %v787_v58 }
  0x2e   :  { %796 = verf.f32 %v369_v56  ;;  %v372_v2 = vmul.f32 0.70710677, %v244_v52  ;;  %v174_v5 = vmul.f32 %v702_v44, %v910_v1  ;;  %v175_v6 = vmul.f32 %v910_v1, %v104_v53 }
  0x2f   :  { %v789_v3 = vpop.eup %788  ;;  %620 = vst.msk [vmem:[%s1488_s3 + $0x78] sm:$0xff] %vm604_vm0, %v555_v59  ;;  %798 = verf.f32 %v370_v57  ;;  %v105_v8 = vunpack.c.h.bf16 %v40_v40  ;;  %v556_v10 = vmul.f32 %v492_v63, %v300_v41  ;;  %v705_v13 = vunpack.c.l.bf16 %v745_v62  ;;  %v747_v63 = vld [vmem:[%s1485_s0 + $0xd8] sm:$0xff]  }
  0x30   :  { %v791_v9 = vpop.eup %790  ;;  %v493_v11 = vadd.f32 1.0, %v789_v3  ;;  %800 = verf.f32 %v371_v61  ;;  %v245_v12 = vadd.f32 %v924_v7, %v174_v5  ;;  %v246_v4 = vadd.f32 %v924_v7, %v175_v6 }
  0x31   :  { %v793_v14 = vpop.eup %792  ;;  %v494_v15 = vadd.f32 1.0, %v791_v9  ;;  %802 = verf.f32 %v372_v2  ;;  %621 = vst.msk [vmem:[%s1488_s3 + $0x80] sm:$0xff] %vm604_vm0, %v556_v10  ;;  %v176_v18 = vmul.f32 %v910_v1, %v105_v8  ;;  %v177_v19 = vmul.f32 %v705_v13, %v910_v1 }
  0x32   :  { %v557_v16 = vmul.f32 %v493_v11, %v301_v54  ;;  %v495_v17 = vadd.f32 1.0, %v793_v14  ;;  %v305_v23 = vmul.f32 0.5, %v241_v47  ;;  %v306_v24 = vmul.f32 0.5, %v242_v48 }
  0x33   :  { %v558_v22 = vmul.f32 %v494_v15, %v302_v55  ;;  %v373_v25 = vmul.f32 0.70710677, %v245_v12  ;;  %v374_v26 = vmul.f32 0.70710677, %v246_v4  ;;  %v247_v27 = vadd.f32 %v924_v7, %v176_v18 }
  0x34   :  { %622 = vst.msk [vmem:[%s1488_s3 + $0x88] sm:$0xff] %vm604_vm0, %v557_v16  ;;  %v559_v21 = vmul.f32 %v495_v17, %v303_v60  ;;  %v1113_v28 = vadd.f32 %v924_v7, %v177_v19  ;;  %v706_v29 = vunpack.c.h.bf16 %v745_v62  ;;  %v108_v30 = vunpack.c.l.bf16 %v44_v20  ;;  %v48_v62 = vld [vmem:[%s1485_s0 + $0xcc] sm:$0xff]  }
  0x35   :  { %623 = vst.msk [vmem:[%s1488_s3 + $0x90] sm:$0xff] %vm604_vm0, %v558_v22  ;;  %804 = verf.f32 %v373_v25  ;;  %v109_v31 = vunpack.c.h.bf16 %v44_v20  ;;  %v307_v33 = vmul.f32 0.5, %v243_v49  ;;  %v308_v34 = vmul.f32 0.5, %v244_v52 }
  0x36   :  { %624 = vst.msk [vmem:[%s1488_s3 + $0x98] sm:$0xff] %vm604_vm0, %v559_v21  ;;  %806 = verf.f32 %v374_v26  ;;  %v375_v35 = vmul.f32 0.70710677, %v247_v27  ;;  %v376_v37 = vmul.f32 0.70710677, %v1113_v28  ;;  %v178_v38 = vmul.f32 %v706_v29, %v910_v1 }
  0x37   :  { %v795_v36 = vpop.eup %794  ;;  %v179_v39 = vmul.f32 %v910_v1, %v108_v30  ;;  %v180_v40 = vmul.f32 %v910_v1, %v109_v31  ;;  %v709_v43 = vunpack.c.l.bf16 %v746_v32  ;;  %v710_v44 = vunpack.c.h.bf16 %v746_v32 }
  0x38   :  { %v797_v41 = vpop.eup %796  ;;  %v496_v42 = vadd.f32 1.0, %v795_v36  ;;  %808 = verf.f32 %v375_v35  ;;  %v249_v47 = vadd.f32 %v924_v7, %v178_v38  ;;  %v309_v60 = vmul.f32 0.5, %v245_v12  ;;  %v748_v38 = vld [vmem:[%s1485_s0 + $0xf0] sm:$0xff]  }
  0x39   :  { %v799_v45 = vpop.eup %798  ;;  %v497_v46 = vadd.f32 1.0, %v797_v41  ;;  %810 = verf.f32 %v376_v37  ;;  %v250_v48 = vadd.f32 %v924_v7, %v179_v39  ;;  %v251_v52 = vadd.f32 %v924_v7, %v180_v40 }
  0x3a   :  { %v801_v49 = vpop.eup %800  ;;  %v560_v50 = vmul.f32 %v496_v42, %v304_v0  ;;  %v498_v51 = vadd.f32 1.0, %v799_v45  ;;  %v181_v53 = vmul.f32 %v709_v43, %v910_v1  ;;  %v377_v57 = vmul.f32 0.70710677, %v249_v47 }
  0x3b   :  { %v803_v54 = vpop.eup %802  ;;  %v561_v55 = vmul.f32 %v497_v46, %v305_v23  ;;  %v499_v56 = vadd.f32 1.0, %v801_v49  ;;  %v378_v61 = vmul.f32 0.70710677, %v250_v48  ;;  %v310_v2 = vmul.f32 0.5, %v246_v4 }
  0x3c   :  { %625 = vst.msk [vmem:[%s1488_s3 + $0xa0] sm:$0xff] %vm604_vm0, %v560_v50  ;;  %v562_v58 = vmul.f32 %v498_v51, %v306_v24  ;;  %v500_v59 = vadd.f32 1.0, %v803_v54  ;;  %812 = verf.f32 %v377_v57  ;;  %v379_v3 = vmul.f32 0.70710677, %v251_v52 }
  0x3d   :  { %626 = vst.msk [vmem:[%s1488_s3 + $0xa8] sm:$0xff] %vm604_vm0, %v561_v55  ;;  %v563_v0 = vmul.f32 %v499_v56, %v307_v33  ;;  %814 = verf.f32 %v378_v61  ;;  %v1153_v6 = vadd.f32 %v924_v7, %v181_v53  ;;  %v182_v8 = vmul.f32 %v710_v44, %v910_v1  ;;  %v52_v33 = vld [vmem:[%s1485_s0 + $0xe4] sm:$0xff]  }
  0x3e   :  { %627 = vst.msk [vmem:[%s1488_s3 + $0xb0] sm:$0xff] %vm604_vm0, %v562_v58  ;;  %v564_v5 = vmul.f32 %v500_v59, %v308_v34  ;;  %816 = verf.f32 %v379_v3  ;;  %v112_v10 = vunpack.c.l.bf16 %v48_v62  ;;  %v113_v11 = vunpack.c.h.bf16 %v48_v62 }
  0x3f   :  { %v805_v9 = vpop.eup %804  ;;  %628 = vst.msk [vmem:[%s1488_s3 + $0xb8] sm:$0xff] %vm604_vm0, %v563_v0  ;;  %v713_v13 = vunpack.c.l.bf16 %v747_v63  ;;  %v311_v12 = vmul.f32 0.5, %v247_v27  ;;  %v380_v4 = vmul.f32 0.70710677, %v1153_v6  ;;  %v1166_v16 = vadd.f32 %v924_v7, %v182_v8 }
  0x40   :  { %v807_v14 = vpop.eup %806  ;;  %629 = vst.msk [vmem:[%s1488_s3 + $0xc0] sm:$0xff] %vm604_vm0, %v564_v5  ;;  %v501_v15 = vadd.f32 1.0, %v805_v9  ;;  %v183_v18 = vmul.f32 %v910_v1, %v112_v10  ;;  %v184_v19 = vmul.f32 %v910_v1, %v113_v11  ;;  %v312_v24 = vmul.f32 0.5, %v1113_v28  ;;  %v56_v10 = vld [vmem:[%s1485_s0 + $0xfc] sm:$0xff]   ;;  %v749_v11 = vld [vmem:[%s1485_s0 + $0x108] sm:$0xff]  }
  0x41   :  { %v502_v17 = vadd.f32 1.0, %v807_v14  ;;  %v185_v20 = vmul.f32 %v713_v13, %v910_v1  ;;  %818 = verf.f32 %v380_v4  ;;  %v381_v25 = vmul.f32 0.70710677, %v1166_v16 }
  0x42   :  { %v809_v22 = vpop.eup %808  ;;  %v565_v23 = vmul.f32 %v501_v15, %v309_v60  ;;  %v254_v29 = vadd.f32 %v924_v7, %v183_v18  ;;  %v255_v30 = vadd.f32 %v924_v7, %v184_v19  ;;  %v714_v28 = vunpack.c.h.bf16 %v747_v63 }
  0x43   :  { %v811_v21 = vpop.eup %810  ;;  %v566_v26 = vmul.f32 %v502_v17, %v310_v2  ;;  %v503_v27 = vadd.f32 1.0, %v809_v22  ;;  %820 = verf.f32 %v381_v25  ;;  %v1180_v32 = vadd.f32 %v924_v7, %v185_v20 }
  0x44   :  { %630 = vst.msk [vmem:[%s1488_s3 + $0xc8] sm:$0xff] %vm604_vm0, %v565_v23  ;;  %v504_v31 = vadd.f32 1.0, %v811_v21  ;;  %v313_v35 = vmul.f32 0.5, %v249_v47  ;;  %v314_v36 = vmul.f32 0.5, %v250_v48  ;;  %v382_v37 = vmul.f32 0.70710677, %v254_v29 }
  0x45   :  { %631 = vst.msk [vmem:[%s1488_s3 + $0xd0] sm:$0xff] %vm604_vm0, %v566_v26  ;;  %v567_v34 = vmul.f32 %v503_v27, %v311_v12  ;;  %v315_v40 = vmul.f32 0.5, %v251_v52  ;;  %v383_v41 = vmul.f32 0.70710677, %v255_v30  ;;  %v384_v42 = vmul.f32 0.70710677, %v1180_v32 }
  0x46   :  { %v568_v39 = vmul.f32 %v504_v31, %v312_v24  ;;  %v813_v43 = vpop.eup %812  ;;  %822 = verf.f32 %v382_v37  ;;  %v186_v44 = vmul.f32 %v714_v28, %v910_v1  ;;  %v116_v45 = vunpack.c.l.bf16 %v52_v33  ;;  %v60_v23 = vld [vmem:[%s1485_s0 + $0x114] sm:$0xff]  }
  0x47   :  { %632 = vst.msk [vmem:[%s1488_s3 + $0xd8] sm:$0xff] %vm604_vm0, %v567_v34  ;;  %v117_v46 = vunpack.c.h.bf16 %v52_v33  ;;  %v815_v47 = vpop.eup %814  ;;  %v505_v48 = vadd.f32 1.0, %v813_v43  ;;  %824 = verf.f32 %v383_v41  ;;  %v717_v49 = vunpack.c.l.bf16 %v748_v38 }
  0x48   :  { %633 = vst.msk [vmem:[%s1488_s3 + $0xe0] sm:$0xff] %vm604_vm0, %v568_v39  ;;  %v718_v50 = vunpack.c.h.bf16 %v748_v38  ;;  %v817_v51 = vpop.eup %816  ;;  %v506_v52 = vadd.f32 1.0, %v815_v47  ;;  %826 = verf.f32 %v384_v42  ;;  %v1203_v53 = vadd.f32 %v924_v7, %v186_v44 }
  0x49   :  { %v187_v54 = vmul.f32 %v910_v1, %v116_v45  ;;  %v569_v55 = vmul.f32 %v505_v48, %v313_v35  ;;  %v507_v56 = vadd.f32 1.0, %v817_v51  ;;  %v188_v57 = vmul.f32 %v910_v1, %v117_v46  ;;  %v750_v48 = vld [vmem:[%s1485_s0 + $0x120] sm:$0xff]  }
  0x4a   :  { %v189_v58 = vmul.f32 %v717_v49, %v910_v1  ;;  %v570_v59 = vmul.f32 %v506_v52, %v314_v36  ;;  %v316_v60 = vmul.f32 0.5, %v1153_v6  ;;  %v385_v61 = vmul.f32 0.70710677, %v1203_v53 }
  0x4b   :  { %v258_v62 = vadd.f32 %v924_v7, %v187_v54  ;;  %v819_v63 = vpop.eup %818  ;;  %634 = vst.msk [vmem:[%s1488_s3 + $0xe8] sm:$0xff] %vm604_vm0, %v569_v55  ;;  %v571_v0 = vmul.f32 %v507_v56, %v315_v40  ;;  %v259_v2 = vadd.f32 %v924_v7, %v188_v57  ;;  %v190_v5 = vmul.f32 %v718_v50, %v910_v1 }
  0x4c   :  { %v1217_v3 = vadd.f32 %v924_v7, %v189_v58  ;;  %635 = vst.msk [vmem:[%s1488_s3 + $0xf0] sm:$0xff] %vm604_vm0, %v570_v59  ;;  %v508_v6 = vadd.f32 1.0, %v819_v63  ;;  %v317_v8 = vmul.f32 0.5, %v1166_v16  ;;  %828 = verf.f32 %v385_v61 }
  0x4d   :  { %v386_v9 = vmul.f32 0.70710677, %v258_v62  ;;  %v821_v13 = vpop.eup %820  ;;  %636 = vst.msk [vmem:[%s1488_s3 + $0xf8] sm:$0xff] %vm604_vm0, %v571_v0  ;;  %v318_v14 = vmul.f32 0.5, %v254_v29  ;;  %v319_v15 = vmul.f32 0.5, %v255_v30  ;;  %v261_v18 = vadd.f32 %v924_v7, %v190_v5 }
  0x4e   :  { %v387_v12 = vmul.f32 0.70710677, %v259_v2  ;;  %v388_v4 = vmul.f32 0.70710677, %v1217_v3  ;;  %v572_v16 = vmul.f32 %v508_v6, %v316_v60  ;;  %v509_v17 = vadd.f32 1.0, %v821_v13 }
  0x4f   :  { %830 = verf.f32 %v386_v9  ;;  %v120_v19 = vunpack.c.l.bf16 %v56_v10  ;;  %v121_v20 = vunpack.c.h.bf16 %v56_v10  ;;  %v721_v22 = vunpack.c.l.bf16 %v749_v11 }
  0x50   :  { %832 = verf.f32 %v387_v12  ;;  %v823_v24 = vpop.eup %822  ;;  %637 = vst.msk [vmem:[%s1488_s3 + $0x100] sm:$0xff] %vm604_vm0, %v572_v16  ;;  %v573_v25 = vmul.f32 %v509_v17, %v317_v8  ;;  %v320_v21 = vmul.f32 0.5, %v1180_v32  ;;  %v389_v26 = vmul.f32 0.70710677, %v261_v18 }
  0x51   :  { %834 = verf.f32 %v388_v4  ;;  %v825_v27 = vpop.eup %824  ;;  %v510_v29 = vadd.f32 1.0, %v823_v24  ;;  %v191_v30 = vmul.f32 %v910_v1, %v120_v19  ;;  %v192_v31 = vmul.f32 %v910_v1, %v121_v20  ;;  %v751_v20 = vld [vmem:[%s1485_s0 + $0x138] sm:$0xff]  }
  0x52   :  { %v193_v28 = vmul.f32 %v721_v22, %v910_v1  ;;  %v827_v33 = vpop.eup %826  ;;  %638 = vst.msk [vmem:[%s1488_s3 + $0x108] sm:$0xff] %vm604_vm0, %v573_v25  ;;  %v511_v34 = vadd.f32 1.0, %v825_v27  ;;  %836 = verf.f32 %v389_v26  ;;  %v722_v35 = vunpack.c.h.bf16 %v749_v11 }
  0x53   :  { %v124_v32 = vunpack.c.l.bf16 %v60_v23  ;;  %v574_v36 = vmul.f32 %v510_v29, %v318_v14  ;;  %v512_v37 = vadd.f32 1.0, %v827_v33  ;;  %v262_v38 = vadd.f32 %v924_v7, %v191_v30 }
  0x54   :  { %v263_v39 = vadd.f32 %v924_v7, %v192_v31  ;;  %v575_v40 = vmul.f32 %v511_v34, %v319_v15  ;;  %v1255_v41 = vadd.f32 %v924_v7, %v193_v28  ;;  %v194_v42 = vmul.f32 %v722_v35, %v910_v1 }
  0x55   :  { %v195_v43 = vmul.f32 %v910_v1, %v124_v32  ;;  %639 = vst.msk [vmem:[%s1488_s3 + $0x110] sm:$0xff] %vm604_vm0, %v574_v36  ;;  %v576_v44 = vmul.f32 %v512_v37, %v320_v21  ;;  %v321_v45 = vmul.f32 0.5, %v1203_v53  ;;  %v322_v46 = vmul.f32 0.5, %v258_v62 }
  0x56   :  { %v390_v47 = vmul.f32 0.70710677, %v262_v38  ;;  %v829_v49 = vpop.eup %828  ;;  %640 = vst.msk [vmem:[%s1488_s3 + $0x118] sm:$0xff] %vm604_vm0, %v575_v40  ;;  %v323_v50 = vmul.f32 0.5, %v259_v2  ;;  %v391_v51 = vmul.f32 0.70710677, %v263_v39  ;;  %v265_v54 = vadd.f32 %v924_v7, %v194_v42 }
  0x57   :  { %v392_v52 = vmul.f32 0.70710677, %v1255_v41  ;;  %641 = vst.msk [vmem:[%s1488_s3 + $0x120] sm:$0xff] %vm604_vm0, %v576_v44  ;;  %v513_v53 = vadd.f32 1.0, %v829_v49  ;;  %v1278_v55 = vadd.f32 %v924_v7, %v195_v43  ;;  %v125_v56 = vunpack.c.h.bf16 %v60_v23  ;;  %v64_v2 = vld [vmem:[%s1485_s0 + $0x12c] sm:$0xff]  }
  0x58   :  { %838 = verf.f32 %v390_v47  ;;  %v324_v58 = vmul.f32 0.5, %v1217_v3  ;;  %v393_v59 = vmul.f32 0.70710677, %v265_v54  ;;  %v725_v60 = vunpack.c.l.bf16 %v750_v48 }
  0x59   :  { %v831_v57 = vpop.eup %830  ;;  %840 = verf.f32 %v391_v51  ;;  %v577_v62 = vmul.f32 %v513_v53, %v321_v45  ;;  %v325_v0 = vmul.f32 0.5, %v261_v18  ;;  %v394_v8 = vmul.f32 0.70710677, %v1278_v55 }
  0x5a   :  { %v833_v61 = vpop.eup %832  ;;  %v514_v63 = vadd.f32 1.0, %v831_v57  ;;  %842 = verf.f32 %v392_v52  ;;  %v196_v9 = vmul.f32 %v910_v1, %v125_v56  ;;  %v197_v11 = vmul.f32 %v725_v60, %v910_v1  ;;  %v1331_v52 = vld [vmem:[%s1487_s2] ss:$0 sm:$0xff] }
  0x5b   :  { %v835_v5 = vpop.eup %834  ;;  %v515_v6 = vadd.f32 1.0, %v833_v61  ;;  %844 = verf.f32 %v393_v59  ;;  %642 = vst.msk [vmem:[%s1488_s3 + $0x128] sm:$0xff] %vm604_vm0, %v577_v62  ;;  %v726_v13 = vunpack.c.h.bf16 %v750_v48  ;;  %v128_v4 = vunpack.c.l.bf16 %v64_v2 }
  0x5c   :  { %v578_v3 = vmul.f32 %v514_v63, %v322_v46  ;;  %v516_v10 = vadd.f32 1.0, %v835_v5  ;;  %v837_v14 = vpop.eup %836  ;;  %846 = verf.f32 %v394_v8  ;;  %v267_v12 = vadd.f32 %v924_v7, %v196_v9 }
  0x5d   :  { %v579_v15 = vmul.f32 %v515_v6, %v323_v50  ;;  %v517_v17 = vadd.f32 1.0, %v837_v14  ;;  %v268_v18 = vadd.f32 %v924_v7, %v197_v11  ;;  %v198_v19 = vmul.f32 %v726_v13, %v910_v1 }
  0x5e   :  { %643 = vst.msk [vmem:[%s1488_s3 + $0x130] sm:$0xff] %vm604_vm0, %v578_v3  ;;  %v580_v16 = vmul.f32 %v516_v10, %v324_v58  ;;  %v326_v22 = vmul.f32 0.5, %v262_v38  ;;  %v395_v23 = vmul.f32 0.70710677, %v267_v12  ;;  %v199_v24 = vmul.f32 %v910_v1, %v128_v4  ;;  %v752_v58 = vld [vmem:[%s1485_s0 + $0x150] sm:$0xff]   ;;  %v72_v10 = vld [vmem:[%s1485_s0 + $0x15c] sm:$0xff]  }
  0x5f   :  { %644 = vst.msk [vmem:[%s1488_s3 + $0x138] sm:$0xff] %vm604_vm0, %v579_v15  ;;  %v129_v25 = vunpack.c.h.bf16 %v64_v2  ;;  %v581_v21 = vmul.f32 %v517_v17, %v325_v0  ;;  %v327_v26 = vmul.f32 0.5, %v263_v39  ;;  %v396_v27 = vmul.f32 0.70710677, %v268_v18  ;;  %v1359_v2 = vld [vmem:[%s1486_s1] ss:$0 sm:$0xff] }
  0x60   :  { %645 = vst.msk [vmem:[%s1488_s3 + $0x140] sm:$0xff] %vm604_vm0, %v580_v16  ;;  %v269_v29 = vadd.f32 %v924_v7, %v198_v19  ;;  %848 = verf.f32 %v395_v23  ;;  %v270_v30 = vadd.f32 %v924_v7, %v199_v24  ;;  %v729_v28 = vunpack.c.l.bf16 %v751_v20 }
  0x61   :  { %v200_v31 = vmul.f32 %v910_v1, %v129_v25  ;;  %646 = vst.msk [vmem:[%s1488_s3 + $0x148] sm:$0xff] %vm604_vm0, %v581_v21  ;;  %v328_v34 = vmul.f32 0.5, %v1255_v41  ;;  %850 = verf.f32 %v396_v27  ;;  %v730_v32 = vunpack.c.h.bf16 %v751_v20  ;;  %v68_v41 = vld [vmem:[%s1485_s0 + $0x144] sm:$0xff]  }
  0x62   :  { %v839_v33 = vpop.eup %838  ;;  %v397_v35 = vmul.f32 0.70710677, %v269_v29  ;;  %v329_v38 = vmul.f32 0.5, %v265_v54  ;;  %v398_v39 = vmul.f32 0.70710677, %v270_v30  ;;  %v201_v44 = vmul.f32 %v729_v28, %v910_v1  ;;  %v753_v28 = vld [vmem:[%s1485_s0 + $0x168] sm:$0xff]  }
  0x63   :  { %v841_v36 = vpop.eup %840  ;;  %v518_v37 = vadd.f32 1.0, %v839_v33  ;;  %v1319_v40 = vadd.f32 %v924_v7, %v200_v31  ;;  %v202_v45 = vmul.f32 %v730_v32, %v910_v1  ;;  %v330_v49 = vmul.f32 0.5, %v1278_v55 }
  0x64   :  { %v843_v42 = vpop.eup %842  ;;  %v519_v43 = vadd.f32 1.0, %v841_v36  ;;  %852 = verf.f32 %v397_v35  ;;  %v1334_v1 = vadd.f32 %v1331_v52, %v201_v44  ;;  %v132_v56 = vunpack.c.l.bf16 %v68_v41 }
  0x65   :  { %v845_v46 = vpop.eup %844  ;;  %v582_v47 = vmul.f32 %v518_v37, %v326_v22  ;;  %v520_v48 = vadd.f32 1.0, %v843_v42  ;;  %854 = verf.f32 %v398_v39  ;;  %v399_v51 = vmul.f32 0.70710677, %v1319_v40 }
  0x66   :  { %v583_v50 = vmul.f32 %v519_v43, %v327_v26  ;;  %v521_v7 = vadd.f32 1.0, %v845_v46  ;;  %v847_v54 = vpop.eup %846  ;;  %v1341_v55 = vadd.f32 %v1331_v52, %v202_v45  ;;  %v133_v57 = vunpack.c.h.bf16 %v68_v41 }
  0x67   :  { %647 = vst.msk [vmem:[%s1488_s3 + $0x150] sm:$0xff] %vm604_vm0, %v582_v47  ;;  %v584_v53 = vmul.f32 %v520_v48, %v328_v34  ;;  %v522_v60 = vadd.f32 1.0, %v847_v54  ;;  %v331_v61 = vmul.f32 0.5, %v267_v12  ;;  %856 = verf.f32 %v399_v51 }
  0x68   :  { %648 = vst.msk [vmem:[%s1488_s3 + $0x158] sm:$0xff] %vm604_vm0, %v583_v50  ;;  %v585_v59 = vmul.f32 %v521_v7, %v329_v38  ;;  %v332_v62 = vmul.f32 0.5, %v268_v18  ;;  %v400_v63 = vmul.f32 0.70710677, %v1334_v1  ;;  %v401_v0 = vmul.f32 0.70710677, %v1341_v55 }
  0x69   :  { %649 = vst.msk [vmem:[%s1488_s3 + $0x160] sm:$0xff] %vm604_vm0, %v584_v53  ;;  %v203_v5 = vmul.f32 %v1359_v2, %v132_v56  ;;  %v586_v6 = vmul.f32 %v522_v60, %v330_v49  ;;  %v204_v8 = vmul.f32 %v1359_v2, %v133_v57  ;;  %v733_v9 = vunpack.c.l.bf16 %v752_v58  ;;  %v76_v38 = vld [vmem:[%s1485_s0 + $0x174] sm:$0xff]  }
  0x6a   :  { %650 = vst.msk [vmem:[%s1488_s3 + $0x168] sm:$0xff] %vm604_vm0, %v585_v59  ;;  %v734_v3 = vunpack.c.h.bf16 %v752_v58  ;;  %v849_v11 = vpop.eup %848  ;;  %v333_v13 = vmul.f32 0.5, %v269_v29  ;;  %v334_v14 = vmul.f32 0.5, %v270_v30  ;;  %858 = verf.f32 %v400_v63 }
  0x6b   :  { %v1371_v15 = vadd.f32 %v1331_v52, %v203_v5  ;;  %v851_v12 = vpop.eup %850  ;;  %651 = vst.msk [vmem:[%s1488_s3 + $0x170] sm:$0xff] %vm604_vm0, %v586_v6  ;;  %v523_v4 = vadd.f32 1.0, %v849_v11  ;;  %860 = verf.f32 %v401_v0  ;;  %v1378_v16 = vadd.f32 %v1331_v52, %v204_v8 }
  0x6c   :  { %v205_v17 = vmul.f32 %v1359_v2, %v733_v9  ;;  %v524_v18 = vadd.f32 1.0, %v851_v12  ;;  %v206_v20 = vmul.f32 %v1359_v2, %v734_v3  ;;  %v136_v22 = vunpack.c.l.bf16 %v72_v10 }
  0x6d   :  { %v402_v19 = vmul.f32 0.70710677, %v1371_v15  ;;  %v587_v24 = vmul.f32 %v523_v4, %v331_v61  ;;  %v403_v25 = vmul.f32 0.70710677, %v1378_v16  ;;  %v137_v26 = vunpack.c.h.bf16 %v72_v10 }
  0x6e   :  { %v853_v23 = vpop.eup %852  ;;  %v1385_v21 = vadd.f32 %v1331_v52, %v205_v17  ;;  %v588_v29 = vmul.f32 %v524_v18, %v332_v62  ;;  %v1388_v31 = vadd.f32 %v1331_v52, %v206_v20  ;;  %v335_v32 = vmul.f32 0.5, %v1319_v40 }
  0x6f   :  { %v855_v27 = vpop.eup %854  ;;  %v525_v30 = vadd.f32 1.0, %v853_v23  ;;  %862 = verf.f32 %v402_v19  ;;  %652 = vst.msk [vmem:[%s1488_s3 + $0x178] sm:$0xff] %vm604_vm0, %v587_v24  ;;  %v207_v37 = vmul.f32 %v1359_v2, %v136_v22  ;;  %v208_v43 = vmul.f32 %v1359_v2, %v137_v26 }
  0x70   :  { %v526_v33 = vadd.f32 1.0, %v855_v27  ;;  %864 = verf.f32 %v403_v25  ;;  %v404_v34 = vmul.f32 0.70710677, %v1385_v21  ;;  %653 = vst.msk [vmem:[%s1488_s3 + $0x180] sm:$0xff] %vm604_vm0, %v588_v29  ;;  %v405_v36 = vmul.f32 0.70710677, %v1388_v31 }
  0x71   :  { %v589_v35 = vmul.f32 %v525_v30, %v333_v13  ;;  %v857_v39 = vpop.eup %856  ;;  %v737_v44 = vunpack.c.l.bf16 %v753_v28  ;;  %v278_v45 = vadd.f32 %v1331_v52, %v207_v37  ;;  %v738_v41 = vunpack.c.h.bf16 %v753_v28 }
  0x72   :  { %v590_v42 = vmul.f32 %v526_v33, %v334_v14  ;;  %866 = verf.f32 %v404_v34  ;;  %v527_v40 = vadd.f32 1.0, %v857_v39  ;;  %v336_v46 = vmul.f32 0.5, %v1334_v1 }
  0x73   :  { %654 = vst.msk [vmem:[%s1488_s3 + $0x188] sm:$0xff] %vm604_vm0, %v589_v35  ;;  %868 = verf.f32 %v405_v36  ;;  %v279_v47 = vadd.f32 %v1331_v52, %v208_v43  ;;  %v209_v48 = vmul.f32 %v1359_v2, %v737_v44  ;;  %v140_v49 = vunpack.c.l.bf16 %v76_v38 }
  0x74   :  { %655 = vst.msk [vmem:[%s1488_s3 + $0x190] sm:$0xff] %vm604_vm0, %v590_v42  ;;  %v859_v50 = vpop.eup %858  ;;  %v591_v7 = vmul.f32 %v527_v40, %v335_v32  ;;  %v337_v51 = vmul.f32 0.5, %v1341_v55  ;;  %v406_v54 = vmul.f32 0.70710677, %v278_v45  ;;  %v210_v53 = vmul.f32 %v1359_v2, %v738_v41 }
  0x75   :  { %v861_v56 = vpop.eup %860  ;;  %v528_v57 = vadd.f32 1.0, %v859_v50  ;;  %v407_v58 = vmul.f32 0.70710677, %v279_v47  ;;  %v280_v59 = vadd.f32 %v1331_v52, %v209_v48  ;;  %v141_v60 = vunpack.c.h.bf16 %v76_v38 }
  0x76   :  { %656 = vst.msk [vmem:[%s1488_s3 + $0x198] sm:$0xff] %vm604_vm0, %v591_v7  ;;  %v529_v1 = vadd.f32 1.0, %v861_v56  ;;  %870 = verf.f32 %v406_v54  ;;  %v281_v61 = vadd.f32 %v1331_v52, %v210_v53  ;;  %v211_v55 = vmul.f32 %v1359_v2, %v140_v49 }
  0x77   :  { %v592_v62 = vmul.f32 %v528_v57, %v336_v46  ;;  %v338_v63 = vmul.f32 0.5, %v1371_v15  ;;  %872 = verf.f32 %v407_v58  ;;  %v408_v0 = vmul.f32 0.70710677, %v280_v59 }
  0x78   :  { %v593_v6 = vmul.f32 %v529_v1, %v337_v51  ;;  %v339_v8 = vmul.f32 0.5, %v1378_v16  ;;  %v409_v9 = vmul.f32 0.70710677, %v281_v61  ;;  %v282_v3 = vadd.f32 %v1331_v52, %v211_v55 }
  0x79   :  { %v863_v5 = vpop.eup %862  ;;  %657 = vst.msk [vmem:[%s1488_s3 + $0x1a0] sm:$0xff] %vm604_vm0, %v592_v62  ;;  %874 = verf.f32 %v408_v0  ;;  %v212_v13 = vmul.f32 %v1359_v2, %v141_v60  ;;  %v340_v15 = vmul.f32 0.5, %v1385_v21  ;;  %v341_v17 = vmul.f32 0.5, %v1388_v31 }
  0x7a   :  { %v865_v10 = vpop.eup %864  ;;  %v530_v11 = vadd.f32 1.0, %v863_v5  ;;  %658 = vst.msk [vmem:[%s1488_s3 + $0x1a8] sm:$0xff] %vm604_vm0, %v593_v6  ;;  %876 = verf.f32 %v409_v9  ;;  %v410_v12 = vmul.f32 0.70710677, %v282_v3  ;;  %v342_v21 = vmul.f32 0.5, %v278_v45 }
  0x7b   :  { %v531_v14 = vadd.f32 1.0, %v865_v10  ;;  %v283_v18 = vadd.f32 %v1331_v52, %v212_v13  ;;  %v343_v26 = vmul.f32 0.5, %v279_v47  ;;  %v344_v31 = vmul.f32 0.5, %v280_v59 }
  0x7c   :  { %v867_v4 = vpop.eup %866  ;;  %v594_v16 = vmul.f32 %v530_v11, %v338_v63  ;;  %878 = verf.f32 %v410_v12  ;;  %v345_v34 = vmul.f32 0.5, %v281_v61  ;;  %v346_v38 = vmul.f32 0.5, %v282_v3 }
  0x7d   :  { %v869_v19 = vpop.eup %868  ;;  %v595_v20 = vmul.f32 %v531_v14, %v339_v8  ;;  %v532_v22 = vadd.f32 1.0, %v867_v4  ;;  %v411_v23 = vmul.f32 0.70710677, %v283_v18  ;;  %v347_v40 = vmul.f32 0.5, %v283_v18 }
  0x7e   :  { %659 = vst.msk [vmem:[%s1488_s3 + $0x1b0] sm:$0xff] %vm604_vm0, %v594_v16  ;;  %v533_v2 = vadd.f32 1.0, %v869_v19 }
  0x7f   :  { %660 = vst.msk [vmem:[%s1488_s3 + $0x1b8] sm:$0xff] %vm604_vm0, %v595_v20  ;;  %v596_v24 = vmul.f32 %v532_v22, %v340_v15  ;;  %880 = verf.f32 %v411_v23 }
  0x80   :  { %v597_v25 = vmul.f32 %v533_v2, %v341_v17  ;;  %v871_v52 = vpop.eup %870 }
  0x81   :  { %661 = vst.msk [vmem:[%s1488_s3 + $0x1c0] sm:$0xff] %vm604_vm0, %v596_v24  ;;  %v873_v27 = vpop.eup %872  ;;  %v534_v29 = vadd.f32 1.0, %v871_v52 }
  0x82   :  { %662 = vst.msk [vmem:[%s1488_s3 + $0x1c8] sm:$0xff] %vm604_vm0, %v597_v25  ;;  %v535_v30 = vadd.f32 1.0, %v873_v27 }
  0x83   :  { %v875_v28 = vpop.eup %874  ;;  %v598_v33 = vmul.f32 %v534_v29, %v342_v21 }
  0x84   :  { %v877_v35 = vpop.eup %876  ;;  %v599_v32 = vmul.f32 %v535_v30, %v343_v26  ;;  %v536_v36 = vadd.f32 1.0, %v875_v28 }
  0x85   :  { %663 = vst.msk [vmem:[%s1488_s3 + $0x1d0] sm:$0xff] %vm604_vm0, %v598_v33  ;;  %v537_v37 = vadd.f32 1.0, %v877_v35 }
  0x86   :  { %v879_v39 = vpop.eup %878  ;;  %664 = vst.msk [vmem:[%s1488_s3 + $0x1d8] sm:$0xff] %vm604_vm0, %v599_v32  ;;  %v600_v42 = vmul.f32 %v536_v36, %v344_v31 }
  0x87   :  { %v601_v43 = vmul.f32 %v537_v37, %v345_v34  ;;  %v538_v44 = vadd.f32 1.0, %v879_v39 }
  0x88   :  { %665 = vst.msk [vmem:[%s1488_s3 + $0x1e0] sm:$0xff] %vm604_vm0, %v600_v42 }
  0x89   :  { %v881_v45 = vpop.eup %880  ;;  %666 = vst.msk [vmem:[%s1488_s3 + $0x1e8] sm:$0xff] %vm604_vm0, %v601_v43  ;;  %v602_v41 = vmul.f32 %v538_v44, %v346_v38 }
  0x8a   :  { %v539_v46 = vadd.f32 1.0, %v881_v45 }
  0x8b   :  { %667 = vst.msk [vmem:[%s1488_s3 + $0x1f0] sm:$0xff] %vm604_vm0, %v602_v41 }
  0x8c   :  { %v603_v47 = vmul.f32 %v539_v46, %v347_v40 }
  0x8e   :  { %668 = vst.msk [vmem:[%s1488_s3 + $0x1f8] sm:$0xff] %vm604_vm0, %v603_v47 }

// kernel: conv_bn_relu_forward.2
= control target key start
LH: loop header
LB: loop body
LE: loop exit
PB: predicated region body
PF: predicated region fallthrough
CT: control target
= control target key end

     0   :  { %s4414_s15 = smov 0   ;;  %s4416_s16 = smov 0   ;;  %s6634_s0 = inlined_call_operand.vmem [shape: bf16[2,440,8], index: 0, kind: input, shape index: {}]   ;;  %s6635_s1 = inlined_call_operand.vmem [shape: bf16[3,24,128], index: 1, kind: input, shape index: {}]   ;;  %s6636_s2 = inlined_call_operand.vmem [shape: bf16[2,384,128], index: 2, kind: output, shape index: {0}]   ;;  %s6637_s3 = inlined_call_operand.vmem [shape: f32[2,8,128], index: 3, kind: output, shape index: {1}]   ;;  %s6638_s4 = inlined_call_operand.vmem [shape: f32[2,8,128], index: 4, kind: output, shape index: {2}]  }
   0x1   :  { %s4418_s17 = smov 0  }
   0x2 LB: > { %s27_s18 = sadd.s32 1, %s4380_s16  ;;  %p3457_p0 = scmp.ge.s32.totalorder %s4384_s17, 1  ;;  %s4384_s17 = sphi %s4418_s17, %s15_s17   ;;  %s4380_s16 = sphi %s4416_s16, %s6875_s16   ;;  %s4376_s15 = sphi %s4414_s15, %s6874_s15  }
   0x3   : > { %p29_p1 = scmp.ge.s32.totalorder %s27_s18, 2  ;;  %p185_p2 = scmp.lt.s32.totalorder %s4384_s17, 3 }
   0x5   : > { %s6877_s18 = smov (%p29_p1, %s27_s18), 0  ;;  %p186_p3 = pnand %p3457_p0, %p185_p2 }
   0x7   : > { %189 = sbr.rel (%p186_p3) target bundleno = 533 (0x215), region = 28 }
   0xe   : > { %p222_p4 = scmp.lt.s32.totalorder %s4376_s15, 1  ;;  %v4355_v0 = vld [vmem:[%s6635_s1 + $0xc] sm:$0xff]   ;;  %vm716_vm0 = vcmask 1046528   ;;  %v4446_v1 = vld [vmem:[%s6635_s1] sm:$0xff]   ;;  %vm438_vm1 = vsmask.f32 7424 }
   0xf   : > { %3942 = vmatprep.subr.bf16.mxu1 %v4355_v0  ;;  %3994 = vmatprep.subr.bf16.mxu0 %v4446_v1  ;;  %s4386_s27 = smov 16   ;;  %s4387_s28 = smov 8   ;;  %vm968_vm2 = vcmask 1043456   ;;  %vm826_vm3 = vcmask 64512   ;;  %vm881_vm4 = vcmask 130048   ;;  %vm1027_vm5 = vcmask 195584  }
  0x10   : > { %s6879_s15 = smov (!%p222_p4, %s4376_s15), 1  ;;  %3943 = vmatpush3.bf16.msra.mxu1 %v4355_v0  ;;  %3995 = vmatpush3.bf16.msra.mxu0 %v4446_v1 }
  0x11   : > { %s4202_s19 = smul.u32 220, %s6879_s15 }
  0x12   : > { %s4203_s11 = smul.u32 192, %s6879_s15 }
  0x13   : > { %s4441_s24 = scalar_lea.vmem %s6634_s0, %s4202_s19  ;;  %s3460_s19 = sshll.u32 %s6879_s15, 3 }
  0x14   : > { %v4449_v2 = vld [vmem:[%s4441_s24 + $0x10] sm:$0xff]   ;;  %v4452_v3 = vld [vmem:[%s4441_s24 + $0x18] sm:$0xff]   ;;  %v4456_v4 = vld [vmem:[%s4441_s24 + $0x8] sm:$0xff]   ;;  %s6169_s14 = scalar_lea.vmem %s6636_s2, %s4203_s11  ;;  %s238_s22 = scalar_lea.vmem %s6637_s3, %s3460_s19 }
  0x15   : > { %v720_v5 = vrot.slane %v4449_v2, 1  ;;  %v722_v6 = vrot.slane %v4452_v3, 1  ;;  %v718_v7 = vrot.slane %v4456_v4, 1  ;;  %v4463_v8 = vld [vmem:[%s4441_s24 + $0x20] sm:$0xff]   ;;  %v447_v9 = vshll.u32 %v4456_v4, 16  ;;  %v4474_v17 = vld [vmem:[%s4441_s24 + $0x28] sm:$0xff]   ;;  %s242_s25 = scalar_lea.vmem %s6638_s4, %s3460_s19 }
  0x16   : > { %v451_v10 = vshrl.u32 %v4456_v4, 16  ;;  %v455_v11 = vshll.u32 %v4449_v2, 16  ;;  %v463_v13 = vshll.u32 %v4452_v3, 16  ;;  %v467_v14 = vshrl.u32 %v4452_v3, 16  ;;  %v245_v16 = vld [vmem:[%s4441_s24 + $0x4] sm:$0xf] }
  0x17   : > { %v723_v12 = vsel %vm716_vm0, %v720_v5, %v722_v6  ;;  %v459_v15 = vshrl.u32 %v4449_v2, 16  ;;  %v721_v18 = vsel %vm716_vm0, %v718_v7, %v720_v5  ;;  %v724_v19 = vrot.slane %v4463_v8, 1  ;;  %v299_v22 = vld [vmem:[%s4441_s24] sm:$0xe]  ;;  %v4481_v23 = vld [vmem:[%s4441_s24 + $0x30] sm:$0xff]   ;;  %v4491_v35 = vld [vmem:[%s4441_s24 + $0x38] sm:$0xff]  }
  0x18   : > { %776 = vrot.lane.b32.xlu0 %v723_v12, %s4386_s27  ;;  %v449_v20 = vrot.slane %v447_v9, 1  ;;  %v457_v21 = vrot.slane %v455_v11, 1  ;;  %774 = vrot.lane.b32.xlu1 %v721_v18, %s4386_s27  ;;  %v465_v24 = vrot.slane %v463_v13, 1  ;;  %v471_v25 = vshll.u32 %v4463_v8, 16  ;;  %v244_v27 = vld [vmem:[%s4441_s24] sm:$0xf] }
  0x19   : > { %v3490_v26 = vcombine.low %v299_v22, %v245_v16  ;;  %v725_v28 = vsel %vm716_vm0, %v722_v6, %v724_v19  ;;  %v4487_v31 = vcombine.low %v244_v27, %v245_v16  ;;  %v479_v34 = vshll.u32 %v4474_v17, 16  ;;  %v4509_v54 = vld [vmem:[%s4441_s24 + $0x40] sm:$0xff]   ;;  %v4521_v63 = vld [vmem:[%s4441_s24 + $0x48] sm:$0xff]   ;;  %v4528_v6 = vld [vmem:[%s4441_s24 + $0x50] sm:$0xff]  }
  0x1a   : > { %v453_v29 = vor.u32 %v451_v10, %v449_v20  ;;  %v461_v30 = vor.u32 %v459_v15, %v457_v21  ;;  %v469_v32 = vor.u32 %v467_v14, %v465_v24  ;;  %v473_v33 = vrot.slane %v471_v25, 1  ;;  %v4532_v12 = vld [vmem:[%s4441_s24 + $0x58] sm:$0xff]   ;;  %v4548_v25 = vld [vmem:[%s4441_s24 + $0x60] sm:$0xff]  }
  0x1b   : > { %v440_v37 = vshrl.u32 %v4487_v31, 16  ;;  %v442_v38 = vshll.u32 %v4487_v31, 16  ;;  %v717_v41 = vrot.slane %v3490_v26, 1  ;;  %v481_v42 = vrot.slane %v479_v34, 1 }
  0x1c   : > { %v458_v36 = vsel %vm438_vm1, %v453_v29, %v457_v21  ;;  %778 = vrot.lane.b32.xlu1 %v725_v28, %s4386_s27  ;;  %v474_v39 = vsel %vm438_vm1, %v469_v32, %v473_v33  ;;  %v466_v40 = vsel %vm438_vm1, %v461_v30, %v465_v24  ;;  %v483_v44 = vshrl.u32 %v4474_v17, 16 }
  0x1d   : > { %661 = vrot.lane.b32.xlu0 %v458_v36, %s4387_s28  ;;  %v444_v43 = vrot.slane %v442_v38, 1  ;;  %v487_v45 = vshll.u32 %v4481_v23, 16  ;;  %v475_v46 = vshrl.u32 %v4463_v8, 16  ;;  %v719_v48 = vsel %vm716_vm0, %v717_v41, %v718_v7 }
  0x1e   : > { %v495_v49 = vshll.u32 %v4491_v35, 16  ;;  %v485_v51 = vor.u32 %v483_v44, %v481_v42  ;;  %v726_v55 = vrot.slane %v4474_v17, 1  ;;  %v728_v56 = vrot.slane %v4481_v23, 1 }
  0x1f   : > { %v445_v47 = vor.u32 %v444_v43, %v440_v37  ;;  %v489_v52 = vrot.slane %v487_v45, 1  ;;  %v477_v53 = vor.u32 %v475_v46, %v473_v33  ;;  %v499_v58 = vshrl.u32 %v4491_v35, 16  ;;  %v4554_v33 = vld [vmem:[%s4441_s24 + $0x68] sm:$0xff]  }
  0x20   : > { %665 = vrot.lane.b32.xlu1 %v474_v39, %s4387_s28  ;;  %v497_v57 = vrot.slane %v495_v49, 1  ;;  %v503_v61 = vshll.u32 %v4509_v54, 16  ;;  %v491_v62 = vshrl.u32 %v4481_v23, 16  ;;  %v729_v0 = vsel %vm716_vm0, %v726_v55, %v728_v56 }
  0x21   : > { %663 = vrot.lane.b32.xlu0 %v466_v40, %s4387_s28  ;;  %v450_v50 = vsel %vm438_vm1, %v445_v47, %v449_v20  ;;  %v490_v59 = vsel %vm438_vm1, %v485_v51, %v489_v52  ;;  %v482_v60 = vsel %vm438_vm1, %v477_v53, %v481_v42  ;;  %v727_v5 = vsel %vm716_vm0, %v724_v19, %v726_v55  ;;  %v4567_v42 = vld [vmem:[%s4441_s24 + $0x70] sm:$0xff]  }
  0x22   : > { %v501_v7 = vor.u32 %v499_v58, %v497_v57  ;;  %v505_v9 = vrot.slane %v503_v61, 1  ;;  %v493_v10 = vor.u32 %v491_v62, %v489_v52  ;;  %v511_v11 = vshll.u32 %v4521_v63, 16  ;;  %v4577_v52 = vld [vmem:[%s4441_s24 + $0xd0] sm:$0xff]   ;;  %v4584_v58 = vld [vmem:[%s4441_s24 + $0x78] sm:$0xff]   ;;  %v4595_v61 = vld [vmem:[%s6635_s1 + $0x8] ss:$0 sps:$4 sm:$0xff]  }
  0x23   : > { %v730_v13 = vrot.slane %v4491_v35, 1  ;;  %v732_v14 = vrot.slane %v4509_v54, 1  ;;  %v515_v15 = vshrl.u32 %v4521_v63, 16  ;;  %v519_v16 = vshll.u32 %v4528_v6, 16  ;;  %4199 = vmatprep.subr.msk.bf16.mxu0 %vm968_vm2, %v4595_v61 }
  0x24   : > { %772 = vrot.lane.b32.xlu1 %v719_v48, %s4386_s27  ;;  %v506_v18 = vsel %vm438_vm1, %v501_v7, %v505_v9  ;;  %v498_v19 = vsel %vm438_vm1, %v493_v10, %v497_v57  ;;  %v513_v20 = vrot.slane %v511_v11, 1  ;;  %v507_v21 = vshrl.u32 %v4509_v54, 16  ;;  %v4360_v7 = vld [vmem:[%s4441_s24 + $0xd8] ss:$0 sps:$4 sm:$0x11]  }
  0x25   : > { %659 = vrot.lane.b32.xlu0 %v450_v50, %s4387_s28  ;;  %v733_v22 = vsel %vm716_vm0, %v730_v13, %v732_v14  ;;  %v731_v24 = vsel %vm716_vm0, %v728_v56, %v730_v13  ;;  %v521_v27 = vrot.slane %v519_v16, 1  ;;  %v527_v29 = vshll.u32 %v4532_v12, 16 }
  0x26   : > { %v517_v26 = vor.u32 %v515_v15, %v513_v20  ;;  %v509_v28 = vor.u32 %v507_v21, %v505_v9  ;;  %v734_v30 = vrot.slane %v4521_v63, 1  ;;  %v736_v32 = vrot.slane %v4528_v6, 1 }
  0x27   : > { %v531_v34 = vshrl.u32 %v4532_v12, 16  ;;  %v535_v36 = vshll.u32 %v4548_v25, 16  ;;  %v529_v39 = vrot.slane %v527_v29, 1  ;;  %v523_v40 = vshrl.u32 %v4528_v6, 16 }
  0x28   : > { %669 = vrot.lane.b32.xlu1 %v490_v59, %s4387_s28  ;;  %v522_v37 = vsel %vm438_vm1, %v517_v26, %v521_v27  ;;  %v514_v38 = vsel %vm438_vm1, %v509_v28, %v513_v20  ;;  %v737_v41 = vsel %vm716_vm0, %v734_v30, %v736_v32  ;;  %v543_v43 = vshll.u32 %v4554_v33, 16  ;;  %v4587_v59 = vld [vmem:[%s4441_s24 + $0x80] sm:$0xff]  }
  0x29   : > { %667 = vrot.lane.b32.xlu0 %v482_v60, %s4387_s28  ;;  %v735_v44 = vsel %vm716_vm0, %v732_v14, %v734_v30  ;;  %v533_v45 = vor.u32 %v531_v34, %v529_v39  ;;  %v537_v46 = vrot.slane %v535_v36, 1  ;;  %v525_v47 = vor.u32 %v523_v40, %v521_v27  ;;  %v4357_v60 = vld [vmem:[%s6635_s1 + $0x14] ss:$0 sps:$4 sm:$0xff]  }
  0x2a   : > { %v738_v48 = vrot.slane %v4532_v12, 1  ;;  %v545_v49 = vrot.slane %v543_v43, 1  ;;  %v547_v50 = vshrl.u32 %v4554_v33, 16  ;;  %v551_v51 = vshll.u32 %v4567_v42, 16  ;;  %4198 = vmatprep.subr.msk.bf16.mxu1 %vm968_vm2, %v4357_v60  ;;  %v4647_v43 = vld [vmem:[%s4441_s24 + $0x90] sm:$0xff]  }
  0x2b   : > { %v538_v53 = vsel %vm438_vm1, %v533_v45, %v537_v46  ;;  %v530_v55 = vsel %vm438_vm1, %v525_v47, %v529_v39  ;;  %v740_v56 = vrot.slane %v4548_v25, 1  ;;  %v539_v57 = vshrl.u32 %v4548_v25, 16 }
  0x2c   : > { %782 = vrot.lane.b32.xlu1 %v729_v0, %s4386_s27  ;;  %v549_v62 = vor.u32 %v547_v50, %v545_v49  ;;  %v553_v0 = vrot.slane %v551_v51, 1  ;;  %v739_v10 = vsel %vm716_vm0, %v736_v32, %v738_v48  ;;  %v559_v13 = vshll.u32 %v4584_v58, 16  ;;  %v4630_v32 = vld [vmem:[%s4441_s24 + $0x88] sm:$0xff]  }
  0x2d   : > { %780 = vrot.lane.b32.xlu0 %v727_v5, %s4386_s27  ;;  %v647_v5 = vshll.u32 %v4577_v52, 16  ;;  %v741_v9 = vsel %vm716_vm0, %v738_v48, %v740_v56  ;;  %v541_v11 = vor.u32 %v539_v57, %v537_v46  ;;  %v742_v14 = vrot.slane %v4554_v33, 1 }
  0x2e   : > { %v744_v15 = vrot.slane %v4567_v42, 1  ;;  %v563_v16 = vshrl.u32 %v4584_v58, 16  ;;  %v555_v20 = vshrl.u32 %v4567_v42, 16  ;;  %v1102_v21 = vsel %vm968_vm2, %v4357_v60, 0 }
  0x2f   : > { %v4625_v26 = vrot.slane %v647_v5, 1  ;;  %v651_v27 = vshrl.u32 %v4577_v52, 16  ;;  %v655_v28 = vshll.u32 %v4360_v7, 16  ;;  %v546_v29 = vsel %vm438_vm1, %v541_v11, %v545_v49  ;;  %3945 = vmatpush3.bf16.msra.mxu1 %v1102_v21 }
  0x30   : > { %673 = vrot.lane.b32.xlu1 %v506_v18, %s4387_s28  ;;  %v4610_v18 = vld [vmem:[%s6635_s1 + $0x18] sm:$0xff]   ;;  %v561_v30 = vrot.slane %v559_v13, 1  ;;  %v768_v34 = vrot.slane %v4577_v52, 1  ;;  %v770_v36 = vrot.slane %v4360_v7, 1  ;;  %4098 = vmatprep.subr.bf16.mxu1 %v4446_v1  ;;  %v745_v40 = vsel %vm716_vm0, %v742_v14, %v744_v15  ;;  %v4670_v7 = vld [vmem:[%s4441_s24 + $0xa0] sm:$0xff]  }
  0x31   : > { %671 = vrot.lane.b32.xlu0 %v498_v19, %s4387_s28  ;;  %v567_v19 = vshll.u32 %v4587_v59, 16  ;;  %v557_v47 = vor.u32 %v555_v20, %v553_v0  ;;  %v575_v48 = vshll.u32 %v4630_v32, 16  ;;  %v746_v49 = vrot.slane %v4584_v58, 1 }
  0x32   : > { %v4640_v39 = vsel %vm716_vm0, %v768_v34, %v770_v36  ;;  %v565_v45 = vor.u32 %v563_v16, %v561_v30  ;;  %v748_v50 = vrot.slane %v4587_v59, 1  ;;  %v579_v51 = vshrl.u32 %v4630_v32, 16  ;;  %v4690_v36 = vld [vmem:[%s4441_s24 + $0xb0] sm:$0xff]  }
  0x33   : > { %v569_v46 = vrot.slane %v567_v19, 1  ;;  %v577_v57 = vrot.slane %v575_v48, 1  ;;  %v571_v60 = vshrl.u32 %v4587_v59, 16  ;;  %v747_v5 = vsel %vm716_vm0, %v744_v15, %v746_v49 }
  0x34   : > { %786 = vrot.lane.b32.xlu1 %v733_v22, %s4386_s27  ;;  %v4620_v22 = vsel %vm968_vm2, %v4595_v61, 0  ;;  %v752_v16 = vrot.slane %v4647_v43, 1  ;;  %v599_v15 = vshll.u32 %v4670_v7, 16  ;;  %v615_v48 = vshll.u32 %v4690_v36, 16 }
  0x35   : > { %784 = vrot.lane.b32.xlu0 %v731_v24, %s4386_s27  ;;  %v554_v24 = vsel %vm438_vm1, %v549_v62, %v553_v0  ;;  %3997 = vmatpush3.bf16.msra.mxu0 %v4620_v22  ;;  %v4663_v62 = vld [vmem:[%s4441_s24 + $0x98] sm:$0xff]   ;;  %v749_v0 = vsel %vm716_vm0, %v746_v49, %v748_v50  ;;  %v573_v11 = vor.u32 %v571_v60, %v569_v46  ;;  %v4710_v60 = vld [vmem:[%s4441_s24 + $0xc0] sm:$0xff]  }
  0x36   : > { %4046 = vmatprep.subr.bf16.mxu0 %v4610_v18  ;;  %v591_v13 = vshll.u32 %v4663_v62, 16  ;;  %v595_v19 = vshrl.u32 %v4663_v62, 16 }
  0x37   : > { %v578_v21 = vsel %vm438_vm1, %v573_v11, %v577_v57 }
  0x38   : > { %677 = vrot.lane.b32.xlu1 %v522_v37, %s4387_s28  ;;  %v653_v37 = vor.u32 %v651_v27, %v4625_v26  ;;  %v587_v27 = vshrl.u32 %v4647_v43, 16 }
  0x39   : > { %675 = vrot.lane.b32.xlu0 %v514_v38, %s4387_s28  ;;  %v657_v38 = vrot.slane %v655_v28, 1  ;;  %v4683_v28 = vld [vmem:[%s4441_s24 + $0xa8] sm:$0xff]  }
  0x3a   : > { %v758_v11 = vrot.slane %v4683_v28, 1 }
  0x3c   : > { %790 = vrot.lane.b32.xlu1 %v737_v41, %s4386_s27  ;;  %v743_v41 = vsel %vm716_vm0, %v740_v56, %v742_v14  ;;  %v562_v56 = vsel %vm438_vm1, %v557_v47, %v561_v30  ;;  %v750_v14 = vrot.slane %v4630_v32, 1  ;;  %v611_v47 = vshrl.u32 %v4683_v28, 16 }
  0x3d   : > { %788 = vrot.lane.b32.xlu0 %v735_v44, %s4386_s27  ;;  %v4650_v44 = vsel %vm438_vm1, %v653_v37, %v657_v38  ;;  %v601_v38 = vrot.slane %v599_v15, 1 }
  0x3e   : > { %v751_v30 = vsel %vm716_vm0, %v748_v50, %v750_v14 }
  0x40   : > { %681 = vrot.lane.b32.xlu1 %v538_v53, %s4387_s28  ;;  %v583_v53 = vshll.u32 %v4647_v43, 16 }
  0x41   : > { %679 = vrot.lane.b32.xlu0 %v530_v55, %s4387_s28  ;;  %v570_v55 = vsel %vm438_vm1, %v565_v45, %v569_v46  ;;  %v754_v45 = vrot.slane %v4663_v62, 1  ;;  %v756_v46 = vrot.slane %v4670_v7, 1 }
  0x44   : > { %794 = vrot.lane.b32.xlu1 %v741_v9, %s4386_s27  ;;  %v581_v9 = vor.u32 %v579_v51, %v577_v57  ;;  %v755_v57 = vsel %vm716_vm0, %v752_v16, %v754_v45 }
  0x45   : > { %792 = vrot.lane.b32.xlu0 %v739_v10, %s4386_s27  ;;  %v585_v10 = vrot.slane %v583_v53, 1  ;;  %v603_v53 = vshrl.u32 %v4670_v7, 16 }
  0x47   : > { %v586_v20 = vsel %vm438_vm1, %v581_v9, %v585_v10  ;;  %v605_v9 = vor.u32 %v603_v53, %v601_v38 }
  0x48   : > { %685 = vrot.lane.b32.xlu1 %v554_v24, %s4387_s28  ;;  %v593_v24 = vrot.slane %v591_v13, 1  ;;  %v760_v13 = vrot.slane %v4690_v36, 1 }
  0x49   : > { %683 = vrot.lane.b32.xlu0 %v546_v29, %s4387_s28  ;;  %v753_v29 = vsel %vm716_vm0, %v750_v14, %v752_v16  ;;  %v631_v16 = vshll.u32 %v4710_v60, 16 }
  0x4a   : > { %v597_v37 = vor.u32 %v595_v19, %v593_v24 }
  0x4c   : > { %798 = vrot.lane.b32.xlu1 %v745_v40, %s4386_s27  ;;  %v589_v40 = vor.u32 %v587_v27, %v585_v10  ;;  %v602_v49 = vsel %vm438_vm1, %v597_v37, %v601_v38  ;;  %v761_v27 = vsel %vm716_vm0, %v758_v11, %v760_v13  ;;  %v633_v37 = vrot.slane %v631_v16, 1 }
  0x4d   : > { %796 = vrot.lane.b32.xlu0 %v743_v41, %s4386_s27  ;;  %v607_v41 = vshll.u32 %v4683_v28, 16 }
  0x4e   : > { %v594_v50 = vsel %vm438_vm1, %v589_v40, %v593_v24  ;;  %v4723_v24 = vld [vmem:[%s4441_s24 + $0xc8] sm:$0xff]  }
  0x4f   : > { %v609_v51 = vrot.slane %v607_v41, 1  ;;  %v639_v40 = vshll.u32 %v4723_v24, 16 }
  0x50   : > { %689 = vrot.lane.b32.xlu1 %v570_v55, %s4387_s28  ;;  %v4703_v55 = vld [vmem:[%s4441_s24 + $0xb8] sm:$0xff]  }
  0x51   : > { %687 = vrot.lane.b32.xlu0 %v562_v56, %s4387_s28  ;;  %v757_v56 = vsel %vm716_vm0, %v754_v45, %v756_v46  ;;  %v623_v10 = vshll.u32 %v4703_v55, 16  ;;  %v627_v14 = vshrl.u32 %v4703_v55, 16  ;;  %v610_v15 = vsel %vm438_vm1, %v605_v9, %v609_v51 }
  0x52   : > { %v762_v41 = vrot.slane %v4703_v55, 1  ;;  %v764_v45 = vrot.slane %v4710_v60, 1  ;;  %v766_v9 = vrot.slane %v4723_v24, 1 }
  0x54   : > { %802 = vrot.lane.b32.xlu1 %v749_v0, %s4386_s27  ;;  %v613_v0 = vor.u32 %v611_v47, %v609_v51  ;;  %v643_v47 = vshrl.u32 %v4723_v24, 16  ;;  %v765_v51 = vsel %vm716_vm0, %v762_v41, %v764_v45  ;;  %v763_v53 = vsel %vm716_vm0, %v760_v13, %v762_v41 }
  0x55   : > { %800 = vrot.lane.b32.xlu0 %v747_v5, %s4386_s27  ;;  %v617_v5 = vrot.slane %v615_v48, 1 }
  0x57   : > { %v618_v19 = vsel %vm438_vm1, %v613_v0, %v617_v5 }
  0x58   : > { %693 = vrot.lane.b32.xlu1 %v586_v20, %s4387_s28  ;;  %v625_v20 = vrot.slane %v623_v10, 1  ;;  %v769_v10 = vsel %vm716_vm0, %v766_v9, %v768_v34 }
  0x59   : > { %691 = vrot.lane.b32.xlu0 %v578_v21, %s4387_s28  ;;  %v619_v21 = vshrl.u32 %v4690_v36, 16 }
  0x5b   : > { %v621_v38 = vor.u32 %v619_v21, %v617_v5 }
  0x5c   : > { %806 = vrot.lane.b32.xlu1 %v753_v29, %s4386_s27  ;;  %v759_v29 = vsel %vm716_vm0, %v756_v46, %v758_v11  ;;  %v641_v46 = vrot.slane %v639_v40, 1  ;;  %v767_v11 = vsel %vm716_vm0, %v764_v45, %v766_v9  ;;  %v4361_v45 = vld [vmem:[%s6635_s1 + $0x20] ss:$0 sps:$4 sm:$0xff]  }
  0x5d   : > { %804 = vrot.lane.b32.xlu0 %v751_v30, %s4386_s27  ;;  %v629_v30 = vor.u32 %v627_v14, %v625_v20 }
  0x5f   : > { %v634_v48 = vsel %vm438_vm1, %v629_v30, %v633_v37 }
  0x60   : > { %697 = vrot.lane.b32.xlu1 %v602_v49, %s4387_s28  ;;  %v626_v49 = vsel %vm438_vm1, %v621_v38, %v625_v20 }
  0x61   : > { %695 = vrot.lane.b32.xlu0 %v594_v50, %s4387_s28  ;;  %v635_v50 = vshrl.u32 %v4710_v60, 16 }
  0x64   : > { %810 = vrot.lane.b32.xlu1 %v757_v56, %s4386_s27  ;;  %v645_v56 = vor.u32 %v643_v47, %v641_v46 }
  0x65   : > { %808 = vrot.lane.b32.xlu0 %v755_v57, %s4386_s27  ;;  %v637_v57 = vor.u32 %v635_v50, %v633_v37 }
  0x66   : > { %v650_v0 = vsel %vm438_vm1, %v645_v56, %v4625_v26 }
  0x67   : > { %v642_v5 = vsel %vm438_vm1, %v637_v57, %v641_v46 }
  0x68   : > { %701 = vrot.lane.b32.xlu1 %v618_v19, %s4387_s28 }
  0x69   : > { %699 = vrot.lane.b32.xlu0 %v610_v15, %s4387_s28 }
  0x6c   : > { %814 = vrot.lane.b32.xlu1 %v761_v27, %s4386_s27 }
  0x6d   : > { %812 = vrot.lane.b32.xlu0 %v759_v29, %s4386_s27 }
  0x70   : > { %705 = vrot.lane.b32.xlu1 %v634_v48, %s4387_s28  ;;  %v1634_v48 = vsel %vm968_vm2, %v4361_v45, 0 }
  0x71   : > { %703 = vrot.lane.b32.xlu0 %v626_v49, %s4387_s28 }
  0x74   : > { %818 = vrot.lane.b32.xlu1 %v765_v51, %s4386_s27 }
  0x75   : > { %816 = vrot.lane.b32.xlu0 %v763_v53, %s4386_s27 }
  0x78   : > { %709 = vrot.lane.b32.xlu1 %v650_v0, %s4387_s28 }
  0x79   : > { %707 = vrot.lane.b32.xlu0 %v642_v5, %s4387_s28 }
  0x7c   : > { %822 = vrot.lane.b32.xlu1 %v769_v10, %s4386_s27 }
  0x7d   : > { %820 = vrot.lane.b32.xlu0 %v767_v11, %s4386_s27 }
  0x80   : > { %824 = vrot.lane.b32.xlu1 %v4640_v39, %s4386_s27 }
  0x81   : > { %711 = vrot.lane.b32.xlu0 %v4650_v44, %s4387_s28 }
  0x8a   : > { %v777_v26 = vpop.permute.xlu0 %776  ;;  %v775_v13 = vpop.permute.xlu1 %774 }
  0x8e   : > { %v779_v14 = vpop.permute.xlu1 %778 }
  0x8f   : > { %v662_v16 = vpop.permute.xlu0 %661 }
  0x90   : > { %v830_v34 = vsel %vm826_vm3, %v4456_v4, %v662_v16 }
  0x91   : > { %v885_v19 = vsel %vm881_vm4, %v830_v34, %v775_v13 }
  0x92   : > { %v666_v15 = vpop.permute.xlu1 %665  ;;  %v969_v30 = vrot.slane %v885_v19, 4 }
  0x93   : > { %v664_v20 = vpop.permute.xlu0 %663  ;;  %v834_v21 = vsel %vm826_vm3, %v4452_v3, %v666_v15 }
  0x94   : > { %v832_v44 = vsel %vm826_vm3, %v4449_v2, %v664_v20  ;;  %v4768_v39 = vsel %vm881_vm4, %v834_v21, %v779_v14 }
  0x95   : > { %v887_v27 = vsel %vm881_vm4, %v832_v44, %v777_v26  ;;  %v972_v29 = vrot.slane %v4768_v39, 4 }
  0x96   : > { %v970_v37 = vrot.slane %v887_v27, 4  ;;  %v773_v4 = vpop.permute.xlu1 %772 }
  0x97   : > { %v660_v38 = vpop.permute.xlu0 %659 }
  0x98   : > { %v828_v40 = vsel %vm826_vm3, %v4487_v31, %v660_v38  ;;  %v971_v3 = vsel %vm968_vm2, %v969_v30, %v970_v37  ;;  %v973_v41 = vsel %vm968_vm2, %v970_v37, %v972_v29 }
  0x99   : > { %3946 = vmatprep.mubr.msk.bf16.mxu1 %vm1027_vm5, %v971_v3  ;;  %v883_v2 = vsel %vm881_vm4, %v828_v40, %v773_v4 }
  0x9a   : > { %3947 = vmatmul.mubr.msk.bf16.vlgmr.msra.gmra.mrb[0].mxu1 %vm1027_vm5, %v973_v41  ;;  %3998 = vmatprep.mubr.msk.bf16.mxu0 %vm1027_vm5, %v883_v2  ;;  %v670_v47 = vpop.permute.xlu1 %669 }
  0x9b   : > { %3999 = vmatmul.mubr.msk.bf16.vlgmr.msra.gmra.mrb[0].mxu0 %vm1027_vm5, %v885_v19  ;;  %v668_v31 = vpop.permute.xlu0 %667  ;;  %4100 = vmatpush3.bf16.msra.mxu1 %v4446_v1  ;;  %v838_v49 = vsel %vm826_vm3, %v4474_v17, %v670_v47 }
  0x9c   : > { %4002 = vmatprep.mubr.msk.bf16.mxu0 %vm1027_vm5, %v887_v27  ;;  %4047 = vmatpush3.bf16.msra.mxu0 %v4610_v18  ;;  %v836_v46 = vsel %vm826_vm3, %v4463_v8, %v668_v31 }
  0x9d   : > { %4201 = vmatprep.subr.msk.bf16.mxu0 %vm968_vm2, %v4361_v45  ;;  %4200 = vmatprep.subr.msk.bf16.mxu1 %vm968_vm2, %v4595_v61 }
  0x9e   : > { %v783_v50 = vpop.permute.xlu1 %782 }
  0x9f   : > { %v781_v51 = vpop.permute.xlu0 %780  ;;  %4101 = vmatpush3.bf16.msra.mxu1 %v4620_v22  ;;  %v4797_v1 = vsel %vm881_vm4, %v838_v49, %v783_v50 }
  0xa0   : > { %v4800_v18 = vsel %vm881_vm4, %v836_v46, %v781_v51  ;;  %4049 = vmatpush3.bf16.msra.mxu0 %v1634_v48  ;;  %v976_v53 = vrot.slane %v4797_v1, 4 }
  0xa1   : > { %v974_v61 = vrot.slane %v4800_v18, 4 }
  0xa2   : > { %v674_v56 = vpop.permute.xlu1 %673 }
  0xa3   : > { %4003 = vmatmul.mubr.msk.bf16.gmra.mrb[4].mxu0 %vm1027_vm5, %v4768_v39  ;;  %v672_v8 = vpop.permute.xlu0 %671  ;;  %v975_v17 = vsel %vm968_vm2, %v972_v29, %v974_v61  ;;  %v977_v22 = vsel %vm968_vm2, %v974_v61, %v976_v53  ;;  %v842_v57 = vsel %vm826_vm3, %v4491_v35, %v674_v56 }
  0xa4   : > { %3950 = vmatprep.mubr.msk.bf16.mxu1 %vm1027_vm5, %v975_v17  ;;  %4006 = vmatprep.mubr.msk.bf16.mxu0 %vm1027_vm5, %v4800_v18  ;;  %v840_v0 = vsel %vm826_vm3, %v4481_v23, %v672_v8 }
  0xa5   : > { %3951 = vmatmul.mubr.msk.bf16.gmra.mrb[4].mxu1 %vm1027_vm5, %v977_v22 }
  0xa6   : > { %v787_v5 = vpop.permute.xlu1 %786 }
  0xa7   : > { %v785_v9 = vpop.permute.xlu0 %784  ;;  %v4817_v10 = vsel %vm881_vm4, %v842_v57, %v787_v5 }
  0xa8   : > { %v4820_v11 = vsel %vm881_vm4, %v840_v0, %v785_v9  ;;  %v980_v26 = vrot.slane %v4817_v10, 4 }
  0xa9   : > { %v978_v13 = vrot.slane %v4820_v11, 4 }
  0xaa   : > { %v678_v14 = vpop.permute.xlu1 %677 }
  0xab   : > { %4007 = vmatmul.mubr.msk.bf16.gmra.mrb[8].mxu0 %vm1027_vm5, %v4797_v1  ;;  %v676_v35 = vpop.permute.xlu0 %675  ;;  %v979_v16 = vsel %vm968_vm2, %v976_v53, %v978_v13  ;;  %v981_v23 = vsel %vm968_vm2, %v978_v13, %v980_v26  ;;  %v846_v34 = vsel %vm826_vm3, %v4521_v63, %v678_v14 }
  0xac   : > { %3954 = vmatprep.mubr.msk.bf16.mxu1 %vm1027_vm5, %v979_v16  ;;  %4010 = vmatprep.mubr.msk.bf16.mxu0 %vm1027_vm5, %v4820_v11  ;;  %v844_v19 = vsel %vm826_vm3, %v4509_v54, %v676_v35 }
  0xad   : > { %3955 = vmatmul.mubr.msk.bf16.gmra.mrb[8].mxu1 %vm1027_vm5, %v981_v23 }
  0xae   : > { %v791_v15 = vpop.permute.xlu1 %790 }
  0xaf   : > { %v789_v20 = vpop.permute.xlu0 %788  ;;  %v4837_v21 = vsel %vm881_vm4, %v846_v34, %v791_v15 }
  0xb0   : > { %v4840_v44 = vsel %vm881_vm4, %v844_v19, %v789_v20  ;;  %v984_v27 = vrot.slane %v4837_v21, 4 }
  0xb1   : > { %v982_v29 = vrot.slane %v4840_v44, 4 }
  0xb2   : > { %v682_v30 = vpop.permute.xlu1 %681 }
  0xb3   : > { %4011 = vmatmul.mubr.msk.bf16.gmra.mrb[12].mxu0 %vm1027_vm5, %v4817_v10  ;;  %v680_v63 = vpop.permute.xlu0 %679  ;;  %v983_v37 = vsel %vm968_vm2, %v980_v26, %v982_v29  ;;  %v985_v54 = vsel %vm968_vm2, %v982_v29, %v984_v27  ;;  %v850_v4 = vsel %vm826_vm3, %v4532_v12, %v682_v30 }
  0xb4   : > { %3958 = vmatprep.mubr.msk.bf16.mxu1 %vm1027_vm5, %v983_v37  ;;  %4014 = vmatprep.mubr.msk.bf16.mxu0 %vm1027_vm5, %v4840_v44  ;;  %v848_v38 = vsel %vm826_vm3, %v4528_v6, %v680_v63 }
  0xb5   : > { %3959 = vmatmul.mubr.msk.bf16.gmra.mrb[12].mxu1 %vm1027_vm5, %v985_v54 }
  0xb6   : > { %v795_v40 = vpop.permute.xlu1 %794 }
  0xb7   : > { %v793_v3 = vpop.permute.xlu0 %792  ;;  %v4857_v41 = vsel %vm881_vm4, %v850_v4, %v795_v40 }
  0xb8   : > { %v4860_v2 = vsel %vm881_vm4, %v848_v38, %v793_v3  ;;  %v988_v45 = vrot.slane %v4857_v41, 4 }
  0xb9   : > { %v986_v47 = vrot.slane %v4860_v2, 4 }
  0xba   : > { %v686_v31 = vpop.permute.xlu1 %685 }
  0xbb   : > { %4015 = vmatmul.mubr.msk.bf16.gmra.mrb[16].mxu0 %vm1027_vm5, %v4837_v21  ;;  %v684_v12 = vpop.permute.xlu0 %683  ;;  %v987_v48 = vsel %vm968_vm2, %v984_v27, %v986_v47  ;;  %v989_v6 = vsel %vm968_vm2, %v986_v47, %v988_v45  ;;  %v854_v49 = vsel %vm826_vm3, %v4554_v33, %v686_v31 }
  0xbc   : > { %3962 = vmatprep.mubr.msk.bf16.mxu1 %vm1027_vm5, %v987_v48  ;;  %4018 = vmatprep.mubr.msk.bf16.mxu0 %vm1027_vm5, %v4860_v2  ;;  %v852_v46 = vsel %vm826_vm3, %v4548_v25, %v684_v12 }
  0xbd   : > { %3963 = vmatmul.mubr.msk.bf16.gmra.mrb[16].mxu1 %vm1027_vm5, %v989_v6 }
  0xbe   : > { %v799_v50 = vpop.permute.xlu1 %798 }
  0xbf   : > { %v797_v51 = vpop.permute.xlu0 %796  ;;  %v4877_v53 = vsel %vm881_vm4, %v854_v49, %v799_v50 }
  0xc0   : > { %v4880_v61 = vsel %vm881_vm4, %v852_v46, %v797_v51  ;;  %v992_v56 = vrot.slane %v4877_v53, 4 }
  0xc1   : > { %v990_v8 = vrot.slane %v4880_v61, 4 }
  0xc2   : > { %v690_v17 = vpop.permute.xlu1 %689 }
  0xc3   : > { %4019 = vmatmul.mubr.msk.bf16.gmra.mrb[20].mxu0 %vm1027_vm5, %v4857_v41  ;;  %v688_v33 = vpop.permute.xlu0 %687  ;;  %v991_v22 = vsel %vm968_vm2, %v988_v45, %v990_v8  ;;  %v993_v25 = vsel %vm968_vm2, %v990_v8, %v992_v56  ;;  %v858_v57 = vsel %vm826_vm3, %v4584_v58, %v690_v17 }
  0xc4   : > { %3966 = vmatprep.mubr.msk.bf16.mxu1 %vm1027_vm5, %v991_v22  ;;  %4050 = vmatprep.mubr.msk.bf16.mxu0 %vm1027_vm5, %v4768_v39  ;;  %v856_v0 = vsel %vm826_vm3, %v4567_v42, %v688_v33 }
  0xc5   : > { %3967 = vmatmul.mubr.msk.bf16.gmra.mrb[20].mxu1 %vm1027_vm5, %v993_v25 }
  0xc6   : > { %v803_v5 = vpop.permute.xlu1 %802 }
  0xc7   : > { %v801_v9 = vpop.permute.xlu0 %800  ;;  %v4897_v26 = vsel %vm881_vm4, %v858_v57, %v803_v5 }
  0xc8   : > { %v4900_v13 = vsel %vm881_vm4, %v856_v0, %v801_v9  ;;  %v996_v14 = vrot.slane %v4897_v26, 4 }
  0xc9   : > { %v994_v39 = vrot.slane %v4900_v13, 4 }
  0xca   : > { %v694_v35 = vpop.permute.xlu1 %693 }
  0xcb   : > { %4051 = vmatmul.mubr.msk.bf16.vlgmr.msra.gmra.mrb[0].mxu0 %vm1027_vm5, %v4800_v18  ;;  %v692_v58 = vpop.permute.xlu0 %691  ;;  %v995_v16 = vsel %vm968_vm2, %v992_v56, %v994_v39  ;;  %v997_v42 = vsel %vm968_vm2, %v994_v39, %v996_v14  ;;  %v862_v23 = vsel %vm826_vm3, %v4630_v32, %v694_v35 }
  0xcc   : > { %3970 = vmatprep.mubr.msk.bf16.mxu1 %vm1027_vm5, %v995_v16  ;;  %4054 = vmatprep.mubr.msk.bf16.mxu0 %vm1027_vm5, %v4797_v1  ;;  %v860_v34 = vsel %vm826_vm3, %v4587_v59, %v692_v58 }
  0xcd   : > { %3971 = vmatmul.mubr.msk.bf16.gmra.mrb[24].mxu1 %vm1027_vm5, %v997_v42 }
  0xce   : > { %v807_v19 = vpop.permute.xlu1 %806 }
  0xcf   : > { %v805_v18 = vpop.permute.xlu0 %804  ;;  %v4917_v15 = vsel %vm881_vm4, %v862_v23, %v807_v19 }
  0xd0   : > { %v4920_v20 = vsel %vm881_vm4, %v860_v34, %v805_v18  ;;  %v1000_v27 = vrot.slane %v4917_v15, 4 }
  0xd1   : > { %v998_v1 = vrot.slane %v4920_v20, 4 }
  0xd2   : > { %v698_v29 = vpop.permute.xlu1 %697 }
  0xd3   : > { %4055 = vmatmul.mubr.msk.bf16.gmra.mrb[4].mxu0 %vm1027_vm5, %v4820_v11  ;;  %v696_v32 = vpop.permute.xlu0 %695  ;;  %v999_v30 = vsel %vm968_vm2, %v996_v14, %v998_v1  ;;  %v1001_v59 = vsel %vm968_vm2, %v998_v1, %v1000_v27  ;;  %v866_v63 = vsel %vm826_vm3, %v4663_v62, %v698_v29 }
  0xd4   : > { %3974 = vmatprep.mubr.msk.bf16.mxu1 %vm1027_vm5, %v999_v30  ;;  %4058 = vmatprep.mubr.msk.bf16.mxu0 %vm1027_vm5, %v4817_v10  ;;  %v864_v37 = vsel %vm826_vm3, %v4647_v43, %v696_v32 }
  0xd5   : > { %3975 = vmatmul.mubr.msk.bf16.gmra.mrb[28].mxu1 %vm1027_vm5, %v1001_v59 }
  0xd6   : > { %v811_v54 = vpop.permute.xlu1 %810 }
  0xd7   : > { %v809_v11 = vpop.permute.xlu0 %808  ;;  %v4937_v4 = vsel %vm881_vm4, %v866_v63, %v811_v54 }
  0xd8   : > { %v4940_v38 = vsel %vm881_vm4, %v864_v37, %v809_v11  ;;  %v1004_v40 = vrot.slane %v4937_v4, 4 }
  0xd9   : > { %v1002_v10 = vrot.slane %v4940_v38, 4 }
  0xda   : > { %v702_v3 = vpop.permute.xlu1 %701 }
  0xdb   : > { %4059 = vmatmul.mubr.msk.bf16.gmra.mrb[8].mxu0 %vm1027_vm5, %v4840_v44  ;;  %v700_v62 = vpop.permute.xlu0 %699  ;;  %v1003_v45 = vsel %vm968_vm2, %v1000_v27, %v1002_v10  ;;  %v1005_v43 = vsel %vm968_vm2, %v1002_v10, %v1004_v40  ;;  %v870_v47 = vsel %vm826_vm3, %v4683_v28, %v702_v3 }
  0xdc   : > { %3978 = vmatprep.mubr.msk.bf16.mxu1 %vm1027_vm5, %v1003_v45  ;;  %4062 = vmatprep.mubr.msk.bf16.mxu0 %vm1027_vm5, %v4837_v21  ;;  %v868_v31 = vsel %vm826_vm3, %v4670_v7, %v700_v62 }
  0xdd   : > { %3979 = vmatmul.mubr.msk.bf16.gmra.mrb[32].mxu1 %vm1027_vm5, %v1005_v43 }
  0xde   : > { %v815_v12 = vpop.permute.xlu1 %814 }
  0xdf   : > { %v813_v44 = vpop.permute.xlu0 %812  ;;  %v4957_v48 = vsel %vm881_vm4, %v870_v47, %v815_v12 }
  0xe0   : > { %v923_v6 = vsel %vm881_vm4, %v868_v31, %v813_v44  ;;  %v1008_v49 = vrot.slane %v4957_v48, 4 }
  0xe1   : > { %v1006_v46 = vrot.slane %v923_v6, 4 }
  0xe2   : > { %v706_v50 = vpop.permute.xlu1 %705 }
  0xe3   : > { %4063 = vmatmul.mubr.msk.bf16.gmra.mrb[12].mxu0 %vm1027_vm5, %v4860_v2  ;;  %v704_v21 = vpop.permute.xlu0 %703  ;;  %v1007_v28 = vsel %vm968_vm2, %v1004_v40, %v1006_v46  ;;  %v1009_v51 = vsel %vm968_vm2, %v1006_v46, %v1008_v49  ;;  %v874_v7 = vsel %vm826_vm3, %v4703_v55, %v706_v50 }
  0xe4   : > { %3982 = vmatprep.mubr.msk.bf16.mxu1 %vm1027_vm5, %v1007_v28  ;;  %4066 = vmatprep.mubr.msk.bf16.mxu0 %vm1027_vm5, %v4857_v41  ;;  %v872_v56 = vsel %vm826_vm3, %v4690_v36, %v704_v21 }
  0xe5   : > { %3983 = vmatmul.mubr.msk.bf16.gmra.mrb[36].mxu1 %vm1027_vm5, %v1009_v51 }
  0xe6   : > { %v819_v8 = vpop.permute.xlu1 %818 }
  0xe7   : > { %v817_v2 = vpop.permute.xlu0 %816  ;;  %v929_v17 = vsel %vm881_vm4, %v874_v7, %v819_v8 }
  0xe8   : > { %v927_v33 = vsel %vm881_vm4, %v872_v56, %v817_v2  ;;  %v1012_v22 = vrot.slane %v929_v17, 4 }
  0xe9   : > { %v1010_v25 = vrot.slane %v927_v33, 4 }
  0xea   : > { %v710_v57 = vpop.permute.xlu1 %709 }
  0xeb   : > { %4067 = vmatmul.mubr.msk.bf16.gmra.mrb[16].mxu0 %vm1027_vm5, %v4880_v61  ;;  %v708_v41 = vpop.permute.xlu0 %707  ;;  %v1011_v0 = vsel %vm968_vm2, %v1008_v49, %v1010_v25  ;;  %v1013_v55 = vsel %vm968_vm2, %v1010_v25, %v1012_v22  ;;  %v878_v36 = vsel %vm826_vm3, %v4723_v24, %v710_v57 }
  0xec   : > { %3986 = vmatprep.mubr.msk.bf16.mxu1 %vm1027_vm5, %v1011_v0  ;;  %4070 = vmatprep.mubr.msk.bf16.mxu0 %vm1027_vm5, %v4877_v53  ;;  %v876_v5 = vsel %vm826_vm3, %v4710_v60, %v708_v41  ;;  %v1909_v60 = vlaneseq }
  0xed   : > { %3987 = vmatmul.mubr.msk.bf16.gmra.mrb[40].mxu1 %vm1027_vm5, %v1013_v55 }
  0xee   : > { %v823_v9 = vpop.permute.xlu1 %822 }
  0xef   : > { %v821_v14 = vpop.permute.xlu0 %820  ;;  %v933_v39 = vsel %vm881_vm4, %v878_v36, %v823_v9 }
  0xf0   : > { %v931_v35 = vsel %vm881_vm4, %v876_v5, %v821_v14  ;;  %v1016_v58 = vrot.slane %v933_v39, 4 }
  0xf1   : > { %v1014_v16 = vrot.slane %v931_v35, 4 }
  0xf3   : > { %4071 = vmatmul.mubr.msk.bf16.gmra.mrb[20].mxu0 %vm1027_vm5, %v4900_v13  ;;  %v1015_v42 = vsel %vm968_vm2, %v1012_v22, %v1014_v16  ;;  %v1017_v23 = vsel %vm968_vm2, %v1014_v16, %v1016_v58  ;;  %v712_v24 = vpop.permute.xlu0 %711 }
  0xf4   : > { %3990 = vmatprep.mubr.msk.bf16.mxu1 %vm1027_vm5, %v1015_v42  ;;  %4074 = vmatprep.mubr.msk.bf16.mxu0 %vm1027_vm5, %v4897_v26 }
  0xf5   : > { %3991 = vmatmul.mubr.msk.bf16.gmra.mrb[44].mxu1 %vm1027_vm5, %v1017_v23 }
  0xf6   : > { %4022 = vmatprep.mubr.msk.bf16.mxu1 %vm1027_vm5, %v4880_v61  ;;  %v880_v61 = vsel %vm826_vm3, %v4577_v52, %v712_v24 }
  0xfb   : > { %4075 = vmatmul.mubr.msk.bf16.gmra.mrb[24].mxu0 %vm1027_vm5, %v4920_v20 }
  0xfc   : > { %4078 = vmatprep.mubr.msk.bf16.mxu0 %vm1027_vm5, %v4917_v15 }
  0xfd   : > { %4023 = vmatmul.mubr.msk.bf16.vlgmr.msra.gmra.mrb[24].mxu1 %vm1027_vm5, %v4877_v53  ;;  %v5028_v53 = vshrl.u32 %v1909_v60, 7 }
  0xfe   : > { %4026 = vmatprep.mubr.msk.bf16.mxu1 %vm1027_vm5, %v4900_v13 }
  0xff   : > { %v1912_v13 = vadd.s32 16, %v5028_v53  ;;  %v1913_v19 = vadd.s32 24, %v5028_v53  ;;  %v1911_v29 = vadd.s32 8, %v5028_v53  ;;  %v1916_v63 = vadd.s32 48, %v5028_v53 }
 0x100   : > { %v1914_v11 = vadd.s32 32, %v5028_v53  ;;  %v1915_v62 = vadd.s32 40, %v5028_v53  ;;  %v5077_v28 = vadd.s32 80, %v5028_v53  ;;  %v5081_v7 = vadd.s32 64, %v5028_v53 }
 0x101   : > { %v5048_v52 = vmul.u32.u64.low 2863311531, %v1913_v19  ;;  %v5049_v1 = vmul.u32.u64.high 2863311531, %v1913_v19, %v5048_v52  ;;  %v5052_v32 = vmul.u32.u64.low 2863311531, %v1911_v29  ;;  %v5053_v30 = vmul.u32.u64.high 2863311531, %v1911_v29, %v5052_v32 }
 0x102   : > { %v5061_v40 = vmul.u32.u64.low 2863311531, %v1916_v63  ;;  %v5062_v10 = vmul.u32.u64.high 2863311531, %v1916_v63, %v5061_v40  ;;  %v5066_v47 = vmul.u32.u64.low 2863311531, %v1914_v11  ;;  %v5067_v31 = vmul.u32.u64.high 2863311531, %v1914_v11, %v5066_v47 }
 0x103   : > { %4079 = vmatmul.mubr.msk.bf16.gmra.mrb[28].mxu0 %vm1027_vm5, %v4940_v38  ;;  %v1997_v54 = vshrl.u32 %v5049_v1, 4  ;;  %v1975_v43 = vshrl.u32 %v5053_v30, 4  ;;  %v5073_v49 = vmul.u32.u64.low 2863311531, %v1915_v62  ;;  %v5074_v46 = vmul.u32.u64.high 2863311531, %v1915_v62, %v5073_v49 }
 0x104   : > { %4082 = vmatprep.mubr.msk.bf16.mxu0 %vm1027_vm5, %v4937_v4  ;;  %v2030_v51 = vshrl.u32 %v5062_v10, 4  ;;  %v2008_v8 = vshrl.u32 %v5067_v31, 4  ;;  %v5092_v22 = vmul.u32.u64.low 2863311531, %v5077_v28  ;;  %v5093_v25 = vmul.u32.u64.high 2863311531, %v5077_v28, %v5092_v22 }
 0x105   : > { %4027 = vmatmul.mubr.msk.bf16.gmra.mrb[28].mxu1 %vm1027_vm5, %v4897_v26  ;;  %v825_v26 = vpop.permute.xlu1 %824  ;;  %v1998_v45 = vmul.u32 24, %v1997_v54  ;;  %v1976_v21 = vmul.u32 24, %v1975_v43  ;;  %v2019_v5 = vshrl.u32 %v5074_v46, 4  ;;  %v5155_v32 = vadd.s32 112, %v5028_v53 }
 0x106   : > { %4030 = vmatprep.mubr.msk.bf16.mxu1 %vm1027_vm5, %v4920_v20  ;;  %v935_v34 = vsel %vm881_vm4, %v880_v61, %v825_v26  ;;  %v5044_v20 = vmul.u32.u64.low 2863311531, %v5028_v53  ;;  %v5045_v27 = vmul.u32.u64.high 2863311531, %v5028_v53, %v5044_v20  ;;  %v2031_v55 = vmul.u32 24, %v2030_v51 }
 0x107   : > { %v1999_v50 = vsub.s32 %v1913_v19, %v1998_v45  ;;  %v5083_v56 = vsub.s32 %v1911_v29, %v1976_v21  ;;  %v5105_v9 = vmul.u32.u64.low 2863311531, %v5081_v7  ;;  %v5106_v14 = vmul.u32.u64.high 2863311531, %v5081_v7, %v5105_v9 }
 0x108   : > { %v1964_v37 = vshrl.u32 %v5045_v27, 4  ;;  %v5120_v24 = vsub.s32 %v1916_v63, %v2031_v55  ;;  %v2020_v26 = vmul.u32 24, %v2019_v5  ;;  %v5131_v19 = vadd.s32 72, %v5028_v53 }
 0x109   : > { %vm2489_vm10 = vcmp.ne.s32.totalorder %v1999_v50, 0  ;;  %vm2537_vm11 = vcmp.lt.s32.totalorder %v1999_v50, 0  ;;  %v2633_v0 = vadd.s32 24, %v1999_v50  ;;  %vm2487_vm15 = vcmp.ne.s32.totalorder %v5083_v56, 0 }
 0x10a   : > { %v1965_v3 = vmul.u32 24, %v1964_v37  ;;  %vm5099_vm14 = vmand %vm2537_vm11, %vm2489_vm10  ;;  %vm2535_vm0 = vcmp.lt.s32.totalorder %v5083_v56, 0  ;;  %v2631_v60 = vadd.s32 24, %v5083_v56  ;;  %v2074_v1 = vshrl.u32 %v5093_v25, 4 }
 0x10b   : > { %4083 = vmatmul.mubr.msk.bf16.gmra.mrb[32].mxu0 %vm1027_vm5, %v923_v6  ;;  %v2681_v23 = vsel %vm5099_vm14, %v2633_v0, %v1999_v50  ;;  %vm5122_vm1 = vmand %vm2535_vm0, %vm2487_vm15  ;;  %v5158_v30 = vadd.s32 96, %v5028_v53  ;;  %v2052_v63 = vshrl.u32 %v5106_v14, 4  ;;  %v6639_v31 = vmov 0.0  }
 0x10c   : > { %4086 = vmatprep.mubr.msk.bf16.mxu0 %vm1027_vm5, %v4957_v48  ;;  %vm5143_vm4 = vcmp.lt.s32.totalorder %v2681_v23, 16  ;;  %v2679_v29 = vsel %vm5122_vm1, %v2631_v60, %v5083_v56  ;;  %v5164_v37 = vmul.u32.u64.low 2863311531, %v5131_v19  ;;  %v5165_v54 = vmul.u32.u64.high 2863311531, %v5131_v19, %v5164_v37 }
 0x10d   : > { %4031 = vmatmul.mubr.msk.bf16.gmra.mrb[32].mxu1 %vm1027_vm5, %v4917_v15  ;;  %v5040_v18 = vmul.u32.u64.low 2863311531, %v1912_v13  ;;  %v5041_v15 = vmul.u32.u64.high 2863311531, %v1912_v13, %v5040_v18  ;;  %v5177_v40 = vmul.u32.u64.low 2863311531, %v5155_v32  ;;  %v5178_v10 = vmul.u32.u64.high 2863311531, %v5155_v32, %v5177_v40 }
 0x10e   : > { %4034 = vmatprep.mubr.msk.bf16.mxu1 %vm1027_vm5, %v4940_v38  ;;  %v2053_v43 = vmul.u32 24, %v2052_v63  ;;  %v5213_v49 = vadd.s32 104, %v5028_v53  ;;  %v5218_v46 = vsel %vm5143_vm4, 1.0, %v6639_v31  ;;  %vm5231_vm0 = vcmp.lt.s32.totalorder %v2679_v29, 16 }
 0x10f   : > { %v1986_v59 = vshrl.u32 %v5041_v15, 4  ;;  %v5248_v22 = vadd.s32 144, %v5028_v53  ;;  %v5263_v5 = vadd.s32 128, %v5028_v53  ;;  %v2118_v14 = vshrl.u32 %v5178_v10, 4 }
 0x110   : > { %v2054_v25 = vsub.s32 %v5081_v7, %v2053_v43  ;;  %v5259_v55 = vmul.u32.u64.low 2863311531, %v5213_v49  ;;  %v5260_v36 = vmul.u32.u64.high 2863311531, %v5213_v49, %v5259_v55  ;;  %v5283_v60 = vsel %vm5231_vm0, 1.0, %v6639_v31 }
 0x111   : > { %v1987_v38 = vmul.u32 24, %v1986_v59  ;;  %v5160_v59 = vsub.s32 %v1915_v62, %v2020_v26  ;;  %v5290_v61 = vmul.u32.u64.low 2863311531, %v5263_v5  ;;  %v5291_v26 = vmul.u32.u64.high 2863311531, %v5263_v5, %v5290_v61 }
 0x112   : > { %vm2494_vm4 = vcmp.ne.s32.totalorder %v2054_v25, 0  ;;  %v2119_v27 = vmul.u32 24, %v2118_v14  ;;  %v5378_v2 = vadd.s32 176, %v5028_v53 }
 0x113   : > { %4087 = vmatmul.mubr.msk.bf16.gmra.mrb[36].mxu0 %vm1027_vm5, %v927_v33  ;;  %v2635_v51 = vadd.s32 24, %v5160_v59 }
 0x114   : > { %4090 = vmatprep.mubr.msk.bf16.mxu0 %vm1027_vm5, %v929_v17 }
 0x115   : > { %4035 = vmatmul.mubr.msk.bf16.gmra.mrb[36].mxu1 %vm1027_vm5, %v4937_v4  ;;  %v1917_v4 = vadd.s32 56, %v5028_v53 }
 0x116   : > { %4038 = vmatprep.mubr.msk.bf16.mxu1 %vm1027_vm5, %v923_v6  ;;  %v1966_v6 = vsub.s32 %v5028_v53, %v1965_v3  ;;  %v5181_v3 = vmul.u32.u64.low 2863311531, %v5158_v30  ;;  %v5182_v62 = vmul.u32.u64.high 2863311531, %v5158_v30, %v5181_v3 }
 0x117   : > { %v5069_v12 = vmul.u32.u64.low 2863311531, %v1917_v4  ;;  %v5070_v44 = vmul.u32.u64.high 2863311531, %v1917_v4, %v5069_v12  ;;  %v5734_v3 = vadd.s32 272, %v5028_v53 }
 0x118   : > { %vm2486_vm8 = vcmp.ne.s32.totalorder %v1966_v6, 0  ;;  %vm2534_vm9 = vcmp.lt.s32.totalorder %v1966_v6, 0  ;;  %v2630_v41 = vadd.s32 24, %v1966_v6 }
 0x119   : > { %vm5095_vm13 = vmand %vm2534_vm9, %vm2486_vm8 }
 0x11a   : > { %v2678_v42 = vsel %vm5095_vm13, %v2630_v41, %v1966_v6  ;;  %vm2539_vm13 = vcmp.lt.s32.totalorder %v5160_v59, 0  ;;  %v2063_v41 = vshrl.u32 %v5165_v54, 4 }
 0x11b   : > { %4091 = vmatmul.mubr.msk.bf16.gmra.mrb[40].mxu0 %vm1027_vm5, %v931_v35  ;;  %v2009_v35 = vmul.u32 24, %v2008_v8  ;;  %vm5139_vm3 = vcmp.lt.s32.totalorder %v2678_v42, 16 }
 0x11c   : > { %4094 = vmatprep.mubr.msk.bf16.mxu0 %vm1027_vm5, %v933_v39  ;;  %v5109_v39 = vadd.s32 88, %v5028_v53  ;;  %v2064_v23 = vmul.u32 24, %v2063_v41  ;;  %v5395_v41 = vadd.s32 184, %v5028_v53 }
 0x11d   : > { %4039 = vmatmul.mubr.msk.bf16.gmra.mrb[40].mxu1 %vm1027_vm5, %v4957_v48  ;;  %v1988_v48 = vsub.s32 %v1912_v13, %v1987_v38  ;;  %v5137_v15 = vsub.s32 %v1914_v11, %v2009_v35  ;;  %v2636_v11 = vadd.s32 24, %v5120_v24  ;;  %v5174_v38 = vadd.s32 120, %v5028_v53 }
 0x11e   : > { %4042 = vmatprep.mubr.msk.bf16.mxu1 %vm1027_vm5, %v927_v33  ;;  %v2041_v33 = vshrl.u32 %v5070_v44, 4  ;;  %v5201_v44 = vsel %vm5139_vm3, 1.0, %v6639_v31  ;;  %v2096_v35 = vshrl.u32 %v5182_v62, 4  ;;  %v5315_v29 = vsub.s32 %v5131_v19, %v2064_v23 }
 0x11f   : > { %vm2488_vm6 = vcmp.ne.s32.totalorder %v1988_v48, 0  ;;  %vm2536_vm7 = vcmp.lt.s32.totalorder %v1988_v48, 0  ;;  %vm2538_vm8 = vcmp.lt.s32.totalorder %v5137_v15, 0  ;;  %v2634_v6 = vadd.s32 24, %v5137_v15 }
 0x120   : > { %vm5086_vm12 = vmand %vm2536_vm7, %vm2488_vm6  ;;  %v2042_v16 = vmul.u32 24, %v2041_v33  ;;  %vm2540_vm6 = vcmp.lt.s32.totalorder %v5120_v24, 0  ;;  %vm2490_vm7 = vcmp.ne.s32.totalorder %v5137_v15, 0  ;;  %v2107_v19 = vshrl.u32 %v5260_v36, 4 }
 0x121   : > { %vm5207_vm14 = vmand %vm2538_vm8, %vm2490_vm7  ;;  %v5349_v62 = vsub.s32 %v5155_v32, %v2119_v27  ;;  %vm2543_vm0 = vcmp.lt.s32.totalorder %v5315_v29, 0  ;;  %v2639_v8 = vadd.s32 24, %v5315_v29 }
 0x122   : > { %v5147_v52 = vsub.s32 %v1917_v4, %v2042_v16  ;;  %v2075_v4 = vmul.u32 24, %v2074_v1  ;;  %v2682_v0 = vsel %vm5207_vm14, %v2634_v6, %v5137_v15  ;;  %v2638_v15 = vadd.s32 24, %v2054_v25 }
 0x123   : > { %4095 = vmatmul.mubr.msk.bf16.gmra.mrb[44].mxu0 %vm1027_vm5, %v935_v34  ;;  %v5127_v13 = vmul.u32.u64.low 2863311531, %v5109_v39  ;;  %v5128_v34 = vmul.u32.u64.high 2863311531, %v5109_v39, %v5127_v13  ;;  %vm5293_vm7 = vcmp.lt.s32.totalorder %v2682_v0, 16  ;;  %v2108_v32 = vmul.u32 24, %v2107_v19 }
 0x124   : > { %vm2493_vm9 = vcmp.ne.s32.totalorder %v5147_v52, 0  ;;  %vm2541_vm10 = vcmp.lt.s32.totalorder %v5147_v52, 0  ;;  %v2637_v21 = vadd.s32 24, %v5147_v52  ;;  %v2076_v56 = vsub.s32 %v5077_v28, %v2075_v4 }
 0x125   : > { %4043 = vmatmul.mubr.msk.bf16.gmra.mrb[44].mxu1 %vm1027_vm5, %v929_v17  ;;  %v2632_v17 = vadd.s32 24, %v1988_v48  ;;  %vm2492_vm5 = vcmp.ne.s32.totalorder %v5120_v24, 0  ;;  %v2085_v47 = vshrl.u32 %v5128_v34, 4  ;;  %vm5224_vm15 = vmand %vm2541_vm10, %vm2493_vm9  ;;  %v5328_v37 = vsel %vm5293_vm7, 1.0, %v6639_v31 }
 0x126   : > { %vm5186_vm11 = vmand %vm2540_vm6, %vm2492_vm5  ;;  %v2685_v9 = vsel %vm5224_vm15, %v2637_v21, %v5147_v52  ;;  %vm2544_vm3 = vcmp.lt.s32.totalorder %v2076_v56, 0  ;;  %vm2542_vm5 = vcmp.lt.s32.totalorder %v2054_v25, 0  ;;  %v2640_v18 = vadd.s32 24, %v2076_v56 }
 0x127   : > { %v2680_v58 = vsel %vm5086_vm12, %v2632_v17, %v1988_v48  ;;  %vm2491_vm12 = vcmp.ne.s32.totalorder %v5160_v59, 0  ;;  %v5244_v17 = vmul.u32.u64.low 2863311531, %v5174_v38  ;;  %v5245_v33 = vmul.u32.u64.high 2863311531, %v5174_v38, %v5244_v17 }
 0x128   : > { %vm5133_vm2 = vcmp.lt.s32.totalorder %v2680_v58, 16  ;;  %vm5239_vm1 = vmand %vm2539_vm13, %vm2491_vm12  ;;  %v2684_v28 = vsel %vm5186_vm11, %v2636_v11, %v5120_v24  ;;  %v2086_v57 = vmul.u32 24, %v2085_v47  ;;  %vm5297_vm8 = vcmp.lt.s32.totalorder %v2685_v9, 16 }
 0x129   : > { %v5196_v12 = vsel %vm5133_vm2, 1.0, %v6639_v31  ;;  %v2683_v7 = vsel %vm5239_vm1, %v2635_v51, %v5160_v59  ;;  %vm2496_vm2 = vcmp.ne.s32.totalorder %v2076_v56, 0  ;;  %vm5285_vm6 = vcmp.lt.s32.totalorder %v2684_v28, 16  ;;  %vm5307_vm11 = vmand %vm2542_vm5, %vm2494_vm4 }
 0x12a   : > { %v5274_v58 = vmul.u32.u64.low 2863311531, %v5248_v22  ;;  %v5275_v16 = vmul.u32.u64.high 2863311531, %v5248_v22, %v5274_v58  ;;  %v5278_v42 = vsub.s32 %v5109_v39, %v2086_v57  ;;  %vm5303_vm9 = vmand %vm2544_vm3, %vm2496_vm2  ;;  %vm2731_vm10 = vcmp.lt.s32.totalorder %v2683_v7, 16 }
 0x12b   : > { %v2097_v52 = vmul.u32 24, %v2096_v35  ;;  %v2129_v1 = vshrl.u32 %v5245_v33, 4  ;;  %v5318_v59 = vadd.s32 152, %v5028_v53  ;;  %v5323_v63 = vsel %vm5285_vm6, 1.0, %v6639_v31 }
 0x12c   : > { %vm2497_vm12 = vcmp.ne.s32.totalorder %v5278_v42, 0  ;;  %vm2545_vm13 = vcmp.lt.s32.totalorder %v5278_v42, 0  ;;  %v5333_v54 = vsel %vm5297_vm8, 1.0, %v6639_v31  ;;  %v5337_v11 = vsel %vm2731_vm10, 1.0, %v6639_v31 }
 0x12d   : > { %v2688_v4 = vsel %vm5303_vm9, %v2640_v18, %v2076_v56  ;;  %v2686_v40 = vsel %vm5307_vm11, %v2638_v15, %v2054_v25  ;;  %v2641_v10 = vadd.s32 24, %v5278_v42  ;;  %vm5344_vm14 = vmand %vm2545_vm13, %vm2497_vm12  ;;  %v5352_v45 = vsub.s32 %v5158_v30, %v2097_v52 }
 0x12e   : > { %v2130_v43 = vmul.u32 24, %v2129_v1  ;;  %v2162_v47 = vshrl.u32 %v5275_v16, 4  ;;  %vm2495_vm15 = vcmp.ne.s32.totalorder %v5315_v29, 0  ;;  %vm5361_vm1 = vcmp.lt.s32.totalorder %v2688_v4, 16 }
 0x12f   : > { %v5358_v48 = vmul.u32.u64.low 2863311531, %v5318_v59  ;;  %v5359_v6 = vmul.u32.u64.high 2863311531, %v5318_v59, %v5358_v48  ;;  %v2140_v21 = vshrl.u32 %v5291_v26, 4  ;;  %v5367_v30 = vadd.s32 136, %v5028_v53  ;;  %vm5380_vm3 = vmand %vm2543_vm0, %vm2495_vm15 }
 0x130   : > { %vm5369_vm2 = vcmp.lt.s32.totalorder %v2686_v40, 16  ;;  %v2689_v56 = vsel %vm5344_vm14, %v2641_v10, %v5278_v42  ;;  %vm2500_vm4 = vcmp.ne.s32.totalorder %v5349_v62, 0  ;;  %v5386_v33 = vsub.s32 %v5174_v38, %v2130_v43 }
 0x131   : > { %v2163_v28 = vmul.u32 24, %v2162_v47  ;;  %v5389_v25 = vadd.s32 160, %v5028_v53  ;;  %vm2548_vm5 = vcmp.lt.s32.totalorder %v5349_v62, 0  ;;  %v2644_v57 = vadd.s32 24, %v5349_v62 }
 0x132   : > { %vm2498_vm6 = vcmp.ne.s32.totalorder %v5352_v45, 0  ;;  %v5398_v0 = vsub.s32 %v5213_v49, %v2108_v32  ;;  %v2141_v55 = vmul.u32 24, %v2140_v21  ;;  %v2687_v9 = vsel %vm5380_vm3, %v2639_v8, %v5315_v29  ;;  %vm5428_vm10 = vmand %vm2548_vm5, %vm2500_vm4 }
 0x133   : > { %v5401_v38 = vmul.u32.u64.low 2863311531, %v5367_v30  ;;  %v5402_v36 = vmul.u32.u64.high 2863311531, %v5367_v30, %v5401_v38  ;;  %vm2546_vm7 = vcmp.lt.s32.totalorder %v5352_v45, 0  ;;  %vm2501_vm8 = vcmp.ne.s32.totalorder %v5386_v33, 0 }
 0x134   : > { %v5409_v7 = vmul.u32.u64.low 2863311531, %v5378_v2  ;;  %v5410_v14 = vmul.u32.u64.high 2863311531, %v5378_v2, %v5409_v7  ;;  %v2164_v49 = vsub.s32 %v5248_v22, %v2163_v28  ;;  %vm2549_vm9 = vcmp.lt.s32.totalorder %v5386_v33, 0  ;;  %vm5456_vm14 = vmand %vm2546_vm7, %vm2498_vm6 }
 0x135   : > { %v5415_v35 = vmul.u32.u64.low 2863311531, %v5389_v25  ;;  %v5416_v58 = vmul.u32.u64.high 2863311531, %v5389_v25, %v5415_v35  ;;  %v2173_v16 = vshrl.u32 %v5359_v6, 4  ;;  %v2642_v22 = vadd.s32 24, %v5352_v45  ;;  %vm5467_vm15 = vmand %vm2549_vm9, %vm2501_vm8 }
 0x136   : > { %v5421_v42 = vmul.u32.u64.low 2863311531, %v5395_v41  ;;  %v5422_v23 = vmul.u32.u64.high 2863311531, %v5395_v41, %v5421_v42  ;;  %vm2499_vm11 = vcmp.ne.s32.totalorder %v5398_v0, 0  ;;  %vm2547_vm12 = vcmp.lt.s32.totalorder %v5398_v0, 0 }
 0x137   : > { %v5436_v61 = vsub.s32 %v5263_v5, %v2141_v55  ;;  %v5441_v26 = vsel %vm5361_vm1, 1.0, %v6639_v31  ;;  %v5446_v13 = vsel %vm5369_vm2, 1.0, %v6639_v31  ;;  %vm5448_vm13 = vcmp.lt.s32.totalorder %v2689_v56, 16  ;;  %vm5484_vm3 = vmand %vm2547_vm12, %vm2499_vm11 }
 0x138   : > { %v5461_v34 = vadd.s32 168, %v5028_v53  ;;  %v2645_v15 = vadd.s32 24, %v5386_v33  ;;  %v2643_v20 = vadd.s32 24, %v5398_v0  ;;  %vm2504_vm0 = vcmp.ne.s32.totalorder %v2164_v49, 0 }
 0x139   : > { %vm2552_vm1 = vcmp.lt.s32.totalorder %v2164_v49, 0  ;;  %vm5473_vm2 = vcmp.lt.s32.totalorder %v2687_v9, 16  ;;  %v2692_v52 = vsel %vm5428_vm10, %v2644_v57, %v5349_v62  ;;  %v2174_v29 = vmul.u32 24, %v2173_v16 }
 0x13a   : > { %v5489_v19 = vadd.s32 208, %v5028_v53  ;;  %v2690_v4 = vsel %vm5456_vm14, %v2642_v22, %v5352_v45  ;;  %v2648_v40 = vadd.s32 24, %v2164_v49  ;;  %vm2502_vm4 = vcmp.ne.s32.totalorder %v5436_v61, 0  ;;  %vm5496_vm5 = vmand %vm2552_vm1, %vm2504_vm0 }
 0x13b   : > { %v2151_v10 = vshrl.u32 %v5402_v36, 4  ;;  %vm2550_vm6 = vcmp.lt.s32.totalorder %v5436_v61, 0  ;;  %v2206_v62 = vshrl.u32 %v5410_v14, 4  ;;  %v2693_v45 = vsel %vm5467_vm15, %v2645_v15, %v5386_v33 }
 0x13c   : > { %v5503_v43 = vmul.u32.u64.low 2863311531, %v5461_v34  ;;  %v5504_v47 = vmul.u32.u64.high 2863311531, %v5461_v34, %v5503_v43  ;;  %v2691_v48 = vsel %vm5484_vm3, %v2643_v20, %v5398_v0  ;;  %v2646_v6 = vadd.s32 24, %v5436_v61  ;;  %vm5531_vm7 = vmand %vm2550_vm6, %vm2502_vm4 }
 0x13d   : > { %v2184_v50 = vshrl.u32 %v5416_v58, 4  ;;  %v5515_v32 = vsub.s32 %v5318_v59, %v2174_v29  ;;  %v2217_v21 = vshrl.u32 %v5422_v23, 4  ;;  %v5525_v8 = vsel %vm5448_vm13, 1.0, %v6639_v31 }
 0x13e   : > { %v5519_v51 = vmul.u32.u64.low 2863311531, %v5489_v19  ;;  %v5520_v56 = vmul.u32.u64.high 2863311531, %v5489_v19, %v5519_v51  ;;  %v2696_v17 = vsel %vm5496_vm5, %v2648_v40, %v2164_v49  ;;  %v2152_v59 = vmul.u32 24, %v2151_v10 }
 0x13f   : > { %v5536_v28 = vadd.s32 192, %v5028_v53  ;;  %v5541_v57 = vsel %vm5473_vm2, 1.0, %v6639_v31  ;;  %vm5543_vm8 = vcmp.lt.s32.totalorder %v2692_v52, 16  ;;  %v2207_v55 = vmul.u32 24, %v2206_v62 }
 0x140   : > { %v5548_v38 = vadd.s32 216, %v5028_v53  ;;  %vm5550_vm9 = vcmp.lt.s32.totalorder %v2690_v4, 16  ;;  %vm5554_vm10 = vcmp.lt.s32.totalorder %v2693_v45, 16  ;;  %vm5558_vm11 = vcmp.lt.s32.totalorder %v2691_v48, 16 }
 0x141   : > { %v2185_v14 = vmul.u32 24, %v2184_v50  ;;  %vm5562_vm12 = vcmp.lt.s32.totalorder %v2696_v17, 16  ;;  %v2694_v35 = vsel %vm5531_vm7, %v2646_v6, %v5436_v61  ;;  %vm2505_vm13 = vcmp.ne.s32.totalorder %v5515_v32, 0 }
 0x142   : > { %v2218_v58 = vmul.u32 24, %v2217_v21  ;;  %vm2553_vm14 = vcmp.lt.s32.totalorder %v5515_v32, 0  ;;  %v5574_v42 = vsub.s32 %v5367_v30, %v2152_v59  ;;  %v5583_v39 = vsub.s32 %v5378_v2, %v2207_v55 }
 0x143   : > { %v5577_v23 = vmul.u32.u64.low 2863311531, %v5536_v28  ;;  %v5578_v24 = vmul.u32.u64.high 2863311531, %v5536_v28, %v5577_v23  ;;  %v2195_v61 = vshrl.u32 %v5504_v47, 4  ;;  %v5595_v30 = vsel %vm5543_vm8, 1.0, %v6639_v31  ;;  %vm5622_vm15 = vmand %vm2553_vm14, %vm2505_vm13 }
 0x144   : > { %v5587_v5 = vmul.u32.u64.low 2863311531, %v5548_v38  ;;  %v5588_v18 = vmul.u32.u64.high 2863311531, %v5548_v38, %v5587_v5  ;;  %v5600_v20 = vsel %vm5550_vm9, 1.0, %v6639_v31  ;;  %v2649_v2 = vadd.s32 24, %v5515_v32 }
 0x145   : > { %v5604_v27 = vsub.s32 %v5389_v25, %v2185_v14  ;;  %v5611_v1 = vsel %vm5554_vm10, 1.0, %v6639_v31  ;;  %v5616_v29 = vsel %vm5558_vm11, 1.0, %v6639_v31  ;;  %v5627_v25 = vsub.s32 %v5395_v41, %v2218_v58 }
 0x146   : > { %6709 = vst [vmem:[#allocation2_spill] sm:$0xff] %v5611_v1  ;;  %6710 = vst [vmem:[#allocation3_spill] sm:$0xff] %v5616_v29  ;;  %v2250_v40 = vshrl.u32 %v5520_v56, 4  ;;  %v5633_v10 = vsel %vm5562_vm12, 1.0, %v6639_v31  ;;  %vm5635_vm0 = vcmp.lt.s32.totalorder %v2694_v35, 16  ;;  %vm2503_vm1 = vcmp.ne.s32.totalorder %v5574_v42, 0 }
 0x147   : > { %6713 = vst [vmem:[#allocation4_spill] sm:$0xff] %v5633_v10  ;;  %vm2551_vm2 = vcmp.lt.s32.totalorder %v5574_v42, 0  ;;  %vm2508_vm3 = vcmp.ne.s32.totalorder %v5583_v39, 0  ;;  %vm2556_vm4 = vcmp.lt.s32.totalorder %v5583_v39, 0  ;;  %v2196_v41 = vmul.u32 24, %v2195_v61 }
 0x148   : > { %v5644_v62 = vadd.s32 200, %v5028_v53  ;;  %v2697_v43 = vsel %vm5622_vm15, %v2649_v2, %v5515_v32  ;;  %v2647_v47 = vadd.s32 24, %v5574_v42  ;;  %vm2506_vm5 = vcmp.ne.s32.totalorder %v5604_v27, 0  ;;  %vm5652_vm7 = vmand %vm2551_vm2, %vm2503_vm1 }
 0x149   : > { %vm2554_vm6 = vcmp.lt.s32.totalorder %v5604_v27, 0  ;;  %vm2509_vm8 = vcmp.ne.s32.totalorder %v5627_v25, 0  ;;  %vm2557_vm9 = vcmp.lt.s32.totalorder %v5627_v25, 0  ;;  %v2251_v48 = vmul.u32 24, %v2250_v40  ;;  %vm5661_vm10 = vmand %vm2556_vm4, %vm2508_vm3 }
 0x14a   : > { %v5659_v6 = vadd.s32 240, %v5028_v53  ;;  %v2652_v32 = vadd.s32 24, %v5583_v39  ;;  %v2650_v21 = vadd.s32 24, %v5604_v27  ;;  %v2653_v51 = vadd.s32 24, %v5627_v25  ;;  %vm5669_vm11 = vmand %vm2554_vm6, %vm2506_vm5 }
 0x14b   : > { %v2228_v56 = vshrl.u32 %v5578_v24, 4  ;;  %v5674_v33 = vsub.s32 %v5461_v34, %v2196_v41  ;;  %v2261_v59 = vshrl.u32 %v5588_v18, 4  ;;  %v5684_v36 = vsel %vm5635_vm0, 1.0, %v6639_v31  ;;  %vm5697_vm13 = vmand %vm2557_vm9, %vm2509_vm8 }
 0x14c   : > { %v5678_v0 = vmul.u32.u64.low 2863311531, %v5644_v62  ;;  %v5679_v55 = vmul.u32.u64.high 2863311531, %v5644_v62, %v5678_v0  ;;  %6722 = vst [vmem:[#allocation5_spill] sm:$0xff] %v5684_v36  ;;  %vm5686_vm12 = vcmp.lt.s32.totalorder %v2697_v43, 16  ;;  %v2695_v34 = vsel %vm5652_vm7, %v2647_v47, %v5574_v42 }
 0x14d   : > { %v5702_v14 = vadd.s32 224, %v5028_v53  ;;  %v5707_v35 = vsub.s32 %v5489_v19, %v2251_v48  ;;  %v5710_v58 = vmul.u32.u64.low 2863311531, %v5659_v6  ;;  %v5711_v23 = vmul.u32.u64.high 2863311531, %v5659_v6, %v5710_v58 }
 0x14e   : > { %v5714_v42 = vadd.s32 248, %v5028_v53  ;;  %v2700_v61 = vsel %vm5661_vm10, %v2652_v32, %v5583_v39  ;;  %v2698_v5 = vsel %vm5669_vm11, %v2650_v21, %v5604_v27  ;;  %v2229_v18 = vmul.u32 24, %v2228_v56 }
 0x14f   : > { %v5725_v19 = vadd.s32 232, %v5028_v53  ;;  %v2701_v4 = vsel %vm5697_vm13, %v2653_v51, %v5627_v25  ;;  %vm2507_vm14 = vcmp.ne.s32.totalorder %v5674_v33, 0  ;;  %v2262_v40 = vmul.u32 24, %v2261_v59 }
 0x150   : > { %vm2555_vm15 = vcmp.lt.s32.totalorder %v5674_v33, 0  ;;  %v2651_v27 = vadd.s32 24, %v5674_v33  ;;  %v5741_v41 = vmul.u32.u64.low 2863311531, %v5702_v14  ;;  %v5742_v43 = vmul.u32.u64.high 2863311531, %v5702_v14, %v5741_v41 }
 0x151   : > { %vm2512_vm0 = vcmp.ne.s32.totalorder %v5707_v35, 0  ;;  %v5746_v25 = vmul.u32.u64.low 2863311531, %v5714_v42  ;;  %v5747_v47 = vmul.u32.u64.high 2863311531, %v5714_v42, %v5746_v25  ;;  %v5750_v45 = vadd.s32 256, %v5028_v53  ;;  %vm5762_vm2 = vmand %vm2555_vm15, %vm2507_vm14 }
 0x152   : > { %vm2560_vm1 = vcmp.lt.s32.totalorder %v5707_v35, 0  ;;  %v5754_v48 = vsub.s32 %v5536_v28, %v2229_v18  ;;  %v5757_v50 = vmul.u32.u64.low 2863311531, %v5725_v19  ;;  %v5758_v32 = vmul.u32.u64.high 2863311531, %v5725_v19, %v5757_v50 }
 0x153   : > { %v5767_v51 = vsub.s32 %v5548_v38, %v2262_v40  ;;  %v2239_v56 = vshrl.u32 %v5679_v55, 4  ;;  %v5771_v17 = vmul.u32.u64.low 2863311531, %v5734_v3  ;;  %v5772_v59 = vmul.u32.u64.high 2863311531, %v5734_v3, %v5771_v17  ;;  %vm5815_vm7 = vmand %vm2560_vm1, %vm2512_vm0 }
 0x154   : > { %v5777_v28 = vsel %vm5686_vm12, 1.0, %v6639_v31  ;;  %vm5779_vm3 = vcmp.lt.s32.totalorder %v2695_v34, 16  ;;  %vm5783_vm4 = vcmp.lt.s32.totalorder %v2700_v61, 16  ;;  %v5788_v38 = vadd.s32 280, %v5028_v53 }
 0x155   : > { %6729 = vst [vmem:[#allocation6_spill] sm:$0xff] %v5777_v28  ;;  %v2656_v58 = vadd.s32 24, %v5707_v35  ;;  %v2294_v18 = vshrl.u32 %v5711_v23, 4  ;;  %v5795_v9 = vmul.u32.u64.low 2863311531, %v5750_v45  ;;  %v5796_v40 = vmul.u32.u64.high 2863311531, %v5750_v45, %v5795_v9 }
 0x156   : > { %vm5800_vm5 = vcmp.lt.s32.totalorder %v2698_v5, 16  ;;  %vm5804_vm6 = vcmp.lt.s32.totalorder %v2701_v4, 16  ;;  %v2699_v25 = vsel %vm5762_vm2, %v2651_v27, %v5674_v33  ;;  %v5820_v5 = vadd.s32 264, %v5028_v53 }
 0x157   : > { %vm2510_vm8 = vcmp.ne.s32.totalorder %v5754_v48, 0  ;;  %vm2558_vm9 = vcmp.lt.s32.totalorder %v5754_v48, 0  ;;  %vm2513_vm10 = vcmp.ne.s32.totalorder %v5767_v51, 0  ;;  %v2240_v33 = vmul.u32 24, %v2239_v56 }
 0x158   : > { %vm2561_vm11 = vcmp.lt.s32.totalorder %v5767_v51, 0  ;;  %v2272_v27 = vshrl.u32 %v5742_v43, 4  ;;  %v5832_v21 = vmul.u32.u64.low 2863311531, %v5788_v38  ;;  %v5833_v17 = vmul.u32.u64.high 2863311531, %v5788_v38, %v5832_v21  ;;  %vm5840_vm12 = vmand %vm2558_vm9, %vm2510_vm8 }
 0x159   : > { %v2704_v9 = vsel %vm5815_vm7, %v2656_v58, %v5707_v35  ;;  %v2654_v31 = vadd.s32 24, %v5754_v48  ;;  %v2295_v28 = vmul.u32 24, %v2294_v18  ;;  %v2305_v10 = vshrl.u32 %v5747_v47, 4  ;;  %vm5857_vm14 = vmand %vm2561_vm11, %vm2513_vm10 }
 0x15a   : > { %v2657_v36 = vadd.s32 24, %v5767_v51  ;;  %v2283_v43 = vshrl.u32 %v5758_v32, 4  ;;  %v5847_v29 = vmul.u32.u64.low 2863311531, %v5820_v5  ;;  %v5848_v21 = vmul.u32.u64.high 2863311531, %v5820_v5, %v5847_v29 }
 0x15b   : > { %v6742_v1 = vmov 0.0   ;;  %vm2747_vm13 = vcmp.lt.s32.totalorder %v2699_v25, 16  ;;  %v5862_v58 = vsub.s32 %v5644_v62, %v2240_v33  ;;  %v2338_v32 = vshrl.u32 %v5772_v59, 4 }
 0x15c   : > { %v5853_v35 = vsel %vm5779_vm3, 1.0, %v6742_v1  ;;  %v5868_v29 = vsel %vm5783_vm4, 1.0, %v6742_v1  ;;  %v5873_v0 = vsel %vm5800_vm5, 1.0, %v6742_v1  ;;  %v5878_v18 = vsel %vm5804_vm6, 1.0, %v6742_v1 }
 0x15d   : > { %6743 = vst [vmem:[#allocation7_spill] sm:$0xff] %v5853_v35  ;;  %6746 = vst [vmem:[#allocation8_spill] sm:$0xff] %v5868_v29  ;;  %v2273_v25 = vmul.u32 24, %v2272_v27  ;;  %vm5882_vm15 = vcmp.lt.s32.totalorder %v2704_v9, 16  ;;  %v5887_v7 = vsub.s32 %v5659_v6, %v2295_v28  ;;  %v2306_v23 = vmul.u32 24, %v2305_v10 }
 0x15e   : > { %6747 = vst [vmem:[#allocation9_spill] sm:$0xff] %v5873_v0  ;;  %6748 = vst [vmem:[#allocation10_spill] sm:$0xff] %v5878_v18  ;;  %v2316_v61 = vshrl.u32 %v5796_v40, 4  ;;  %v5893_v29 = vsel %vm2747_vm13, 1.0, %v6742_v1  ;;  %v2702_v41 = vsel %vm5840_vm12, %v2654_v31, %v5754_v48  ;;  %v2705_v27 = vsel %vm5857_vm14, %v2657_v36, %v5767_v51 }
 0x15f   : > { %6751 = vst [vmem:[#allocation11_spill] sm:$0xff] %v5893_v29  ;;  %v2284_v9 = vmul.u32 24, %v2283_v43  ;;  %vm2511_vm0 = vcmp.ne.s32.totalorder %v5862_v58, 0  ;;  %vm2559_vm1 = vcmp.lt.s32.totalorder %v5862_v58, 0  ;;  %v2339_v10 = vmul.u32 24, %v2338_v32 }
 0x160   : > { %v5906_v6 = vadd.s32 304, %v5028_v53  ;;  %v5913_v31 = vsel %vm5882_vm15, 1.0, %v6742_v1  ;;  %v2655_v36 = vadd.s32 24, %v5862_v58  ;;  %v2274_v48 = vsub.s32 %v5702_v14, %v2273_v25  ;;  %vm5931_vm6 = vmand %vm2559_vm1, %vm2511_vm0 }
 0x161   : > { %6752 = vst [vmem:[#allocation12_spill] sm:$0xff] %v5913_v31  ;;  %v2349_v51 = vshrl.u32 %v5833_v17, 4  ;;  %vm2516_vm2 = vcmp.ne.s32.totalorder %v5887_v7, 0  ;;  %vm2564_vm3 = vcmp.lt.s32.totalorder %v5887_v7, 0  ;;  %v2307_v40 = vsub.s32 %v5714_v42, %v2306_v23 }
 0x162   : > { %v2317_v56 = vmul.u32 24, %v2316_v61  ;;  %vm5921_vm4 = vcmp.lt.s32.totalorder %v2702_v41, 16  ;;  %vm5925_vm5 = vcmp.lt.s32.totalorder %v2705_v27, 16  ;;  %v2285_v17 = vsub.s32 %v5725_v19, %v2284_v9  ;;  %vm5945_vm7 = vmand %vm2564_vm3, %vm2516_vm2 }
 0x163   : > { %v2327_v32 = vshrl.u32 %v5848_v21, 4  ;;  %v2660_v42 = vadd.s32 24, %v5887_v7  ;;  %v5939_v25 = vsub.s32 %v5734_v3, %v2339_v10  ;;  %vm2514_vm8 = vcmp.ne.s32.totalorder %v2274_v48, 0 }
 0x164   : > { %v5942_v59 = vmul.u32.u64.low 2863311531, %v5906_v6  ;;  %v5943_v23 = vmul.u32.u64.high 2863311531, %v5906_v6, %v5942_v59  ;;  %vm2562_vm9 = vcmp.lt.s32.totalorder %v2274_v48, 0  ;;  %v2350_v41 = vmul.u32 24, %v2349_v51 }
 0x165   : > { %v5950_v19 = vadd.s32 288, %v5028_v53  ;;  %v2703_v3 = vsel %vm5931_vm6, %v2655_v36, %v5862_v58  ;;  %vm2517_vm10 = vcmp.ne.s32.totalorder %v2307_v40, 0  ;;  %vm2565_vm11 = vcmp.lt.s32.totalorder %v2307_v40, 0  ;;  %vm5969_vm14 = vmand %vm2562_vm9, %vm2514_vm8 }
 0x166   : > { %v5958_v27 = vsub.s32 %v5750_v45, %v2317_v56  ;;  %v2658_v10 = vadd.s32 24, %v2274_v48  ;;  %vm2515_vm12 = vcmp.ne.s32.totalorder %v2285_v17, 0  ;;  %vm2563_vm13 = vcmp.lt.s32.totalorder %v2285_v17, 0  ;;  %vm5979_vm1 = vmand %vm2565_vm11, %vm2517_vm10 }
 0x167   : > { %v2328_v51 = vmul.u32 24, %v2327_v32  ;;  %v2708_v31 = vsel %vm5945_vm7, %v2660_v42, %v5887_v7  ;;  %v2661_v45 = vadd.s32 24, %v2307_v40  ;;  %vm2520_vm15 = vcmp.ne.s32.totalorder %v5939_v25, 0  ;;  %vm5991_vm2 = vmand %vm2563_vm13, %vm2515_vm12 }
 0x168   : > { %vm2568_vm0 = vcmp.lt.s32.totalorder %v5939_v25, 0  ;;  %v2659_v7 = vadd.s32 24, %v2285_v17  ;;  %v5984_v14 = vsub.s32 %v5788_v38, %v2350_v41  ;;  %v2664_v29 = vadd.s32 24, %v5939_v25 }
 0x169   : > { %v5987_v32 = vmul.u32.u64.low 2863311531, %v5950_v19  ;;  %v5988_v42 = vmul.u32.u64.high 2863311531, %v5950_v19, %v5987_v32  ;;  %vm2518_vm3 = vcmp.ne.s32.totalorder %v5958_v27, 0  ;;  %vm2566_vm6 = vcmp.lt.s32.totalorder %v5958_v27, 0  ;;  %vm6017_vm7 = vmand %vm2568_vm0, %vm2520_vm15 }
 0x16a   : > { %v5999_v0 = vadd.s32 312, %v5028_v53  ;;  %v6004_v38 = vsel %vm5921_vm4, 1.0, %v6742_v1  ;;  %v6009_v41 = vsel %vm5925_vm5, 1.0, %v6742_v1  ;;  %v2706_v32 = vsel %vm5969_vm14, %v2658_v10, %v2274_v48  ;;  %vm6036_vm8 = vmand %vm2566_vm6, %vm2518_vm3 }
 0x16b   : > { %6767 = vst [vmem:[#allocation13_spill] sm:$0xff] %v6004_v38  ;;  %6768 = vst [vmem:[#allocation14_spill] sm:$0xff] %v6009_v41  ;;  %v2329_v43 = vsub.s32 %v5820_v5, %v2328_v51  ;;  %vm6022_vm4 = vcmp.lt.s32.totalorder %v2703_v3, 16  ;;  %v2709_v47 = vsel %vm5979_vm1, %v2661_v45, %v2307_v40  ;;  %v2662_v58 = vadd.s32 24, %v5958_v27 }
 0x16c   : > { %v2382_v48 = vshrl.u32 %v5943_v23, 4  ;;  %vm6030_vm5 = vcmp.lt.s32.totalorder %v2708_v31, 16  ;;  %v2707_v41 = vsel %vm5991_vm2, %v2659_v7, %v2285_v17  ;;  %vm2521_vm9 = vcmp.ne.s32.totalorder %v5984_v14, 0 }
 0x16d   : > { %v5570_v16 = vpop.f32.mrb[0].mxu1  ;;  %vm2569_vm10 = vcmp.lt.s32.totalorder %v5984_v14, 0  ;;  %vm6044_vm11 = vcmp.lt.s32.totalorder %v2706_v32, 16  ;;  %v2712_v31 = vsel %vm6017_vm7, %v2664_v29, %v5939_v25  ;;  %vm6057_vm12 = vcmp.lt.s32.totalorder %v2709_v47, 16 }
 0x16e   : > { %v5580_v22 = vpop.f32.mrb[1].mxu1  ;;  %v6052_v17 = vmul.u32.u64.low 2863311531, %v5999_v0  ;;  %v6053_v23 = vmul.u32.u64.high 2863311531, %v5999_v0, %v6052_v17  ;;  %v2665_v56 = vadd.s32 24, %v5984_v14  ;;  %vm2519_vm13 = vcmp.ne.s32.totalorder %v2329_v43, 0  ;;  %vm6069_vm0 = vmand %vm2569_vm10, %vm2521_vm9 }
 0x16f   : > { %v5590_v15 = vpop.f32.mrb[2].mxu1  ;;  %vm2567_vm14 = vcmp.lt.s32.totalorder %v2329_v43, 0  ;;  %vm2755_vm15 = vcmp.lt.s32.totalorder %v2707_v41, 16  ;;  %v2710_v35 = vsel %vm6036_vm8, %v2662_v58, %v5958_v27  ;;  %v2383_v25 = vmul.u32 24, %v2382_v48 }
 0x170   : > { %v5606_v52 = vpop.f32.mrb[3].mxu1  ;;  %v6074_v61 = vadd.s32 296, %v5028_v53  ;;  %v6081_v41 = vsel %vm6022_vm4, 1.0, %v6742_v1  ;;  %vm2760_vm1 = vcmp.lt.s32.totalorder %v2712_v31, 16  ;;  %v2663_v47 = vadd.s32 24, %v2329_v43  ;;  %vm6101_vm2 = vmand %vm2567_vm14, %vm2519_vm13 }
 0x171   : > { %6786 = vst [vmem:[#allocation18_spill] sm:$0xff] %v6081_v41  ;;  %v2360_v27 = vshrl.u32 %v5988_v42, 4  ;;  %v6087_v58 = vsel %vm6030_vm5, 1.0, %v6742_v1  ;;  %v6092_v48 = vsel %vm6044_vm11, 1.0, %v6742_v1  ;;  %v6097_v38 = vsel %vm6057_vm12, 1.0, %v6742_v1 }
 0x172   : > { %6787 = vst [vmem:[#allocation19_spill] sm:$0xff] %v6087_v58  ;;  %6788 = vst [vmem:[#allocation20_spill] sm:$0xff] %v6092_v48  ;;  %v6106_v42 = vadd.s32 336, %v5028_v53  ;;  %v6109_v10 = vsel %vm2755_vm15, 1.0, %v6742_v1  ;;  %vm6111_vm3 = vcmp.lt.s32.totalorder %v2710_v35, 16  ;;  %v2713_v31 = vsel %vm6069_vm0, %v2665_v56, %v5984_v14 }
 0x173   : > { %6789 = vst [vmem:[#allocation21_spill] sm:$0xff] %v6097_v38  ;;  %6792 = vst [vmem:[#allocation22_spill] sm:$0xff] %v6109_v10  ;;  %v6119_v17 = vadd.s32 320, %v5028_v53  ;;  %v6122_v38 = vsel %vm2760_vm1, 1.0, %v6742_v1  ;;  %v6125_v58 = vsub.s32 %v5906_v6, %v2383_v25  ;;  %v2711_v14 = vsel %vm6101_vm2, %v2663_v47, %v2329_v43 }
 0x174   : > { %6795 = vst [vmem:[#allocation23_spill] sm:$0xff] %v6122_v38  ;;  %v6128_v10 = vmul.u32.u64.low 2863311531, %v6074_v61  ;;  %v6129_v35 = vmul.u32.u64.high 2863311531, %v6074_v61, %v6128_v10  ;;  %v2361_v56 = vmul.u32 24, %v2360_v27  ;;  %v6135_v29 = vadd.s32 344, %v5028_v53 }
 0x175   : > { %v6142_v6 = vsel %vm6111_vm3, 1.0, %v6742_v1  ;;  %vm6144_vm6 = vcmp.lt.s32.totalorder %v2713_v31, 16  ;;  %v2393_v27 = vshrl.u32 %v6053_v23, 4  ;;  %vm2759_vm7 = vcmp.lt.s32.totalorder %v2711_v14, 16 }
 0x176   : > { %6796 = vst [vmem:[#allocation24_spill] sm:$0xff] %v6142_v6  ;;  %vm2524_vm4 = vcmp.ne.s32.totalorder %v6125_v58, 0  ;;  %vm2572_vm5 = vcmp.lt.s32.totalorder %v6125_v58, 0  ;;  %v6182_v23 = vsel %vm2759_vm7, 1.0, %v6742_v1 }
 0x177   : > { %6800 = vst [vmem:[#allocation26_spill] sm:$0xff] %v6182_v23  ;;  %vm6193_vm8 = vmand %vm2572_vm5, %vm2524_vm4 }
 0x178   : > { %v5704_v49 = vpop.f32.mrb[4].mxu1 }
 0x179   : > { %v5716_v24 = vpop.f32.mrb[5].mxu1 }
 0x17a   : > { %v5727_v2 = vpop.f32.mrb[6].mxu1 }
 0x17b   : > { %v5736_v39 = vpop.f32.mrb[7].mxu1 }
 0x180   : > { %v5790_v55 = vpop.f32.mrb[8].mxu1 }
 0x181   : > { %v5798_v34 = vpop.f32.mrb[9].mxu1 }
 0x182   : > { %v5822_v50 = vpop.f32.mrb[10].mxu1 }
 0x183   : > { %v5827_v4 = vpop.f32.mrb[11].mxu1 }
 0x188   : > { %v5880_v62 = vpop.f32.mrb[12].mxu1 }
 0x189   : > { %v5890_v33 = vpop.f32.mrb[13].mxu1 }
 0x18a   : > { %v5901_v18 = vpop.f32.mrb[14].mxu1 }
 0x18b   : > { %v5908_v28 = vpop.f32.mrb[15].mxu1 }
 0x190   : > { %v5952_v21 = vpop.f32.mrb[16].mxu1 }
 0x191   : > { %v5960_v9 = vpop.f32.mrb[17].mxu1 }
 0x192   : > { %v5962_v59 = vpop.f32.mrb[18].mxu1 }
 0x193   : > { %v5975_v36 = vpop.f32.mrb[19].mxu1 }
 0x198   : > { %v6042_v40 = vpop.f32.mrb[20].mxu1 }
 0x199   : > { %v6055_v51 = vpop.f32.mrb[21].mxu1 }
 0x19a   : > { %6779 = vst [vmem:[#allocation15_spill] sm:$0xff] %v6055_v51  ;;  %v6062_v7 = vpop.f32.mrb[22].mxu1 }
 0x19b   : > { %6782 = vst [vmem:[#allocation16_spill] sm:$0xff] %v6062_v7  ;;  %v6076_v32 = vpop.f32.mrb[23].mxu1 }
 0x19c   : > { %6785 = vst [vmem:[#allocation17_spill] sm:$0xff] %v6076_v32 }
 0x19e   : > { %v4052_v45 = vpop.f32.mrb[0].mxu0 }
 0x19f   : > { %v4102_v48 = vadd.f32 %v4052_v45, %v5570_v16  ;;  %v1670_v41 = vpop.f32.mrb[1].mxu0  ;;  %v6149_v16 = vadd.s32 328, %v5028_v53 }
 0x1a0   : > { %v4103_v32 = vadd.f32 %v1670_v41, %v5580_v22  ;;  %v4053_v38 = vpop.f32.mrb[2].mxu0  ;;  %v6154_v22 = vmul.u32.u64.low 2863311531, %v6106_v42  ;;  %v6155_v41 = vmul.u32.u64.high 2863311531, %v6106_v42, %v6154_v22 }
 0x1a1   : > { %v4104_v43 = vadd.f32 %v4053_v38, %v5590_v15  ;;  %v1673_v47 = vpop.f32.mrb[3].mxu0  ;;  %v2872_v3 = vmul.f32 %v4102_v48, %v5196_v12  ;;  %v6164_v15 = vsub.s32 %v5950_v19, %v2361_v56  ;;  %v2668_v12 = vadd.s32 24, %v6125_v58 }
 0x1a2   : > { %v2870_v5 = vmul.f32 %v4103_v32, %v5201_v44  ;;  %v4105_v10 = vadd.f32 %v1673_v47, %v5606_v52  ;;  %v6175_v52 = vsel %vm6144_vm6, 1.0, %v6742_v1  ;;  %v2394_v22 = vmul.u32 24, %v2393_v27 }
 0x1a3   : > { %v2873_v31 = vmul.f32 %v4104_v43, %v5218_v46  ;;  %6799 = vst [vmem:[#allocation25_spill] sm:$0xff] %v6175_v52  ;;  %v6179_v46 = vadd.s32 368, %v5028_v53  ;;  %v6185_v32 = vmul.u32.u64.low 2863311531, %v6119_v17  ;;  %v6186_v48 = vmul.u32.u64.high 2863311531, %v6119_v17, %v6185_v32 }
 0x1a4   : > { %v2871_v44 = vmul.f32 %v4105_v10, %v5283_v60  ;;  %v3217_v60 = vmul.f32 %v2870_v5, %v2870_v5  ;;  %vm2522_vm9 = vcmp.ne.s32.totalorder %v6164_v15, 0  ;;  %vm2570_vm10 = vcmp.lt.s32.totalorder %v6164_v15, 0 }
 0x1a5   : > { %v3729_v19 = vpack.c.bf16 %v2873_v31, %v2872_v3  ;;  %v3220_v52 = vmul.f32 %v2873_v31, %v2873_v31  ;;  %vm6214_vm11 = vmand %vm2570_vm10, %vm2522_vm9 }
 0x1a6   : > { %v3724_v38 = vpack.c.bf16 %v2871_v44, %v2870_v5  ;;  %v3164_v45 = vadd.f32 %v2871_v44, %v2870_v5  ;;  %v3218_v14 = vmul.f32 %v2871_v44, %v2871_v44  ;;  %v4056_v56 = vpop.f32.mrb[4].mxu0  ;;  %v3219_v5 = vmul.f32 %v2872_v3, %v2872_v3 }
 0x1a7   : > { %3841 = vst [vmem:[%s6169_s14 + $0x8] sm:$0xff] %v3729_v19   ;;  %v4106_v43 = vadd.f32 %v4056_v56, %v5704_v49  ;;  %v1686_v47 = vpop.f32.mrb[5].mxu0  ;;  %v2716_v49 = vsel %vm6193_vm8, %v2668_v12, %v6125_v58  ;;  %v2666_v19 = vadd.s32 24, %v6164_v15  ;;  %v2371_v12 = vshrl.u32 %v6129_v35, 4 }
 0x1a8   : > { %3725 = vst [vmem:[%s6169_s14] sm:$0xff] %v3724_v38   ;;  %v3165_v10 = vadd.f32 %v3164_v45, %v2872_v3  ;;  %v3265_v44 = vadd.f32 %v3218_v14, %v3217_v60  ;;  %v4107_v32 = vadd.f32 %v1686_v47, %v5716_v24  ;;  %v4057_v23 = vpop.f32.mrb[6].mxu0  ;;  %vm6225_vm12 = vcmp.lt.s32.totalorder %v2716_v49, 16 }
 0x1a9   : > { %v4108_v6 = vadd.f32 %v4057_v23, %v5727_v2  ;;  %v1689_v7 = vpop.f32.mrb[7].mxu0  ;;  %v2876_v2 = vmul.f32 %v4106_v43, %v5323_v63  ;;  %v2714_v63 = vsel %vm6214_vm11, %v2666_v19, %v6164_v15  ;;  %v2372_v25 = vmul.u32 24, %v2371_v12 }
 0x1aa   : > { %v3266_v56 = vadd.f32 %v3265_v44, %v3219_v5  ;;  %v2874_v27 = vmul.f32 %v4107_v32, %v5328_v37  ;;  %v3166_v51 = vadd.f32 %v3165_v10, %v2873_v31  ;;  %v4109_v3 = vadd.f32 %v1689_v7, %v5736_v39 }
 0x1ab   : > { %v2877_v58 = vmul.f32 %v4108_v6, %v5333_v54  ;;  %v6222_v37 = vadd.s32 352, %v5028_v53  ;;  %v6233_v54 = vsub.s32 %v5999_v0, %v2394_v22  ;;  %v3223_v5 = vmul.f32 %v2876_v2, %v2876_v2 }
 0x1ac   : > { %v3167_v31 = vadd.f32 %v3166_v51, %v2874_v27  ;;  %v3221_v39 = vmul.f32 %v2874_v27, %v2874_v27  ;;  %v3267_v7 = vadd.f32 %v3266_v56, %v3220_v52  ;;  %v2875_v23 = vmul.f32 %v4109_v3, %v5337_v11 }
 0x1ad   : > { %v3739_v60 = vpack.c.bf16 %v2877_v58, %v2876_v2  ;;  %v6238_v43 = vmul.u32.u64.low 2863311531, %v6135_v29  ;;  %v6239_v47 = vmul.u32.u64.high 2863311531, %v6135_v29, %v6238_v43  ;;  %v3224_v44 = vmul.f32 %v2877_v58, %v2877_v58 }
 0x1ae   : > { %v3268_v35 = vadd.f32 %v3267_v7, %v3221_v39  ;;  %v3734_v6 = vpack.c.bf16 %v2875_v23, %v2874_v27  ;;  %v3168_v51 = vadd.f32 %v3167_v31, %v2875_v23  ;;  %v3222_v45 = vmul.f32 %v2875_v23, %v2875_v23  ;;  %v4060_v52 = vpop.f32.mrb[8].mxu0 }
 0x1af   : > { %3843 = vst [vmem:[%s6169_s14 + $0x18] sm:$0xff] %v3739_v60   ;;  %v4110_v11 = vadd.f32 %v4060_v52, %v5790_v55  ;;  %v1702_v14 = vpop.f32.mrb[9].mxu0  ;;  %vm6245_vm13 = vcmp.lt.s32.totalorder %v2714_v63, 16  ;;  %v2426_v19 = vshrl.u32 %v6155_v41, 4  ;;  %vm2525_vm14 = vcmp.ne.s32.totalorder %v6233_v54, 0 }
 0x1b0   : > { %3842 = vst [vmem:[%s6169_s14 + $0x10] sm:$0xff] %v3734_v6   ;;  %v3169_v15 = vadd.f32 %v3168_v51, %v2876_v2  ;;  %v3269_v0 = vadd.f32 %v3268_v35, %v3222_v45  ;;  %v4111_v22 = vadd.f32 %v1702_v14, %v5798_v34  ;;  %v4061_v10 = vpop.f32.mrb[10].mxu0  ;;  %vm2573_vm15 = vcmp.lt.s32.totalorder %v6233_v54, 0 }
 0x1b1   : > { %v4112_v32 = vadd.f32 %v4061_v10, %v5822_v50  ;;  %v1705_v49 = vpop.f32.mrb[11].mxu0  ;;  %v2880_v2 = vmul.f32 %v4110_v11, %v5441_v26  ;;  %v6263_v26 = vadd.s32 24, %v6233_v54  ;;  %vm6272_vm0 = vmand %vm2573_vm15, %vm2525_vm14  ;;  %v6281_v35 = vsel %vm6245_vm13, 1.0, %v6742_v1 }
 0x1b2   : > { %v3270_v56 = vadd.f32 %v3269_v0, %v3223_v5  ;;  %v2878_v27 = vmul.f32 %v4111_v22, %v5446_v13  ;;  %v3170_v3 = vadd.f32 %v3169_v15, %v2877_v58  ;;  %v4113_v24 = vadd.f32 %v1705_v49, %v5827_v4 }
 0x1b3   : > { %v2881_v34 = vmul.f32 %v4112_v32, %v5525_v8  ;;  %v6260_v13 = vsel %vm6225_vm12, 1.0, %v6742_v1  ;;  %v6266_v8 = vadd.s32 376, %v5028_v53  ;;  %v6284_v6 = vsub.s32 %v6074_v61, %v2372_v25  ;;  %v6811_v32 = vld [vmem:[#allocation2_spill] sm:$0xff] }
 0x1b4   : > { %v3171_v50 = vadd.f32 %v3170_v3, %v2878_v27  ;;  %v3225_v12 = vmul.f32 %v2878_v27, %v2878_v27  ;;  %v3271_v31 = vadd.f32 %v3270_v56, %v3224_v44  ;;  %v2879_v41 = vmul.f32 %v4113_v24, %v5541_v57 }
 0x1b5   : > { %v3749_v39 = vpack.c.bf16 %v2881_v34, %v2880_v2  ;;  %v2427_v51 = vmul.u32 24, %v2426_v19  ;;  %v3227_v45 = vmul.f32 %v2880_v2, %v2880_v2  ;;  %v3228_v5 = vmul.f32 %v2881_v34, %v2881_v34 }
 0x1b6   : > { %v3272_v4 = vadd.f32 %v3271_v31, %v3225_v12  ;;  %v3744_v58 = vpack.c.bf16 %v2879_v41, %v2878_v27  ;;  %v3172_v7 = vadd.f32 %v3171_v50, %v2879_v41  ;;  %v3226_v23 = vmul.f32 %v2879_v41, %v2879_v41  ;;  %v4064_v60 = vpop.f32.mrb[12].mxu0 }
 0x1b7   : > { %3845 = vst [vmem:[%s6169_s14 + $0x28] sm:$0xff] %v3749_v39   ;;  %v4114_v38 = vadd.f32 %v4064_v60, %v5880_v62  ;;  %v1718_v63 = vpop.f32.mrb[13].mxu0  ;;  %v2717_v0 = vsel %vm6272_vm0, %v6263_v26, %v6233_v54  ;;  %v2404_v61 = vshrl.u32 %v6186_v48, 4  ;;  %v6812_v48 = vld [vmem:[#allocation3_spill] sm:$0xff]  ;;  %vm2523_vm1 = vcmp.ne.s32.totalorder %v6284_v6, 0 }
 0x1b8   : > { %3844 = vst [vmem:[%s6169_s14 + $0x20] sm:$0xff] %v3744_v58   ;;  %v3173_v52 = vadd.f32 %v3172_v7, %v2880_v2  ;;  %v3273_v11 = vadd.f32 %v3272_v4, %v3226_v23  ;;  %v4115_v14 = vadd.f32 %v1718_v63, %v5890_v33  ;;  %v4065_v43 = vpop.f32.mrb[14].mxu0  ;;  %vm2571_vm2 = vcmp.lt.s32.totalorder %v6284_v6, 0 }
 0x1b9   : > { %v4116_v62 = vadd.f32 %v4065_v43, %v5901_v18  ;;  %v1721_v15 = vpop.f32.mrb[15].mxu0  ;;  %v2884_v33 = vmul.f32 %v4114_v38, %v5595_v30  ;;  %v6299_v18 = vmul.u32.u64.low 2863311531, %v6149_v16  ;;  %v6300_v55 = vmul.u32.u64.high 2863311531, %v6149_v16, %v6299_v18  ;;  %vm6321_vm3 = vmand %vm2571_vm2, %vm2523_vm1  ;;  %v6815_v38 = vld [vmem:[#allocation5_spill] sm:$0xff] }
 0x1ba   : > { %v3274_v25 = vadd.f32 %v3273_v11, %v3227_v45  ;;  %v2882_v22 = vmul.f32 %v4115_v14, %v5600_v20  ;;  %v3174_v10 = vadd.f32 %v3173_v52, %v2881_v34  ;;  %v4117_v44 = vadd.f32 %v1721_v15, %v5908_v28  ;;  %v6818_v52 = vld [vmem:[#allocation4_spill] sm:$0xff]  ;;  %v6819_v14 = vld [vmem:[#allocation6_spill] sm:$0xff] }
 0x1bb   : > { %v2885_v49 = vmul.f32 %v4116_v62, %v6811_v32  ;;  %v6307_v30 = vsub.s32 %v6106_v42, %v2427_v51  ;;  %v2667_v31 = vadd.s32 24, %v6284_v6  ;;  %v2405_v41 = vmul.u32 24, %v2404_v61 }
 0x1bc   : > { %v3175_v19 = vadd.f32 %v3174_v10, %v2882_v22  ;;  %v3229_v54 = vmul.f32 %v2882_v22, %v2882_v22  ;;  %v3275_v56 = vadd.f32 %v3274_v25, %v3228_v5  ;;  %v2883_v27 = vmul.f32 %v4117_v44, %v6812_v48  ;;  %v6820_v25 = vld [vmem:[#allocation7_spill] sm:$0xff] }
 0x1bd   : > { %v3759_v3 = vpack.c.bf16 %v2885_v49, %v2884_v33  ;;  %v6313_v39 = vadd.s32 360, %v5028_v53  ;;  %v3231_v26 = vmul.f32 %v2884_v33, %v2884_v33  ;;  %v3232_v23 = vmul.f32 %v2885_v49, %v2885_v49 }
 0x1be   : > { %v3276_v20 = vadd.f32 %v3275_v56, %v3229_v54  ;;  %v3754_v28 = vpack.c.bf16 %v2883_v27, %v2882_v22  ;;  %v3176_v24 = vadd.f32 %v3175_v19, %v2883_v27  ;;  %v3230_v2 = vmul.f32 %v2883_v27, %v2883_v27  ;;  %v4068_v34 = vpop.f32.mrb[16].mxu0 }
 0x1bf   : > { %3847 = vst [vmem:[%s6169_s14 + $0x38] sm:$0xff] %v3759_v3   ;;  %v4118_v50 = vadd.f32 %v4068_v34, %v5952_v21  ;;  %v1734_v12 = vpop.f32.mrb[17].mxu0  ;;  %vm2528_vm6 = vcmp.ne.s32.totalorder %v6307_v30, 0  ;;  %vm2576_vm7 = vcmp.lt.s32.totalorder %v6307_v30, 0  ;;  %vm6330_vm4 = vcmp.lt.s32.totalorder %v2717_v0, 16  ;;  %v6830_v21 = vld [vmem:[#allocation10_spill] sm:$0xff] }
 0x1c0   : > { %3846 = vst [vmem:[%s6169_s14 + $0x30] sm:$0xff] %v3754_v28   ;;  %v3177_v4 = vadd.f32 %v3176_v24, %v2884_v33  ;;  %v3277_v42 = vadd.f32 %v3276_v20, %v3230_v2  ;;  %v4119_v58 = vadd.f32 %v1734_v12, %v5960_v9  ;;  %v4069_v7 = vpop.f32.mrb[18].mxu0  ;;  %v2672_v5 = vadd.s32 24, %v6307_v30  ;;  %vm6345_vm5 = vmand %vm2576_vm7, %vm2528_vm6  ;;  %v6825_v24 = vld [vmem:[#allocation15_spill] sm:$0xff] }
 0x1c1   : > { %v4120_v60 = vadd.f32 %v4069_v7, %v5962_v59  ;;  %v1737_v53 = vpop.f32.mrb[19].mxu0  ;;  %v2888_v11 = vmul.f32 %v4118_v50, %v6818_v52  ;;  %v2715_v59 = vsel %vm6321_vm3, %v2667_v31, %v6284_v6  ;;  %v6350_v10 = vsub.s32 %v6119_v17, %v2405_v41 }
 0x1c2   : > { %v3278_v57 = vadd.f32 %v3277_v42, %v3231_v26  ;;  %v2886_v9 = vmul.f32 %v4119_v58, %v6815_v38  ;;  %v3178_v63 = vadd.f32 %v3177_v4, %v2885_v49  ;;  %v4121_v51 = vadd.f32 %v1737_v53, %v5975_v36  ;;  %v6827_v26 = vld [vmem:[#allocation9_spill] sm:$0xff]  ;;  %v6829_v58 = vld [vmem:[#allocation8_spill] sm:$0xff] }
 0x1c3   : > { %v2889_v43 = vmul.f32 %v4120_v60, %v6819_v14  ;;  %v6353_v6 = vmul.u32.u64.low 2863311531, %v6179_v46  ;;  %v6354_v44 = vmul.u32.u64.high 2863311531, %v6179_v46, %v6353_v6  ;;  %vm6358_vm8 = vcmp.lt.s32.totalorder %v2715_v59, 16 }
 0x1c4   : > { %v3179_v62 = vadd.f32 %v3178_v63, %v2886_v9  ;;  %v3233_v15 = vmul.f32 %v2886_v9, %v2886_v9  ;;  %v3279_v61 = vadd.f32 %v3278_v57, %v3232_v23  ;;  %v2887_v36 = vmul.f32 %v4121_v51, %v6820_v25  ;;  %v6831_v63 = vld [vmem:[#allocation11_spill] sm:$0xff] }
 0x1c5   : > { %v3769_v22 = vpack.c.bf16 %v2889_v43, %v2888_v11  ;;  %v2720_v17 = vsel %vm6345_vm5, %v2672_v5, %v6307_v30  ;;  %v2437_v27 = vshrl.u32 %v6239_v47, 4  ;;  %v3235_v3 = vmul.f32 %v2888_v11, %v2888_v11  ;;  %v6828_v47 = vld [vmem:[#allocation17_spill] sm:$0xff] }
 0x1c6   : > { %v3280_v33 = vadd.f32 %v3279_v61, %v3233_v15  ;;  %v3764_v32 = vpack.c.bf16 %v2887_v36, %v2886_v9  ;;  %v3180_v49 = vadd.f32 %v3179_v62, %v2887_v36  ;;  %v3234_v18 = vmul.f32 %v2887_v36, %v2887_v36  ;;  %v4072_v19 = vpop.f32.mrb[20].mxu0 }
 0x1c7   : > { %3849 = vst [vmem:[%s6169_s14 + $0x48] sm:$0xff] %v3769_v22   ;;  %v4122_v54 = vadd.f32 %v4072_v19, %v6042_v40  ;;  %v1750_v56 = vpop.f32.mrb[21].mxu0  ;;  %v3236_v50 = vmul.f32 %v2889_v43, %v2889_v43  ;;  %v6826_v40 = vld [vmem:[#allocation16_spill] sm:$0xff]  ;;  %vm2526_vm9 = vcmp.ne.s32.totalorder %v6350_v10, 0  ;;  %vm2574_vm10 = vcmp.lt.s32.totalorder %v6350_v10, 0 }
 0x1c8   : > { %3848 = vst [vmem:[%s6169_s14 + $0x40] sm:$0xff] %v3764_v32   ;;  %v3181_v20 = vadd.f32 %v3180_v49, %v2888_v11  ;;  %v3281_v28 = vadd.f32 %v3280_v33, %v3234_v18  ;;  %v4123_v2 = vadd.f32 %v1750_v56, %v6825_v24  ;;  %v4073_v34 = vpop.f32.mrb[22].mxu0  ;;  %v2670_v60 = vadd.s32 24, %v6350_v10  ;;  %vm6390_vm12 = vmand %vm2574_vm10, %vm2526_vm9 }
 0x1c9   : > { %v4124_v12 = vadd.f32 %v4073_v34, %v6826_v40  ;;  %v1753_v31 = vpop.f32.mrb[23].mxu0  ;;  %v2892_v7 = vmul.f32 %v4122_v54, %v6829_v58  ;;  %v2438_v53 = vmul.u32 24, %v2437_v27  ;;  %v6380_v11 = vsel %vm6330_vm4, 1.0, %v6742_v1 }
 0x1ca   : > { %v3282_v41 = vadd.f32 %v3281_v28, %v3235_v3  ;;  %v2890_v30 = vmul.f32 %v4123_v2, %v6827_v26  ;;  %v3182_v4 = vadd.f32 %v3181_v20, %v2889_v43  ;;  %v4125_v42 = vadd.f32 %v1753_v31, %v6828_v47  ;;  %v6838_v31 = vld [vmem:[#allocation13_spill] sm:$0xff]  ;;  %v6840_v47 = vld [vmem:[#allocation14_spill] sm:$0xff] }
 0x1cb   : > { %v2893_v23 = vmul.f32 %v4124_v12, %v6830_v21  ;;  %vm6382_vm11 = vcmp.lt.s32.totalorder %v2720_v17, 16  ;;  %v2415_v59 = vshrl.u32 %v6300_v55, 4  ;;  %v6399_v36 = vsel %vm6358_vm8, 1.0, %v6742_v1 }
 0x1cc   : > { %v3183_v57 = vadd.f32 %v3182_v4, %v2890_v30  ;;  %v3237_v38 = vmul.f32 %v2890_v30, %v2890_v30  ;;  %v3283_v9 = vadd.f32 %v3282_v41, %v3236_v50  ;;  %v2891_v51 = vmul.f32 %v4125_v42, %v6831_v63 }
 0x1cd   : > { %v3779_v52 = vpack.c.bf16 %v2893_v23, %v2892_v7  ;;  %v6402_v0 = vsub.s32 %v6135_v29, %v2438_v53  ;;  %v6405_v22 = vmul.u32.u64.low 2863311531, %v6222_v37  ;;  %v6406_v6 = vmul.u32.u64.high 2863311531, %v6222_v37, %v6405_v22 }
 0x1ce   : > { %v3284_v5 = vadd.f32 %v3283_v9, %v3237_v38  ;;  %v3774_v62 = vpack.c.bf16 %v2891_v51, %v2890_v30  ;;  %v3184_v45 = vadd.f32 %v3183_v57, %v2891_v51  ;;  %v3238_v15 = vmul.f32 %v2891_v51, %v2891_v51  ;;  %v4076_v61 = vpop.f32.mrb[24].mxu0 }
 0x1cf   : > { %3851 = vst [vmem:[%s6169_s14 + $0x58] sm:$0xff] %v3779_v52   ;;  %v1766_v25 = vpop.f32.mrb[25].mxu0  ;;  %v3239_v55 = vmul.f32 %v2892_v7, %v2892_v7  ;;  %v2718_v19 = vsel %vm6390_vm12, %v2670_v60, %v6350_v10  ;;  %v6415_v29 = vsel %vm6382_vm11, 1.0, %v6742_v1  ;;  %v2416_v17 = vmul.u32 24, %v2415_v59  ;;  %v6848_v10 = vld [vmem:[#allocation21_spill] sm:$0xff] }
 0x1d0   : > { %3850 = vst [vmem:[%s6169_s14 + $0x50] sm:$0xff] %v3774_v62   ;;  %v3185_v33 = vadd.f32 %v3184_v45, %v2892_v7  ;;  %v3285_v32 = vadd.f32 %v3284_v5, %v3238_v15  ;;  %v4024_v49 = vpop.f32.mrb[24].mxu1  ;;  %v4077_v18 = vpop.f32.mrb[26].mxu0  ;;  %v2470_v27 = vshrl.u32 %v6354_v44, 4  ;;  %v3240_v3 = vmul.f32 %v2893_v23, %v2893_v23  ;;  %v6839_v44 = vld [vmem:[#allocation12_spill] sm:$0xff] }
 0x1d1   : > { %v4126_v54 = vadd.f32 %v4076_v61, %v4024_v49  ;;  %v1519_v56 = vpop.f32.mrb[25].mxu1  ;;  %v1769_v48 = vpop.f32.mrb[27].mxu0  ;;  %vm6418_vm13 = vcmp.lt.s32.totalorder %v2718_v19, 16  ;;  %v6423_v40 = vmul.u32.u64.low 2863311531, %v6266_v8  ;;  %v6424_v12 = vmul.u32.u64.high 2863311531, %v6266_v8, %v6423_v40 }
 0x1d2   : > { %v3286_v20 = vadd.f32 %v3285_v32, %v3239_v55  ;;  %v4127_v28 = vadd.f32 %v1766_v25, %v1519_v56  ;;  %v3186_v24 = vadd.f32 %v3185_v33, %v2893_v23  ;;  %v4025_v2 = vpop.f32.mrb[26].mxu1  ;;  %vm2529_vm14 = vcmp.ne.s32.totalorder %v6402_v0, 0  ;;  %v6841_v23 = vld [vmem:[#allocation18_spill] sm:$0xff]  ;;  %v6854_v56 = vld [vmem:[#allocation25_spill] sm:$0xff] }
 0x1d3   : > { %v4128_v34 = vadd.f32 %v4077_v18, %v4025_v2  ;;  %v1522_v50 = vpop.f32.mrb[27].mxu1  ;;  %v2896_v4 = vmul.f32 %v4126_v54, %v6839_v44  ;;  %vm2577_vm15 = vcmp.lt.s32.totalorder %v6402_v0, 0  ;;  %v6432_v58 = vsub.s32 %v6149_v16, %v2416_v17  ;;  %v6849_v44 = vld [vmem:[#allocation22_spill] sm:$0xff] }
 0x1d4   : > { %v2894_v41 = vmul.f32 %v4127_v28, %v6838_v31  ;;  %v3287_v26 = vadd.f32 %v3286_v20, %v3240_v3  ;;  %v4129_v30 = vadd.f32 %v1769_v48, %v1522_v50  ;;  %v6436_v57 = vadd.s32 24, %v6402_v0  ;;  %vm6455_vm2 = vmand %vm2577_vm15, %vm2529_vm14  ;;  %v6844_v3 = vld [vmem:[#allocation20_spill] sm:$0xff] }
 0x1d5   : > { %v2897_v42 = vmul.f32 %v4128_v34, %v6840_v47  ;;  %v6441_v63 = vsel %vm6418_vm13, 1.0, %v6742_v1  ;;  %v6444_v16 = vmul.u32.u64.low 2863311531, %v6313_v39  ;;  %v6445_v51 = vmul.u32.u64.high 2863311531, %v6313_v39, %v6444_v16  ;;  %v6847_v34 = vld [vmem:[#allocation19_spill] sm:$0xff] }
 0x1d6   : > { %v3187_v7 = vadd.f32 %v3186_v24, %v2894_v41  ;;  %v3241_v21 = vmul.f32 %v2894_v41, %v2894_v41  ;;  %v2895_v60 = vmul.f32 %v4129_v30, %v6841_v23  ;;  %v4080_v53 = vpop.f32.mrb[28].mxu0  ;;  %vm2527_vm0 = vcmp.ne.s32.totalorder %v6432_v58, 0 }
 0x1d7   : > { %v3789_v38 = vpack.c.bf16 %v2897_v42, %v2896_v4  ;;  %v1782_v9 = vpop.f32.mrb[29].mxu0  ;;  %vm2575_vm1 = vcmp.lt.s32.totalorder %v6432_v58, 0  ;;  %v2471_v25 = vmul.u32 24, %v2470_v27  ;;  %v3243_v22 = vmul.f32 %v2896_v4, %v2896_v4 }
 0x1d8   : > { %v3288_v52 = vadd.f32 %v3287_v26, %v3241_v21  ;;  %v3784_v14 = vpack.c.bf16 %v2895_v60, %v2894_v41  ;;  %v3188_v43 = vadd.f32 %v3187_v7, %v2895_v60  ;;  %v3242_v59 = vmul.f32 %v2895_v60, %v2895_v60  ;;  %v4028_v5 = vpop.f32.mrb[28].mxu1  ;;  %v4081_v62 = vpop.f32.mrb[30].mxu0  ;;  %vm6466_vm3 = vmand %vm2575_vm1, %vm2527_vm0 }
 0x1d9   : > { %3853 = vst [vmem:[%s6169_s14 + $0x68] sm:$0xff] %v3789_v38   ;;  %v4130_v45 = vadd.f32 %v4080_v53, %v4028_v5  ;;  %v1535_v15 = vpop.f32.mrb[29].mxu1  ;;  %v1785_v61 = vpop.f32.mrb[31].mxu0  ;;  %v3244_v18 = vmul.f32 %v2897_v42, %v2897_v42  ;;  %v2671_v48 = vadd.s32 24, %v6432_v58  ;;  %v2448_v17 = vshrl.u32 %v6406_v6, 4 }
 0x1da   : > { %3852 = vst [vmem:[%s6169_s14 + $0x60] sm:$0xff] %v3784_v14   ;;  %v3189_v55 = vadd.f32 %v3188_v43, %v2896_v4  ;;  %v3289_v33 = vadd.f32 %v3288_v52, %v3242_v59  ;;  %v4131_v32 = vadd.f32 %v1782_v9, %v1535_v15  ;;  %v4029_v49 = vpop.f32.mrb[30].mxu1  ;;  %v6473_v31 = vsub.s32 %v6179_v46, %v2471_v25 }
 0x1db   : > { %v4132_v19 = vadd.f32 %v4081_v62, %v4029_v49  ;;  %v1538_v54 = vpop.f32.mrb[31].mxu1  ;;  %v2900_v50 = vmul.f32 %v4130_v45, %v6847_v34  ;;  %v2481_v6 = vshrl.u32 %v6424_v12, 4  ;;  %v2721_v21 = vsel %vm6455_vm2, %v6436_v57, %v6402_v0 }
 0x1dc   : > { %v3290_v27 = vadd.f32 %v3289_v33, %v3243_v22  ;;  %v2898_v20 = vmul.f32 %v4131_v32, %v6844_v3  ;;  %v3190_v28 = vadd.f32 %v3189_v55, %v2897_v42  ;;  %v4133_v24 = vadd.f32 %v1785_v61, %v1538_v54  ;;  %v6850_v33 = vld [vmem:[#allocation24_spill] sm:$0xff] }
 0x1dd   : > { %v2901_v40 = vmul.f32 %v4132_v19, %v6848_v10  ;;  %v2719_v46 = vsel %vm6466_vm3, %v2671_v48, %v6432_v58  ;;  %v2449_v12 = vmul.u32 24, %v2448_v17  ;;  %vm2532_vm6 = vcmp.ne.s32.totalorder %v6473_v31, 0  ;;  %v6853_v19 = vld [vmem:[#allocation23_spill] sm:$0xff] }
 0x1de   : > { %v3191_v41 = vadd.f32 %v3190_v28, %v2898_v20  ;;  %v3245_v26 = vmul.f32 %v2898_v20, %v2898_v20  ;;  %v3291_v30 = vadd.f32 %v3290_v27, %v3244_v18  ;;  %v2899_v4 = vmul.f32 %v4133_v24, %v6849_v44  ;;  %v4084_v47 = vpop.f32.mrb[32].mxu0  ;;  %v6855_v28 = vld [vmem:[#allocation26_spill] sm:$0xff] }
 0x1df   : > { %v3799_v42 = vpack.c.bf16 %v2901_v40, %v2900_v50  ;;  %v1798_v7 = vpop.f32.mrb[33].mxu0  ;;  %v2482_v59 = vmul.u32 24, %v2481_v6  ;;  %v2459_v0 = vshrl.u32 %v6445_v51, 4  ;;  %v3247_v57 = vmul.f32 %v2900_v50, %v2900_v50 }
 0x1e0   : > { %v3292_v23 = vadd.f32 %v3291_v30, %v3245_v26  ;;  %v3794_v60 = vpack.c.bf16 %v2899_v4, %v2898_v20  ;;  %v3192_v53 = vadd.f32 %v3191_v41, %v2899_v4  ;;  %v3246_v38 = vmul.f32 %v2899_v4, %v2899_v4  ;;  %v4032_v9 = vpop.f32.mrb[32].mxu1  ;;  %v4085_v16 = vpop.f32.mrb[34].mxu0 }
 0x1e1   : > { %3855 = vst [vmem:[%s6169_s14 + $0x78] sm:$0xff] %v3799_v42   ;;  %v4134_v52 = vadd.f32 %v4084_v47, %v4032_v9  ;;  %v1551_v14 = vpop.f32.mrb[33].mxu1  ;;  %v1801_v43 = vpop.f32.mrb[35].mxu0  ;;  %v3248_v15 = vmul.f32 %v2901_v40, %v2901_v40  ;;  %vm2580_vm7 = vcmp.lt.s32.totalorder %v6473_v31, 0  ;;  %v6490_v22 = vsub.s32 %v6222_v37, %v2449_v12 }
 0x1e2   : > { %3854 = vst [vmem:[%s6169_s14 + $0x70] sm:$0xff] %v3794_v60   ;;  %v3193_v58 = vadd.f32 %v3192_v53, %v2900_v50  ;;  %v3293_v5 = vadd.f32 %v3292_v23, %v3246_v38  ;;  %v4135_v62 = vadd.f32 %v1798_v7, %v1551_v14  ;;  %v4033_v45 = vpop.f32.mrb[34].mxu1  ;;  %vm6493_vm4 = vcmp.lt.s32.totalorder %v2721_v21, 16  ;;  %vm6528_vm12 = vmand %vm2580_vm7, %vm2532_vm6 }
 0x1e3   : > { %v4136_v61 = vadd.f32 %v4085_v16, %v4033_v45  ;;  %v1554_v25 = vpop.f32.mrb[35].mxu1  ;;  %v2904_v54 = vmul.f32 %v4134_v52, %v6853_v19  ;;  %v6500_v17 = vsub.s32 %v6266_v8, %v2482_v59  ;;  %v2460_v27 = vmul.u32 24, %v2459_v0 }
 0x1e4   : > { %v3294_v55 = vadd.f32 %v3293_v5, %v3247_v57  ;;  %v2902_v32 = vmul.f32 %v4135_v62, %v6850_v33  ;;  %v3194_v49 = vadd.f32 %v3193_v58, %v2901_v40  ;;  %v4137_v18 = vadd.f32 %v1801_v43, %v1554_v25 }
 0x1e5   : > { %v2905_v48 = vmul.f32 %v4136_v61, %v6854_v56  ;;  %vm6503_vm5 = vcmp.lt.s32.totalorder %v2719_v46, 16  ;;  %v6508_v40 = vadd.s32 24, %v6473_v31  ;;  %vm2530_vm8 = vcmp.ne.s32.totalorder %v6490_v22, 0 }
 0x1e6   : > { %v3195_v3 = vadd.f32 %v3194_v49, %v2902_v32  ;;  %v3249_v37 = vmul.f32 %v2902_v32, %v2902_v32  ;;  %v3295_v20 = vadd.f32 %v3294_v55, %v3248_v15  ;;  %v2903_v24 = vmul.f32 %v4137_v18, %v6855_v28  ;;  %v4088_v2 = vpop.f32.mrb[36].mxu0 }
 0x1e7   : > { %v3809_v50 = vpack.c.bf16 %v2905_v48, %v2904_v54  ;;  %v1814_v10 = vpop.f32.mrb[37].mxu0  ;;  %vm2578_vm9 = vcmp.lt.s32.totalorder %v6490_v22, 0  ;;  %v6514_v7 = vadd.s32 24, %v6490_v22  ;;  %vm2533_vm10 = vcmp.ne.s32.totalorder %v6500_v17, 0 }
 0x1e8   : > { %v3296_v8 = vadd.f32 %v3295_v20, %v3249_v37  ;;  %v3804_v6 = vpack.c.bf16 %v2903_v24, %v2902_v32  ;;  %v3196_v41 = vadd.f32 %v3195_v3, %v2903_v24  ;;  %v3250_v26 = vmul.f32 %v2903_v24, %v2903_v24  ;;  %v4036_v30 = vpop.f32.mrb[36].mxu1  ;;  %v4089_v44 = vpop.f32.mrb[38].mxu0  ;;  %vm6538_vm13 = vmand %vm2578_vm9, %vm2530_vm8 }
 0x1e9   : > { %3857 = vst [vmem:[%s6169_s14 + $0x88] sm:$0xff] %v3809_v50   ;;  %v4138_v4 = vadd.f32 %v4088_v2, %v4036_v30  ;;  %v1567_v47 = vpop.f32.mrb[37].mxu1  ;;  %v1817_v42 = vpop.f32.mrb[39].mxu0  ;;  %v6518_v21 = vsub.s32 %v6313_v39, %v2460_v27  ;;  %v3251_v46 = vmul.f32 %v2904_v54, %v2904_v54  ;;  %v3252_v38 = vmul.f32 %v2905_v48, %v2905_v48 }
 0x1ea   : > { %3856 = vst [vmem:[%s6169_s14 + $0x80] sm:$0xff] %v3804_v6   ;;  %v3197_v12 = vadd.f32 %v3196_v41, %v2904_v54  ;;  %v3297_v23 = vadd.f32 %v3296_v8, %v3250_v26  ;;  %v4139_v60 = vadd.f32 %v1814_v10, %v1567_v47  ;;  %v4037_v53 = vpop.f32.mrb[38].mxu1  ;;  %vm2581_vm11 = vcmp.lt.s32.totalorder %v6500_v17, 0 }
 0x1eb   : > { %v4140_v9 = vadd.f32 %v4089_v44, %v4037_v53  ;;  %v1570_v16 = vpop.f32.mrb[39].mxu1  ;;  %v2677_v52 = vadd.s32 24, %v6500_v17  ;;  %v2908_v57 = vmul.f32 %v4138_v4, %v6260_v13  ;;  %vm2531_vm14 = vcmp.ne.s32.totalorder %v6518_v21, 0  ;;  %vm6549_vm0 = vmand %vm2581_vm11, %vm2533_vm10 }
 0x1ec   : > { %v3298_v14 = vadd.f32 %v3297_v23, %v3251_v46  ;;  %v2906_v43 = vmul.f32 %v4139_v60, %v6281_v35  ;;  %v3198_v59 = vadd.f32 %v3197_v12, %v2905_v48  ;;  %v4141_v0 = vadd.f32 %v1817_v42, %v1570_v16 }
 0x1ed   : > { %v2909_v58 = vmul.f32 %v4140_v9, %v6380_v11  ;;  %vm2579_vm15 = vcmp.lt.s32.totalorder %v6518_v21, 0  ;;  %v3618_v55 = vsel %vm6493_vm4, 1.0, %v6742_v1  ;;  %v2675_v33 = vadd.s32 24, %v6518_v21 }
 0x1ee   : > { %v3199_v5 = vadd.f32 %v3198_v59, %v2906_v43  ;;  %v3253_v62 = vmul.f32 %v2906_v43, %v2906_v43  ;;  %v3299_v45 = vadd.f32 %v3298_v14, %v3252_v38  ;;  %v2907_v13 = vmul.f32 %v4141_v0, %v6399_v36  ;;  %v4092_v15 = vpop.f32.mrb[40].mxu0  ;;  %vm6565_vm1 = vmand %vm2579_vm15, %vm2531_vm14 }
 0x1ef   : > { %v3819_v61 = vpack.c.bf16 %v2909_v58, %v2908_v57  ;;  %v1830_v25 = vpop.f32.mrb[41].mxu0  ;;  %v2724_v36 = vsel %vm6528_vm12, %v6508_v40, %v6473_v31  ;;  %v3616_v3 = vsel %vm6503_vm5, 1.0, %v6742_v1  ;;  %v2722_v37 = vsel %vm6538_vm13, %v6514_v7, %v6490_v22 }
 0x1f0   : > { %v3300_v32 = vadd.f32 %v3299_v45, %v3253_v62  ;;  %v3814_v49 = vpack.c.bf16 %v2907_v13, %v2906_v43  ;;  %v3200_v18 = vadd.f32 %v3199_v5, %v2907_v13  ;;  %v3254_v19 = vmul.f32 %v2907_v13, %v2907_v13  ;;  %v4040_v54 = vpop.f32.mrb[40].mxu1  ;;  %v4093_v56 = vpop.f32.mrb[42].mxu0 }
 0x1f1   : > { %3859 = vst [vmem:[%s6169_s14 + $0x98] sm:$0xff] %v3819_v61   ;;  %v4142_v48 = vadd.f32 %v4092_v15, %v4040_v54  ;;  %v1583_v31 = vpop.f32.mrb[41].mxu1  ;;  %v1833_v27 = vpop.f32.mrb[43].mxu0  ;;  %v2725_v20 = vsel %vm6549_vm0, %v2677_v52, %v6500_v17  ;;  %v3255_v28 = vmul.f32 %v2908_v57, %v2908_v57  ;;  %v3256_v40 = vmul.f32 %v2909_v58, %v2909_v58 }
 0x1f2   : > { %3858 = vst [vmem:[%s6169_s14 + $0x90] sm:$0xff] %v3814_v49   ;;  %v3201_v24 = vadd.f32 %v3200_v18, %v2908_v57  ;;  %v3301_v2 = vadd.f32 %v3300_v32, %v3254_v19  ;;  %v4143_v50 = vadd.f32 %v1830_v25, %v1583_v31  ;;  %v4041_v10 = vpop.f32.mrb[42].mxu1  ;;  %vm6581_vm2 = vcmp.lt.s32.totalorder %v2724_v36, 16 }
 0x1f3   : > { %v4144_v8 = vadd.f32 %v4093_v56, %v4041_v10  ;;  %v1586_v6 = vpop.f32.mrb[43].mxu1  ;;  %v2723_v22 = vsel %vm6565_vm1, %v2675_v33, %v6518_v21  ;;  %v2912_v44 = vmul.f32 %v4142_v48, %v6415_v29  ;;  %vm6590_vm3 = vcmp.lt.s32.totalorder %v2722_v37, 16 }
 0x1f4   : > { %v3302_v41 = vadd.f32 %v3301_v2, %v3255_v28  ;;  %v2910_v17 = vmul.f32 %v4143_v50, %v6441_v63  ;;  %v3202_v26 = vadd.f32 %v3201_v24, %v2909_v58  ;;  %v4145_v30 = vadd.f32 %v1833_v27, %v1586_v6 }
 0x1f5   : > { %v2913_v4 = vmul.f32 %v4144_v8, %v3618_v55  ;;  %vm6594_vm6 = vcmp.lt.s32.totalorder %v2725_v20, 16  ;;  %vm6598_vm7 = vcmp.lt.s32.totalorder %v2723_v22, 16  ;;  %v3621_v59 = vsel %vm6581_vm2, 1.0, %v6742_v1 }
 0x1f6   : > { %v3203_v7 = vadd.f32 %v3202_v26, %v2910_v17  ;;  %v3257_v46 = vmul.f32 %v2910_v17, %v2910_v17  ;;  %v3303_v21 = vadd.f32 %v3302_v41, %v3256_v40  ;;  %v2911_v12 = vmul.f32 %v4145_v30, %v3616_v3  ;;  %v4096_v23 = vpop.f32.mrb[44].mxu0 }
 0x1f7   : > { %v3829_v63 = vpack.c.bf16 %v2913_v4, %v2912_v44  ;;  %v1846_v60 = vpop.f32.mrb[45].mxu0  ;;  %v3619_v39 = vsel %vm6590_vm3, 1.0, %v6742_v1  ;;  %v3622_v58 = vsel %vm6594_vm6, 1.0, %v6742_v1  ;;  %v3259_v35 = vmul.f32 %v2912_v44, %v2912_v44 }
 0x1f8   : > { %v3304_v53 = vadd.f32 %v3303_v21, %v3257_v46  ;;  %v3824_v38 = vpack.c.bf16 %v2911_v12, %v2910_v17  ;;  %v3204_v9 = vadd.f32 %v3203_v7, %v2911_v12  ;;  %v3258_v16 = vmul.f32 %v2911_v12, %v2911_v12  ;;  %v4044_v52 = vpop.f32.mrb[44].mxu1  ;;  %v4097_v14 = vpop.f32.mrb[46].mxu0 }
 0x1f9   : > { %3861 = vst [vmem:[%s6169_s14 + $0xa8] sm:$0xff] %v3829_v63   ;;  %v4146_v43 = vadd.f32 %v4096_v23, %v4044_v52  ;;  %v1599_v0 = vpop.f32.mrb[45].mxu1  ;;  %v1849_v57 = vpop.f32.mrb[47].mxu0  ;;  %v3260_v15 = vmul.f32 %v2913_v4, %v2913_v4  ;;  %v3620_v25 = vsel %vm6598_vm7, 1.0, %v6742_v1 }
 0x1fa   : > { %3860 = vst [vmem:[%s6169_s14 + $0xa0] sm:$0xff] %v3824_v38   ;;  %v3205_v5 = vadd.f32 %v3204_v9, %v2912_v44  ;;  %v3305_v62 = vadd.f32 %v3304_v53, %v3258_v16  ;;  %v4147_v45 = vadd.f32 %v1846_v60, %v1599_v0  ;;  %v4045_v13 = vpop.f32.mrb[46].mxu1 }
 0x1fb   : > { %v4148_v11 = vadd.f32 %v4097_v14, %v4045_v13  ;;  %v1602_v61 = vpop.f32.mrb[47].mxu1  ;;  %v2916_v49 = vmul.f32 %v4146_v43, %v3621_v59 }
 0x1fc   : > { %v3306_v55 = vadd.f32 %v3305_v62, %v3259_v35  ;;  %v2914_v36 = vmul.f32 %v4147_v45, %v3619_v39  ;;  %v3206_v33 = vadd.f32 %v3205_v5, %v2913_v4  ;;  %v4149_v32 = vadd.f32 %v1849_v57, %v1602_v61 }
 0x1fd   : > { %v2917_v18 = vmul.f32 %v4148_v11, %v3622_v58  ;;  %v3263_v1 = vmul.f32 %v2916_v49, %v2916_v49 }
 0x1fe   : > { %v3207_v19 = vadd.f32 %v3206_v33, %v2914_v36  ;;  %v3261_v54 = vmul.f32 %v2914_v36, %v2914_v36  ;;  %v3307_v56 = vadd.f32 %v3306_v55, %v3260_v15  ;;  %v2915_v51 = vmul.f32 %v4149_v32, %v3620_v25 }
 0x1ff   : > { %v3839_v48 = vpack.c.bf16 %v2917_v18, %v2916_v49  ;;  %v3264_v24 = vmul.f32 %v2917_v18, %v2917_v18 }
 0x200   : > { %v3308_v31 = vadd.f32 %v3307_v56, %v3261_v54  ;;  %v3834_v27 = vpack.c.bf16 %v2915_v51, %v2914_v36  ;;  %v3208_v3 = vadd.f32 %v3207_v19, %v2915_v51  ;;  %v3262_v37 = vmul.f32 %v2915_v51, %v2915_v51 }
 0x201   : > { %3863 = vst [vmem:[%s6169_s14 + $0xb8] sm:$0xff] %v3839_v48  }
 0x202   : > { %3862 = vst [vmem:[%s6169_s14 + $0xb0] sm:$0xff] %v3834_v27   ;;  %v3209_v20 = vadd.f32 %v3208_v3, %v2916_v49  ;;  %v3309_v28 = vadd.f32 %v3308_v31, %v3262_v37 }
 0x204   : > { %v3210_v2 = vadd.f32 %v3209_v20, %v2917_v18  ;;  %v3310_v50 = vadd.f32 %v3309_v28, %v3263_v1 }
 0x206   : > { %v3211_v10 = vrot.slane %v3210_v2, 4  ;;  %v3311_v40 = vadd.f32 %v3310_v50, %v3264_v24 }
 0x208   : > { %v3212_v8 = vadd.f32 %v3211_v10, %v3210_v2  ;;  %v3312_v6 = vrot.slane %v3311_v40, 4 }
 0x20a   : > { %v3213_v34 = vrot.slane %v3212_v8, 2  ;;  %v3313_v22 = vadd.f32 %v3312_v6, %v3311_v40 }
 0x20c   : > { %v3214_v41 = vadd.f32 %v3213_v34, %v3212_v8  ;;  %v3314_v17 = vrot.slane %v3313_v22, 2 }
 0x20e   : > { %v3215_v26 = vrot.slane %v3214_v41, 1  ;;  %v3315_v30 = vadd.f32 %v3314_v17, %v3313_v22 }
 0x210   : > { %v3216_v44 = vadd.f32 %v3215_v26, %v3214_v41  ;;  %v3316_v4 = vrot.slane %v3315_v30, 1 }
 0x212   : > { %v3317_v47 = vadd.f32 %v3316_v4, %v3315_v30  ;;  %3320 = vst [vmem:[%s238_s22] sm:$0xff] %v3216_v44 }
 0x214   : > { %3323 = vst [vmem:[%s242_s25] sm:$0xff] %v3317_v47 }
 0x215 PF: > { %s15_s17 = sadd.s32 1, %s4384_s17   ;;  %s6874_s15 = smov %s4380_s16 }
 0x216   : > { %p12_p5 = scmp.ge.s32.totalorder %s15_s17, 4   ;;  %s6875_s16 = smov %s6877_s18 }
 0x218   :  { %14 = sbr.rel (!%p12_p5) target bundleno = 2 (0x2), region = 88 }

</bundles_post_ra>
